<compile_context>
chip_gen: v7x
topology: tpu7x:2x2x1
jax: 0.10.0
libtpu: 0.0.40
codegen_flags: <defaults>
</compile_context>

<pallas_src>
import functools

import jax
import jax.numpy as jnp
import numpy as np
from jax.experimental import pallas as pl
from jax.experimental.pallas import tpu as pltpu

KERNEL_SIZE = 7
PAD = KERNEL_SIZE // 2
SUBLANE = 8


def convgate_kernel(x_ref, wconv_ref, wout_ref, bout_ref, g_ref, o_ref, slab_ref):
    """Processes a block of batch elements in one grid step.

    x_ref    : (bpb, cp, n + 6)  zero-padded input (channels padded to cp=8), NCL
    wconv_ref: (2H, 7*cp)        im2col conv weight (padded channel cols are 0)
    wout_ref : (dim, H)          1x1 conv weight
    bout_ref : (dim, 1)          1x1 conv bias
    g_ref    : (dim, 1)          RMSNorm gain
    o_ref    : (bpb, dim, n)     output, native NCL
    slab_ref : (7*cp, n)         im2col scratch (every row written each iter)
    """
    bpb, cp, _ = x_ref.shape
    n = o_ref.shape[2]
    h = wout_ref.shape[1]
    dim = o_ref.shape[1]

    # Full f32 MXU precision when operands are f32; with bf16 operands the MXU
    # products are already exact, so no precision override is needed.
    mxu_prec = (jax.lax.Precision.HIGHEST
                if wconv_ref.dtype == jnp.float32 else None)

    # Hoisted loop-invariant loads / broadcasts (JAX does not CSE these).
    wconv = wconv_ref[...]                                          # (2H, 7*cp)
    wout = wout_ref[...]                                            # (dim, H)
    bias = jnp.broadcast_to(bout_ref[...].astype(jnp.float32), (dim, n))
    gscale = jnp.broadcast_to(
        g_ref[...].astype(jnp.float32) * jnp.sqrt(jnp.float32(dim)), (dim, n))

    # Static batch loop (bpb is tiny here).  For bpb > 2 / large n, use
    # lax.fori_loop with dynamic ref indexing to bound vreg live ranges.
    for bi in range(bpb):
        # im2col: slab[k*cp + ci, p] = x_pad[ci, p + k]  (= x[ci, p + k - 3]).
        # Full cp-row tap blocks -> sublane-aligned, unmasked-sublane stores;
        # padded channel rows are guaranteed zero from the HBM pad.
        for k in range(KERNEL_SIZE):
            slab_ref[k * cp:(k + 1) * cp, :] = (
                x_ref[bi, :, k:k + n].astype(slab_ref.dtype))

        # depth-7 conv as ONE MXU matmul: (2H, 7*cp) @ (7*cp, n) -> (2H, n)
        wv = jnp.dot(wconv, slab_ref[...],
                     preferred_element_type=jnp.float32, precision=mxu_prec)

        w = wv[:h, :]   # (H, n) -- aligned sublane slices
        v = wv[h:, :]   # (H, n)

        # Softmax over the sequence axis (lanes); per-channel, so the
        # (heads, dim_head) split of H is irrelevant.  Exact reciprocal.
        w = w - jnp.max(w, axis=1, keepdims=True)
        e = jnp.exp(w)
        p = e * pl.reciprocal(jnp.sum(e, axis=1, keepdims=True), approx=False)

        gated = (p * v).astype(wout.dtype)   # (H, n)

        # 1x1 conv == channel matmul + bias: (dim, H) @ (H, n) -> (dim, n)
        y = jnp.dot(wout, gated,
                    preferred_element_type=jnp.float32, precision=mxu_prec)
        y = y + bias

        # RMSNorm over channels: F.normalize(y, dim=1) * g * sqrt(dim)
        ss = jnp.sum(y * y, axis=0, keepdims=True)            # (1, n)
        y = y * jax.lax.rsqrt(jnp.maximum(ss, 1e-24))
        y = y * gscale

        o_ref[bi] = y.astype(o_ref.dtype)


@functools.partial(jax.jit,
                   static_argnames=("heads", "batch_blocks", "use_bf16_mxu"))
def convgate_forward(x, w_conv, w_out, b_out, g, heads=4,
                     batch_blocks=1, use_bf16_mxu=False):
    """x: (b, dim, n) f32 NCL; w_conv: (2H, dim, 7) torch Conv1d weight;
    w_out: (dim, H); b_out: (dim,); g: (dim,).  Returns (b, dim, n) in NCL.

    batch_blocks: 1 for single-TC chips (v5e/v6e); 2 on v7x to use both TCs.
    use_bf16_mxu: cast MXU operands to bf16 (f32 accumulation/elementwise) --
                  recommended for production shapes on v6e/v7x.
    """
    b, c, n = x.shape
    two_h = w_conv.shape[0]
    hidden = two_h // 2
    dim = w_out.shape[0]
    # `heads` only affects a reshape around a per-channel softmax -> unused.

    assert b % batch_blocks == 0
    bpb = b // batch_blocks

    mxu_dtype = jnp.bfloat16 if use_bf16_mxu else jnp.float32

    # Channel pad to a full sublane block + halo pad on the lane axis, all in
    # native NCL (no wrapper transposes).  The zero channel rows meet zero
    # weight columns, so results are unchanged.
    cp = -(-c // SUBLANE) * SUBLANE
    x_pad = jnp.pad(x, ((0, 0), (0, cp - c), (PAD, PAD)))

    # Kernel-ready conv weight: tap-major im2col columns, each tap padded to a
    # full 8-sublane block so the in-kernel slab stores are sublane-aligned.
    w_t = jnp.transpose(w_conv, (0, 2, 1))                    # (2H, 7, c)
    w_t = jnp.pad(w_t, ((0, 0), (0, 0), (0, cp - c)))         # (2H, 7, cp)
    w_conv2 = w_t.reshape(two_h, KERNEL_SIZE * cp).astype(mxu_dtype)
    w_out_k = w_out.astype(mxu_dtype)

    cost = pl.CostEstimate(
        flops=2 * (two_h * KERNEL_SIZE * cp + dim * hidden) * n * b,
        transcendentals=hidden * n * b,
        bytes_accessed=4 * (x_pad.size + w_conv2.size + w_out.size
                            + b_out.size + g.size + b * dim * n),
    )

    out = pl.pallas_call(
        convgate_kernel,
        out_shape=jax.ShapeDtypeStruct((b, dim, n), x.dtype),
        grid_spec=pltpu.PrefetchScalarGridSpec(
            num_scalar_prefetch=0,
            grid=(batch_blocks,),
            in_specs=[
                pl.BlockSpec((bpb, cp, n + 2 * PAD), lambda i: (i, 0, 0)),
                pl.BlockSpec((two_h, KERNEL_SIZE * cp), lambda i: (0, 0)),
                pl.BlockSpec((dim, hidden), lambda i: (0, 0)),
                pl.BlockSpec((dim, 1), lambda i: (0, 0)),
                pl.BlockSpec((dim, 1), lambda i: (0, 0)),
            ],
            out_specs=pl.BlockSpec((bpb, dim, n), lambda i: (i, 0, 0)),
            scratch_shapes=[pltpu.VMEM((KERNEL_SIZE * cp, n), mxu_dtype)],
        ),
        compiler_params=pltpu.CompilerParams(
            dimension_semantics=("parallel",),
        ),
        cost_estimate=cost,
    )(x_pad, w_conv2, w_out_k, b_out.reshape(dim, 1), g.reshape(dim, 1))

    return out  # already NCL, no post-kernel transpose


def ref_forward(x, w_conv, w_out, b_out, g, heads=4):
    """Pure-JAX reference mirroring the PyTorch module (full f32 precision)."""
    b, c, n = x.shape
    wv = jax.lax.conv_general_dilated(
        x, w_conv, window_strides=(1,), padding=[(PAD, PAD)],
        dimension_numbers=("NCH", "OIH", "NCH"),
        precision=jax.lax.Precision.HIGHEST)
    hidden = wv.shape[1] // 2
    dim_head = hidden // heads
    w, v = wv[:, :hidden], wv[:, hidden:]
    w = w.reshape(b, heads, dim_head, n)
    v = v.reshape(b, heads, dim_head, n)
    w = jax.nn.softmax(w, axis=-1)
    out = (w * v).reshape(b, hidden, n)
    y = jnp.einsum("oc,bcn->bon", w_out, out,
                   precision=jax.lax.Precision.HIGHEST) + b_out[None, :, None]
    norm = jnp.sqrt(jnp.sum(y * y, axis=1, keepdims=True))
    y = y / jnp.maximum(norm, 1e-12)
    return y * g[None, :, None] * jnp.sqrt(jnp.float32(y.shape[1]))


if __name__ == "__main__":
    # Module hyper-params (from __init__): dim=4, heads=4, dim_head=32
    dim, heads, dim_head = 4, 4, 32
    hidden = heads * dim_head  # 128
    b, n = 2, 16

    key = jax.random.PRNGKey(0)
    k_x, k_w1, k_w2, k_b2 = jax.random.split(key, 4)

    x = jax.random.normal(k_x, (b, dim, n), jnp.float32)
    # to_wv: Conv1d(dim, 2*hidden, k=7, bias=False); torch weight layout (2H, dim, 7)
    w_conv = 0.1 * jax.random.normal(k_w1, (2 * hidden, dim, KERNEL_SIZE), jnp.float32)
    # to_out[0]: Conv1d(hidden, dim, 1) with bias; weight squeezed to (dim, hidden)
    w_out = 0.1 * jax.random.normal(k_w2, (dim, hidden), jnp.float32)
    b_out = 0.1 * jax.random.normal(k_b2, (dim,), jnp.float32)
    # RMSNorm gain, initialized to ones as in the module
    g = jnp.ones((dim,), jnp.float32)

    out = convgate_forward(x, w_conv, w_out, b_out, g, heads=heads,
                           batch_blocks=1, use_bf16_mxu=False)
    out = jax.block_until_ready(out)

    ref = ref_forward(x, w_conv, w_out, b_out, g, heads=heads)
    # Both sides run at full-f32 matmul precision (diffs ~1e-6); the 5e-3
    # tolerance leaves headroom for backends that fall back to mixed-precision
    # MXU passes.
    np.testing.assert_allclose(np.asarray(out), np.asarray(ref),
                               rtol=5e-3, atol=5e-3)

    print("KERNEL_OK")
</pallas_src>

<mosaic_0001>
module attributes {stable_mosaic.version = 11 : i64} {
  func.func @convgate_kernel(%arg0: i32, %arg1: memref<2x8x22xf32, #tpu.memory_space<vmem>>, %arg2: memref<256x56xf32, #tpu.memory_space<vmem>>, %arg3: memref<4x128xf32, #tpu.memory_space<vmem>>, %arg4: memref<4x1xf32, #tpu.memory_space<vmem>>, %arg5: memref<4x1xf32, #tpu.memory_space<vmem>>, %arg6: memref<2x4x16xf32, #tpu.memory_space<vmem>>, %arg7: memref<56x16xf32, #tpu.memory_space<vmem>>) attributes {dimension_semantics = [#tpu.dimension_semantics<parallel>], iteration_bounds = array<i64: 1>, scalar_prefetch = 0 : i64, scratch_operands = 1 : i64, tpu.core_type = #tpu.core_type<tc>, window_params = [{transform_indices = @transform_0, window_bounds = array<i64: 2, 8, 22>}, {pipeline_mode = #tpu.pipeline_mode<synchronous>, transform_indices = @transform_1, window_bounds = array<i64: 256, 56>}, {pipeline_mode = #tpu.pipeline_mode<synchronous>, transform_indices = @transform_2, window_bounds = array<i64: 4, 128>}, {pipeline_mode = #tpu.pipeline_mode<synchronous>, transform_indices = @transform_3, window_bounds = array<i64: 4, 1>}, {pipeline_mode = #tpu.pipeline_mode<synchronous>, transform_indices = @transform_4, window_bounds = array<i64: 4, 1>}, {transform_indices = @transform_5, window_bounds = array<i64: 2, 4, 16>}]} {
    %c0 = arith.constant 0 : index
    %c0_0 = arith.constant 0 : index
    %0 = vector.load %arg2[%c0, %c0_0] : memref<256x56xf32, #tpu.memory_space<vmem>>, vector<256x56xf32>
    %c0_1 = arith.constant 0 : index
    %c0_2 = arith.constant 0 : index
    %1 = vector.load %arg3[%c0_1, %c0_2] : memref<4x128xf32, #tpu.memory_space<vmem>>, vector<4x128xf32>
    %c0_3 = arith.constant 0 : index
    %c0_4 = arith.constant 0 : index
    %2 = vector.load %arg4[%c0_3, %c0_4] : memref<4x1xf32, #tpu.memory_space<vmem>>, vector<4x1xf32>
    %3 = vector.shape_cast %2 : vector<4x1xf32> to vector<4x1xf32>
    %4 = vector.broadcast %3 : vector<4x1xf32> to vector<4x16xf32>
    %c0_5 = arith.constant 0 : index
    %c0_6 = arith.constant 0 : index
    %5 = vector.load %arg5[%c0_5, %c0_6] : memref<4x1xf32, #tpu.memory_space<vmem>>, vector<4x1xf32>
    %cst = arith.constant 4.000000e+00 : f32
    %6 = math.sqrt %cst : f32
    %7 = vector.broadcast %6 : f32 to vector<4x1xf32>
    %8 = arith.mulf %5, %7 : vector<4x1xf32>
    %9 = vector.shape_cast %8 : vector<4x1xf32> to vector<4x1xf32>
    %10 = vector.broadcast %9 : vector<4x1xf32> to vector<4x16xf32>
    %c0_7 = arith.constant 0 : index
    %c0_8 = arith.constant 0 : index
    %c0_9 = arith.constant 0 : index
    %11 = vector.load %arg1[%c0_7, %c0_8, %c0_9] : memref<2x8x22xf32, #tpu.memory_space<vmem>>, vector<1x8x16xf32>
    %12 = vector.shape_cast %11 : vector<1x8x16xf32> to vector<8x16xf32>
    %c0_10 = arith.constant 0 : index
    %c0_11 = arith.constant 0 : index
    %13 = vector.load %arg7[%c0_10, %c0_11] : memref<56x16xf32, #tpu.memory_space<vmem>>, vector<8x16xf32>
    tpu.vector_store %arg7[%c0_10, %c0_11], %12 {strides = array<i32>} : memref<56x16xf32, #tpu.memory_space<vmem>>, vector<8x16xf32>,
    %c0_12 = arith.constant 0 : index
    %c0_13 = arith.constant 0 : index
    %c1 = arith.constant 1 : index
    %14 = vector.load %arg1[%c0_12, %c0_13, %c1] : memref<2x8x22xf32, #tpu.memory_space<vmem>>, vector<1x8x16xf32>
    %15 = vector.shape_cast %14 : vector<1x8x16xf32> to vector<8x16xf32>
    %c8 = arith.constant 8 : index
    %c0_14 = arith.constant 0 : index
    %16 = vector.load %arg7[%c8, %c0_14] : memref<56x16xf32, #tpu.memory_space<vmem>>, vector<8x16xf32>
    tpu.vector_store %arg7[%c8, %c0_14], %15 {strides = array<i32>} : memref<56x16xf32, #tpu.memory_space<vmem>>, vector<8x16xf32>,
    %c0_15 = arith.constant 0 : index
    %c0_16 = arith.constant 0 : index
    %c2 = arith.constant 2 : index
    %17 = vector.load %arg1[%c0_15, %c0_16, %c2] : memref<2x8x22xf32, #tpu.memory_space<vmem>>, vector<1x8x16xf32>
    %18 = vector.shape_cast %17 : vector<1x8x16xf32> to vector<8x16xf32>
    %c16 = arith.constant 16 : index
    %c0_17 = arith.constant 0 : index
    %19 = vector.load %arg7[%c16, %c0_17] : memref<56x16xf32, #tpu.memory_space<vmem>>, vector<8x16xf32>
    tpu.vector_store %arg7[%c16, %c0_17], %18 {strides = array<i32>} : memref<56x16xf32, #tpu.memory_space<vmem>>, vector<8x16xf32>,
    %c0_18 = arith.constant 0 : index
    %c0_19 = arith.constant 0 : index
    %c3 = arith.constant 3 : index
    %20 = vector.load %arg1[%c0_18, %c0_19, %c3] : memref<2x8x22xf32, #tpu.memory_space<vmem>>, vector<1x8x16xf32>
    %21 = vector.shape_cast %20 : vector<1x8x16xf32> to vector<8x16xf32>
    %c24 = arith.constant 24 : index
    %c0_20 = arith.constant 0 : index
    %22 = vector.load %arg7[%c24, %c0_20] : memref<56x16xf32, #tpu.memory_space<vmem>>, vector<8x16xf32>
    tpu.vector_store %arg7[%c24, %c0_20], %21 {strides = array<i32>} : memref<56x16xf32, #tpu.memory_space<vmem>>, vector<8x16xf32>,
    %c0_21 = arith.constant 0 : index
    %c0_22 = arith.constant 0 : index
    %c4 = arith.constant 4 : index
    %23 = vector.load %arg1[%c0_21, %c0_22, %c4] : memref<2x8x22xf32, #tpu.memory_space<vmem>>, vector<1x8x16xf32>
    %24 = vector.shape_cast %23 : vector<1x8x16xf32> to vector<8x16xf32>
    %c32 = arith.constant 32 : index
    %c0_23 = arith.constant 0 : index
    %25 = vector.load %arg7[%c32, %c0_23] : memref<56x16xf32, #tpu.memory_space<vmem>>, vector<8x16xf32>
    tpu.vector_store %arg7[%c32, %c0_23], %24 {strides = array<i32>} : memref<56x16xf32, #tpu.memory_space<vmem>>, vector<8x16xf32>,
    %c0_24 = arith.constant 0 : index
    %c0_25 = arith.constant 0 : index
    %c5 = arith.constant 5 : index
    %26 = vector.load %arg1[%c0_24, %c0_25, %c5] : memref<2x8x22xf32, #tpu.memory_space<vmem>>, vector<1x8x16xf32>
    %27 = vector.shape_cast %26 : vector<1x8x16xf32> to vector<8x16xf32>
    %c40 = arith.constant 40 : index
    %c0_26 = arith.constant 0 : index
    %28 = vector.load %arg7[%c40, %c0_26] : memref<56x16xf32, #tpu.memory_space<vmem>>, vector<8x16xf32>
    tpu.vector_store %arg7[%c40, %c0_26], %27 {strides = array<i32>} : memref<56x16xf32, #tpu.memory_space<vmem>>, vector<8x16xf32>,
    %c0_27 = arith.constant 0 : index
    %c0_28 = arith.constant 0 : index
    %c6 = arith.constant 6 : index
    %29 = vector.load %arg1[%c0_27, %c0_28, %c6] : memref<2x8x22xf32, #tpu.memory_space<vmem>>, vector<1x8x16xf32>
    %30 = vector.shape_cast %29 : vector<1x8x16xf32> to vector<8x16xf32>
    %c48 = arith.constant 48 : index
    %c0_29 = arith.constant 0 : index
    %31 = vector.load %arg7[%c48, %c0_29] : memref<56x16xf32, #tpu.memory_space<vmem>>, vector<8x16xf32>
    tpu.vector_store %arg7[%c48, %c0_29], %30 {strides = array<i32>} : memref<56x16xf32, #tpu.memory_space<vmem>>, vector<8x16xf32>,
    %c0_30 = arith.constant 0 : index
    %c0_31 = arith.constant 0 : index
    %32 = vector.load %arg7[%c0_30, %c0_31] : memref<56x16xf32, #tpu.memory_space<vmem>>, vector<56x16xf32>
    %cst_32 = arith.constant dense<0.000000e+00> : vector<256x16xf32>
    %33 = tpu.matmul %0, %32, %cst_32 {dimension_numbers = #tpu.dot_dimension_numbers<[1], [0], [0], [1], [0, 0, 1, 1], [], []>, precision = #tpu.contract_precision<fp32>} : vector<256x56xf32>, vector<56x16xf32>, vector<256x16xf32> -> vector<256x16xf32>
    %34 = vector.extract_strided_slice %33 {offsets = [0, 0], sizes = [128, 16], strides = [1, 1]} : vector<256x16xf32> to vector<128x16xf32>
    %35 = vector.extract_strided_slice %33 {offsets = [128, 0], sizes = [128, 16], strides = [1, 1]} : vector<256x16xf32> to vector<128x16xf32>
    %cst_33 = arith.constant dense<0xFF800000> : vector<128xf32>
    %36 = vector.multi_reduction <maximumf>, %34, %cst_33 [1] : vector<128x16xf32> to vector<128xf32>
    %37 = vector.shape_cast %36 : vector<128xf32> to vector<128x1xf32>
    %38 = vector.broadcast %37 : vector<128x1xf32> to vector<128x16xf32>
    %39 = arith.subf %34, %38 : vector<128x16xf32>
    %40 = math.exp %39 : vector<128x16xf32>
    %cst_34 = arith.constant dense<0.000000e+00> : vector<128xf32>
    %41 = vector.multi_reduction <add>, %40, %cst_34 [1] : vector<128x16xf32> to vector<128xf32>
    %42 = vector.shape_cast %41 : vector<128xf32> to vector<128x1xf32>
    %43 = tpu.reciprocal %42 : vector<128x1xf32> -> vector<128x1xf32>
    %44 = vector.broadcast %43 : vector<128x1xf32> to vector<128x16xf32>
    %45 = arith.mulf %40, %44 : vector<128x16xf32>
    %46 = arith.mulf %45, %35 : vector<128x16xf32>
    %cst_35 = arith.constant dense<0.000000e+00> : vector<4x16xf32>
    %47 = tpu.matmul %1, %46, %cst_35 {dimension_numbers = #tpu.dot_dimension_numbers<[1], [0], [0], [1], [0, 0, 1, 1], [], []>, precision = #tpu.contract_precision<fp32>} : vector<4x128xf32>, vector<128x16xf32>, vector<4x16xf32> -> vector<4x16xf32>
    %48 = arith.addf %47, %4 : vector<4x16xf32>
    %49 = arith.mulf %48, %48 : vector<4x16xf32>
    %cst_36 = arith.constant dense<0.000000e+00> : vector<16xf32>
    %50 = vector.multi_reduction <add>, %49, %cst_36 [0] : vector<4x16xf32> to vector<16xf32>
    %51 = vector.shape_cast %50 : vector<16xf32> to vector<1x16xf32>
    %cst_37 = arith.constant 1.000000e-24 : f32
    %52 = vector.broadcast %cst_37 : f32 to vector<1x16xf32>
    %53 = arith.maximumf %51, %52 : vector<1x16xf32>
    %54 = math.rsqrt %53 : vector<1x16xf32>
    %55 = vector.broadcast %54 : vector<1x16xf32> to vector<4x16xf32>
    %56 = arith.mulf %48, %55 : vector<4x16xf32>
    %57 = arith.mulf %56, %10 : vector<4x16xf32>
    %c0_38 = arith.constant 0 : index
    %c0_39 = arith.constant 0 : index
    %c0_40 = arith.constant 0 : index
    %58 = vector.load %arg6[%c0_38, %c0_39, %c0_40] : memref<2x4x16xf32, #tpu.memory_space<vmem>>, vector<1x4x16xf32>
    %59 = vector.shape_cast %58 : vector<1x4x16xf32> to vector<4x16xf32>
    %60 = vector.shape_cast %57 : vector<4x16xf32> to vector<1x4x16xf32>
    tpu.vector_store %arg6[%c0_38, %c0_39, %c0_40], %60 {strides = array<i32>} : memref<2x4x16xf32, #tpu.memory_space<vmem>>, vector<1x4x16xf32>,
    %c1_41 = arith.constant 1 : index
    %c0_42 = arith.constant 0 : index
    %c0_43 = arith.constant 0 : index
    %61 = vector.load %arg1[%c1_41, %c0_42, %c0_43] : memref<2x8x22xf32, #tpu.memory_space<vmem>>, vector<1x8x16xf32>
    %62 = vector.shape_cast %61 : vector<1x8x16xf32> to vector<8x16xf32>
    %c0_44 = arith.constant 0 : index
    %c0_45 = arith.constant 0 : index
    %63 = vector.load %arg7[%c0_44, %c0_45] : memref<56x16xf32, #tpu.memory_space<vmem>>, vector<8x16xf32>
    tpu.vector_store %arg7[%c0_44, %c0_45], %62 {strides = array<i32>} : memref<56x16xf32, #tpu.memory_space<vmem>>, vector<8x16xf32>,
    %c1_46 = arith.constant 1 : index
    %c0_47 = arith.constant 0 : index
    %c1_48 = arith.constant 1 : index
    %64 = vector.load %arg1[%c1_46, %c0_47, %c1_48] : memref<2x8x22xf32, #tpu.memory_space<vmem>>, vector<1x8x16xf32>
    %65 = vector.shape_cast %64 : vector<1x8x16xf32> to vector<8x16xf32>
    %c8_49 = arith.constant 8 : index
    %c0_50 = arith.constant 0 : index
    %66 = vector.load %arg7[%c8_49, %c0_50] : memref<56x16xf32, #tpu.memory_space<vmem>>, vector<8x16xf32>
    tpu.vector_store %arg7[%c8_49, %c0_50], %65 {strides = array<i32>} : memref<56x16xf32, #tpu.memory_space<vmem>>, vector<8x16xf32>,
    %c1_51 = arith.constant 1 : index
    %c0_52 = arith.constant 0 : index
    %c2_53 = arith.constant 2 : index
    %67 = vector.load %arg1[%c1_51, %c0_52, %c2_53] : memref<2x8x22xf32, #tpu.memory_space<vmem>>, vector<1x8x16xf32>
    %68 = vector.shape_cast %67 : vector<1x8x16xf32> to vector<8x16xf32>
    %c16_54 = arith.constant 16 : index
    %c0_55 = arith.constant 0 : index
    %69 = vector.load %arg7[%c16_54, %c0_55] : memref<56x16xf32, #tpu.memory_space<vmem>>, vector<8x16xf32>
    tpu.vector_store %arg7[%c16_54, %c0_55], %68 {strides = array<i32>} : memref<56x16xf32, #tpu.memory_space<vmem>>, vector<8x16xf32>,
    %c1_56 = arith.constant 1 : index
    %c0_57 = arith.constant 0 : index
    %c3_58 = arith.constant 3 : index
    %70 = vector.load %arg1[%c1_56, %c0_57, %c3_58] : memref<2x8x22xf32, #tpu.memory_space<vmem>>, vector<1x8x16xf32>
    %71 = vector.shape_cast %70 : vector<1x8x16xf32> to vector<8x16xf32>
    %c24_59 = arith.constant 24 : index
    %c0_60 = arith.constant 0 : index
    %72 = vector.load %arg7[%c24_59, %c0_60] : memref<56x16xf32, #tpu.memory_space<vmem>>, vector<8x16xf32>
    tpu.vector_store %arg7[%c24_59, %c0_60], %71 {strides = array<i32>} : memref<56x16xf32, #tpu.memory_space<vmem>>, vector<8x16xf32>,
    %c1_61 = arith.constant 1 : index
    %c0_62 = arith.constant 0 : index
    %c4_63 = arith.constant 4 : index
    %73 = vector.load %arg1[%c1_61, %c0_62, %c4_63] : memref<2x8x22xf32, #tpu.memory_space<vmem>>, vector<1x8x16xf32>
    %74 = vector.shape_cast %73 : vector<1x8x16xf32> to vector<8x16xf32>
    %c32_64 = arith.constant 32 : index
    %c0_65 = arith.constant 0 : index
    %75 = vector.load %arg7[%c32_64, %c0_65] : memref<56x16xf32, #tpu.memory_space<vmem>>, vector<8x16xf32>
    tpu.vector_store %arg7[%c32_64, %c0_65], %74 {strides = array<i32>} : memref<56x16xf32, #tpu.memory_space<vmem>>, vector<8x16xf32>,
    %c1_66 = arith.constant 1 : index
    %c0_67 = arith.constant 0 : index
    %c5_68 = arith.constant 5 : index
    %76 = vector.load %arg1[%c1_66, %c0_67, %c5_68] : memref<2x8x22xf32, #tpu.memory_space<vmem>>, vector<1x8x16xf32>
    %77 = vector.shape_cast %76 : vector<1x8x16xf32> to vector<8x16xf32>
    %c40_69 = arith.constant 40 : index
    %c0_70 = arith.constant 0 : index
    %78 = vector.load %arg7[%c40_69, %c0_70] : memref<56x16xf32, #tpu.memory_space<vmem>>, vector<8x16xf32>
    tpu.vector_store %arg7[%c40_69, %c0_70], %77 {strides = array<i32>} : memref<56x16xf32, #tpu.memory_space<vmem>>, vector<8x16xf32>,
    %c1_71 = arith.constant 1 : index
    %c0_72 = arith.constant 0 : index
    %c6_73 = arith.constant 6 : index
    %79 = vector.load %arg1[%c1_71, %c0_72, %c6_73] : memref<2x8x22xf32, #tpu.memory_space<vmem>>, vector<1x8x16xf32>
    %80 = vector.shape_cast %79 : vector<1x8x16xf32> to vector<8x16xf32>
    %c48_74 = arith.constant 48 : index
    %c0_75 = arith.constant 0 : index
    %81 = vector.load %arg7[%c48_74, %c0_75] : memref<56x16xf32, #tpu.memory_space<vmem>>, vector<8x16xf32>
    tpu.vector_store %arg7[%c48_74, %c0_75], %80 {strides = array<i32>} : memref<56x16xf32, #tpu.memory_space<vmem>>, vector<8x16xf32>,
    %c0_76 = arith.constant 0 : index
    %c0_77 = arith.constant 0 : index
    %82 = vector.load %arg7[%c0_76, %c0_77] : memref<56x16xf32, #tpu.memory_space<vmem>>, vector<56x16xf32>
    %cst_78 = arith.constant dense<0.000000e+00> : vector<256x16xf32>
    %83 = tpu.matmul %0, %82, %cst_78 {dimension_numbers = #tpu.dot_dimension_numbers<[1], [0], [0], [1], [0, 0, 1, 1], [], []>, precision = #tpu.contract_precision<fp32>} : vector<256x56xf32>, vector<56x16xf32>, vector<256x16xf32> -> vector<256x16xf32>
    %84 = vector.extract_strided_slice %83 {offsets = [0, 0], sizes = [128, 16], strides = [1, 1]} : vector<256x16xf32> to vector<128x16xf32>
    %85 = vector.extract_strided_slice %83 {offsets = [128, 0], sizes = [128, 16], strides = [1, 1]} : vector<256x16xf32> to vector<128x16xf32>
    %cst_79 = arith.constant dense<0xFF800000> : vector<128xf32>
    %86 = vector.multi_reduction <maximumf>, %84, %cst_79 [1] : vector<128x16xf32> to vector<128xf32>
    %87 = vector.shape_cast %86 : vector<128xf32> to vector<128x1xf32>
    %88 = vector.broadcast %87 : vector<128x1xf32> to vector<128x16xf32>
    %89 = arith.subf %84, %88 : vector<128x16xf32>
    %90 = math.exp %89 : vector<128x16xf32>
    %cst_80 = arith.constant dense<0.000000e+00> : vector<128xf32>
    %91 = vector.multi_reduction <add>, %90, %cst_80 [1] : vector<128x16xf32> to vector<128xf32>
    %92 = vector.shape_cast %91 : vector<128xf32> to vector<128x1xf32>
    %93 = tpu.reciprocal %92 : vector<128x1xf32> -> vector<128x1xf32>
    %94 = vector.broadcast %93 : vector<128x1xf32> to vector<128x16xf32>
    %95 = arith.mulf %90, %94 : vector<128x16xf32>
    %96 = arith.mulf %95, %85 : vector<128x16xf32>
    %cst_81 = arith.constant dense<0.000000e+00> : vector<4x16xf32>
    %97 = tpu.matmul %1, %96, %cst_81 {dimension_numbers = #tpu.dot_dimension_numbers<[1], [0], [0], [1], [0, 0, 1, 1], [], []>, precision = #tpu.contract_precision<fp32>} : vector<4x128xf32>, vector<128x16xf32>, vector<4x16xf32> -> vector<4x16xf32>
    %98 = arith.addf %97, %4 : vector<4x16xf32>
    %99 = arith.mulf %98, %98 : vector<4x16xf32>
    %cst_82 = arith.constant dense<0.000000e+00> : vector<16xf32>
    %100 = vector.multi_reduction <add>, %99, %cst_82 [0] : vector<4x16xf32> to vector<16xf32>
    %101 = vector.shape_cast %100 : vector<16xf32> to vector<1x16xf32>
    %cst_83 = arith.constant 1.000000e-24 : f32
    %102 = vector.broadcast %cst_83 : f32 to vector<1x16xf32>
    %103 = arith.maximumf %101, %102 : vector<1x16xf32>
    %104 = math.rsqrt %103 : vector<1x16xf32>
    %105 = vector.broadcast %104 : vector<1x16xf32> to vector<4x16xf32>
    %106 = arith.mulf %98, %105 : vector<4x16xf32>
    %107 = arith.mulf %106, %10 : vector<4x16xf32>
    %c1_84 = arith.constant 1 : index
    %c0_85 = arith.constant 0 : index
    %c0_86 = arith.constant 0 : index
    %108 = vector.load %arg6[%c1_84, %c0_85, %c0_86] : memref<2x4x16xf32, #tpu.memory_space<vmem>>, vector<1x4x16xf32>
    %109 = vector.shape_cast %108 : vector<1x4x16xf32> to vector<4x16xf32>
    %110 = vector.shape_cast %107 : vector<4x16xf32> to vector<1x4x16xf32>
    tpu.vector_store %arg6[%c1_84, %c0_85, %c0_86], %110 {strides = array<i32>} : memref<2x4x16xf32, #tpu.memory_space<vmem>>, vector<1x4x16xf32>,
    return
  }
  func.func @transform_0(%arg0: i32) -> (i32, i32, i32) {
    %c0_i32 = arith.constant 0 : i32
    %c0_i32_0 = arith.constant 0 : i32
    %c0_i32_1 = arith.constant 0 : i32
    return %arg0, %c0_i32, %c0_i32_0 : i32, i32, i32
  }
  func.func @transform_1(%arg0: i32) -> (i32, i32) {
    %c0_i32 = arith.constant 0 : i32
    %c0_i32_0 = arith.constant 0 : i32
    %c0_i32_1 = arith.constant 0 : i32
    return %c0_i32, %c0_i32_0 : i32, i32
  }
  func.func @transform_2(%arg0: i32) -> (i32, i32) {
    %c0_i32 = arith.constant 0 : i32
    %c0_i32_0 = arith.constant 0 : i32
    %c0_i32_1 = arith.constant 0 : i32
    return %c0_i32, %c0_i32_0 : i32, i32
  }
  func.func @transform_3(%arg0: i32) -> (i32, i32) {
    %c0_i32 = arith.constant 0 : i32
    %c0_i32_0 = arith.constant 0 : i32
    %c0_i32_1 = arith.constant 0 : i32
    return %c0_i32, %c0_i32_0 : i32, i32
  }
  func.func @transform_4(%arg0: i32) -> (i32, i32) {
    %c0_i32 = arith.constant 0 : i32
    %c0_i32_0 = arith.constant 0 : i32
    %c0_i32_1 = arith.constant 0 : i32
    return %c0_i32, %c0_i32_0 : i32, i32
  }
  func.func @transform_5(%arg0: i32) -> (i32, i32, i32) {
    %c0_i32 = arith.constant 0 : i32
    %c0_i32_0 = arith.constant 0 : i32
    %c0_i32_1 = arith.constant 0 : i32
    return %arg0, %c0_i32, %c0_i32_0 : i32, i32, i32
  }
}

</mosaic_0001>

<bundles_post_ra>
// kernel: convgate_forward.1
= control target key start
LH: loop header
LB: loop body
LE: loop exit
PB: predicated region body
PF: predicated region fallthrough
CT: control target
= control target key end

     0   :  { %vm68_vm0 = vcmask 130048   ;;  %s8468_s20 = smov 125   ;;  %s8469_s21 = smov 127   ;;  %vm113_vm1 = vcmask 457728   ;;  %s10672_s0 = inlined_call_operand.vmem [shape: f32[2,8,22], index: 0, kind: input, shape index: {}]   ;;  %s10673_s1 = inlined_call_operand.vmem [shape: f32[256,56], index: 1, kind: input, shape index: {}]   ;;  %s10674_s2 = inlined_call_operand.vmem [shape: f32[4,128], index: 2, kind: input, shape index: {}]   ;;  %s10675_s3 = inlined_call_operand.vmem [shape: f32[4,1], index: 3, kind: input, shape index: {}]   ;;  %s10676_s4 = inlined_call_operand.vmem [shape: f32[4,1], index: 4, kind: input, shape index: {}]   ;;  %s10677_s5 = inlined_call_operand.hbm [shape: f32[2,4,16], index: 5, kind: output, shape index: {}]  }
   0x1   :  { %v82_v0 = vld [vmem:[%s10672_s0] sm:$0xff] }
   0x2   :  { %84 = vrot.lane.b32.xlu1 %v82_v0, %s8468_s20  ;;  %72 = vrot.lane.b32.xlu0 %v82_v0, %s8469_s21  ;;  %69 = vst.msk [vmem:[#allocation2] sm:$0xff] %vm68_vm0, %v82_v0  ;;  %v21_v1 = vld [vmem:[%s10673_s1] sm:$0xff] }
   0x3   :  { %10 = vsyncpa [#allocation4], 0  ;;  %v115_v2 = vsel %vm113_vm1, %v21_v1, 0  ;;  %s8470_s24 = smov 124   ;;  %s8471_s25 = smov 126   ;;  %v5680_v5 = vld [vmem:[%s10672_s0 + $0x8] sm:$0xff] }
   0x4   :  { %v8521_v3 = vand.u32 4294901760, %v115_v2  ;;  %s8472_s28 = smov 123   ;;  %s8473_s29 = smov 122   ;;  %v22_v10 = vld [vmem:[%s10673_s1 + $0x8] sm:$0xff]  ;;  %v23_v11 = vld [vmem:[%s10673_s1 + $0x10] sm:$0xff]  ;;  %v24_v12 = vld [vmem:[%s10673_s1 + $0x18] sm:$0xff] }
   0x5   :  { %v118_v13 = vsel %vm113_vm1, %v22_v10, 0  ;;  %v121_v14 = vsel %vm113_vm1, %v23_v11, 0  ;;  %v124_v15 = vsel %vm113_vm1, %v24_v12, 0  ;;  %v25_v22 = vld [vmem:[%s10673_s1 + $0x20] sm:$0xff]  ;;  %v26_v26 = vld [vmem:[%s10673_s1 + $0x28] sm:$0xff]  ;;  %v27_v42 = vld [vmem:[%s10673_s1 + $0x30] sm:$0xff] }
   0x6   :  { %10904 = vst [vmem:[#allocation6_spill] sm:$0xff] %v8521_v3  ;;  %90 = vrot.lane.b32.xlu1 %v82_v0, %s8470_s24  ;;  %78 = vrot.lane.b32.xlu0 %v82_v0, %s8471_s25  ;;  %v8526_v4 = vsub.f32 %v115_v2, %v8521_v3  ;;  %v8554_v17 = vand.u32 4294901760, %v118_v13  ;;  %v8556_v18 = vand.u32 4294901760, %v121_v14  ;;  %v8558_v19 = vand.u32 4294901760, %v124_v15  ;;  %v28_v49 = vld [vmem:[%s10673_s1 + $0x38] sm:$0xff]  ;;  %v29_v62 = vld [vmem:[%s10673_s1 + $0x40] sm:$0xff] }
   0x7   :  { %v127_v28 = vsel %vm113_vm1, %v25_v22, 0  ;;  %v130_v31 = vsel %vm113_vm1, %v26_v26, 0  ;;  %v133_v53 = vsel %vm113_vm1, %v27_v42, 0  ;;  %v136_v61 = vsel %vm113_vm1, %v28_v49, 0  ;;  %v30_v11 = vld [vmem:[%s10673_s1 + $0x48] sm:$0xff]  ;;  %v31_v12 = vld [vmem:[%s10673_s1 + $0x50] sm:$0xff] }
   0x8   :  { %10905 = vst [vmem:[#allocation7_spill] sm:$0xff] %v8526_v4  ;;  %v8532_v6 = vand.u32 4294901760, %v8526_v4  ;;  %10908 = vst [vmem:[#allocation10_spill] sm:$0xff] %v8554_v17  ;;  %v8566_v23 = vsub.f32 %v118_v13, %v8554_v17  ;;  %v8571_v25 = vsub.f32 %v121_v14, %v8556_v18  ;;  %v8577_v27 = vsub.f32 %v124_v15, %v8558_v19 }
   0x9   :  { %v106_v7 = vld [vmem:[#allocation2] sm:$0xff]  ;;  %10909 = vst [vmem:[#allocation11_spill] sm:$0xff] %v8556_v18  ;;  %10910 = vst [vmem:[#allocation12_spill] sm:$0xff] %v8558_v19  ;;  %v8590_v35 = vand.u32 4294901760, %v127_v28  ;;  %v8595_v41 = vand.u32 4294901760, %v130_v31  ;;  %v8641_v2 = vand.u32 4294901760, %v133_v53 }
   0xa   :  { %10906 = vst [vmem:[#allocation8_spill] sm:$0xff] %v8532_v6  ;;  %96 = vrot.lane.b32.xlu0 %v82_v0, %s8472_s28  ;;  %102 = vrot.lane.b32.xlu1 %v82_v0, %s8473_s29  ;;  %2916 = vst.msk [vmem:[#allocation2] sm:$0xff] %vm68_vm0, %v5680_v5  ;;  %v285_v8 = vsub.f32 %v8526_v4, %v8532_v6  ;;  %v211_v16 = vand.u32 4294901760, %v106_v7  ;;  %v8584_v32 = vand.u32 4294901760, %v8566_v23  ;;  %v8588_v34 = vand.u32 4294901760, %v8571_v25 }
   0xb   :  { %10911 = vst [vmem:[#allocation13_spill] sm:$0xff] %v8566_v23  ;;  %10913 = vst [vmem:[#allocation15_spill] sm:$0xff] %v8571_v25  ;;  %v8593_v36 = vand.u32 4294901760, %v8577_v27  ;;  %v8612_v48 = vsub.f32 %v127_v28, %v8590_v35  ;;  %v8625_v57 = vsub.f32 %v130_v31, %v8595_v41  ;;  %v142_v31 = vsel %vm113_vm1, %v30_v11, 0 }
   0xc   :  { %v8539_v9 = vand.u32 4294901760, %v285_v8  ;;  %v8568_v24 = vsub.f32 %v106_v7, %v211_v16  ;;  %10914 = vst [vmem:[#allocation16_spill] sm:$0xff] %v8577_v27  ;;  %10915 = vst [vmem:[#allocation17_spill] sm:$0xff] %v8584_v32  ;;  %v295_v45 = vsub.f32 %v8566_v23, %v8584_v32  ;;  %v305_v47 = vsub.f32 %v8571_v25, %v8588_v34 }
   0xd   :  { %10916 = vst [vmem:[#allocation18_spill] sm:$0xff] %v8588_v34  ;;  %10917 = vst [vmem:[#allocation19_spill] sm:$0xff] %v8590_v35  ;;  %v315_v52 = vsub.f32 %v8577_v27, %v8593_v36  ;;  %v8639_v1 = vand.u32 4294901760, %v8612_v48  ;;  %vm8475_vm2 = vmmov 0   ;;  %vm2901_vm3 = vcmask 125952  }
   0xe   :  { %10907 = vst [vmem:[#allocation9_spill] sm:$0xff] %v8539_v9  ;;  %6373 = vmatprep.mubr.f32.mxu0 %v8539_v9  ;;  %10912 = vst [vmem:[#allocation14_spill] sm:$0xff] %v8568_v24  ;;  %v10679_v33 = vand.u32 4294901760, %v8568_v24  ;;  %v8634_v63 = vand.u32 4294901760, %v295_v45  ;;  %v8636_v0 = vand.u32 4294901760, %v305_v47 }
   0xf   :  { %10918 = vst [vmem:[#allocation20_spill] sm:$0xff] %v8593_v36  ;;  %10919 = vst [vmem:[#allocation21_spill] sm:$0xff] %v8595_v41  ;;  %v8646_v10 = vand.u32 4294901760, %v315_v52 }
  0x10   :  { %v8607_v46 = vsub.f32 %v8568_v24, %v10679_v33  ;;  %10920 = vst [vmem:[#allocation22_spill] sm:$0xff] %v8612_v48  ;;  %10922 = vst [vmem:[#allocation24_spill] sm:$0xff] %v8625_v57 }
  0x11   :  { %10923 = vst [vmem:[#allocation25_spill] sm:$0xff] %v8634_v63  ;;  %10924 = vst [vmem:[#allocation26_spill] sm:$0xff] %v8636_v0 }
  0x12   :  { %10925 = vst [vmem:[#allocation27_spill] sm:$0xff] %v8639_v1  ;;  %10926 = vst [vmem:[#allocation28_spill] sm:$0xff] %v8641_v2  ;;  %v607_v7 = vand.u32 4294901760, %v8607_v46 }
  0x13   :  { %10927 = vst [vmem:[#allocation29_spill] sm:$0xff] %v8646_v10 }
  0x74   :  { %v85_v20 = vpop.permute.xlu1 %84  ;;  %v73_v21 = vpop.permute.xlu0 %72 }
  0x75   :  { %87 = vst.msk [vmem:[#allocation2 + $0x18] sm:$0xff] %vm68_vm0, %v85_v20  ;;  %75 = vst.msk [vmem:[#allocation2 + $0x8] sm:$0xff] %vm68_vm0, %v73_v21  ;;  %v8657_v20 = vand.u32 4294901760, %v136_v61  ;;  %v139_v21 = vsel %vm113_vm1, %v29_v62, 0  ;;  %v33_v62 = vld [vmem:[%s10673_s1 + $0x60] sm:$0xff] }
  0x76   :  { %v8682_v47 = vand.u32 4294901760, %v139_v21 }
  0x77   :  { %10929 = vst [vmem:[#allocation31_spill] sm:$0xff] %v8657_v20  ;;  %v8680_v46 = vsub.f32 %v136_v61, %v8657_v20 }
  0x78   :  { %v91_v29 = vpop.permute.xlu1 %90  ;;  %v79_v30 = vpop.permute.xlu0 %78  ;;  %10933 = vst [vmem:[#allocation35_spill] sm:$0xff] %v8682_v47 }
  0x79   :  { %93 = vst.msk [vmem:[#allocation2 + $0x20] sm:$0xff] %vm68_vm0, %v91_v29  ;;  %81 = vst.msk [vmem:[#allocation2 + $0x10] sm:$0xff] %vm68_vm0, %v79_v30  ;;  %v8666_v30 = vsub.f32 %v133_v53, %v8641_v2 }
  0x7a   :  { %10932 = vst [vmem:[#allocation34_spill] sm:$0xff] %v8680_v46 }
  0x7b   :  { %10930 = vst [vmem:[#allocation32_spill] sm:$0xff] %v8666_v30 }
  0x7c   :  { %v97_v37 = vpop.permute.xlu0 %96  ;;  %v103_v38 = vpop.permute.xlu1 %102  ;;  %v107_v39 = vld [vmem:[#allocation2 + $0x8] sm:$0xff]  ;;  %v109_v40 = vld [vmem:[#allocation2 + $0x18] sm:$0xff] }
  0x7d   :  { %99 = vst.msk [vmem:[#allocation2 + $0x28] sm:$0xff] %vm68_vm0, %v97_v37  ;;  %105 = vst.msk [vmem:[#allocation2 + $0x30] sm:$0xff] %vm68_vm0, %v103_v38  ;;  %v214_v43 = vand.u32 4294901760, %v107_v39  ;;  %v220_v44 = vand.u32 4294901760, %v109_v40  ;;  %v145_v37 = vsel %vm113_vm1, %v31_v12, 0 }
  0x7f   :  { %v8617_v50 = vpack.c.bf16 %v214_v43, %v211_v16  ;;  %v8619_v51 = vsub.f32 %v107_v39, %v214_v43  ;;  %v625_v56 = vsub.f32 %v109_v40, %v220_v44  ;;  %v8655_v16 = vand.u32 4294901760, %v8625_v57 }
  0x80   :  { %v108_v54 = vld [vmem:[#allocation2 + $0x10] sm:$0xff]  ;;  %v110_v55 = vld [vmem:[#allocation2 + $0x20] sm:$0xff] }
  0x81   :  { %10921 = vst [vmem:[#allocation23_spill] sm:$0xff] %v8619_v51  ;;  %7524 = vmatprep.subr.bf16.mxu0 %v8617_v50  ;;  %v217_v58 = vand.u32 4294901760, %v108_v54  ;;  %v223_v59 = vand.u32 4294901760, %v110_v55  ;;  %v10678_v60 = vand.u32 4294901760, %v8619_v51  ;;  %v626_v15 = vand.u32 4294901760, %v625_v56  ;;  %10928 = vst [vmem:[#allocation30_spill] sm:$0xff] %v8655_v16 }
  0x82   :  { %7526 = vmatpush3.bf16.msra.mxu0 %v8617_v50 }
  0x83   :  { %v8643_v5 = vpack.c.bf16 %v220_v44, %v217_v58  ;;  %v618_v8 = vsub.f32 %v108_v54, %v217_v58  ;;  %v613_v26 = vsub.f32 %v8619_v51, %v10678_v60  ;;  %v632_v29 = vsub.f32 %v110_v55, %v223_v59  ;;  %v32_v44 = vld [vmem:[%s10673_s1 + $0x58] sm:$0xff] }
  0x84   :  { %v111_v13 = vld [vmem:[#allocation2 + $0x28] sm:$0xff]  ;;  %v112_v14 = vld [vmem:[#allocation2 + $0x30] sm:$0xff]  ;;  %v627_v45 = vsub.f32 %v625_v56, %v626_v15  ;;  %v325_v58 = vsub.f32 %v8612_v48, %v8639_v1  ;;  %v148_v61 = vsel %vm113_vm1, %v32_v44, 0  ;;  %v151_v60 = vsel %vm113_vm1, %v33_v62, 0 }
  0x85   :  { %7528 = vmatprep.subr.bf16.mxu0 %v8643_v5  ;;  %v226_v22 = vand.u32 4294901760, %v111_v13  ;;  %v619_v28 = vand.u32 4294901760, %v618_v8  ;;  %v8670_v38 = vpack.c.bf16 %v625_v56, %v618_v8  ;;  %v8674_v40 = vand.u32 4294901760, %v112_v14 }
  0x86   :  { %7530 = vmatpush3.bf16.msra.mxu0 %v8643_v5  ;;  %v614_v52 = vand.u32 4294901760, %v613_v26  ;;  %v633_v53 = vand.u32 4294901760, %v632_v29  ;;  %v8692_v56 = vand.u32 4294901760, %v142_v31  ;;  %v8712_v26 = vand.u32 4294901760, %v8666_v30 }
  0x87   :  { %v8672_v39 = vpack.c.bf16 %v226_v22, %v223_v59  ;;  %10931 = vst [vmem:[#allocation33_spill] sm:$0xff] %v8674_v40  ;;  %v620_v42 = vsub.f32 %v618_v8, %v619_v28  ;;  %v639_v43 = vsub.f32 %v111_v13, %v226_v22  ;;  %v8684_v49 = vpack.c.bf16 %v626_v15, %v619_v28  ;;  %v34_v13 = vld [vmem:[%s10673_s1 + $0x68] sm:$0xff] }
  0x88   :  { %10935 = vst [vmem:[#allocation37_spill] sm:$0xff] %v8692_v56  ;;  %v8694_v59 = vand.u32 4294901760, %v145_v37  ;;  %v8702_v12 = vsub.f32 %v112_v14, %v8674_v40  ;;  %v335_v22 = vsub.f32 %v8625_v57, %v8655_v16  ;;  %10938 = vst [vmem:[#allocation40_spill] sm:$0xff] %v8712_v26  ;;  %v8715_v28 = vand.u32 4294901760, %v8680_v46  ;;  %v35_v14 = vld [vmem:[%s10673_s1 + $0x70] sm:$0xff] }
  0x89   :  { %10934 = vst [vmem:[#allocation36_spill] sm:$0xff] %v8684_v49  ;;  %7532 = vmatprep.subr.bf16.mxu0 %v8672_v39  ;;  %v640_v54 = vand.u32 4294901760, %v639_v43  ;;  %v8687_v55 = vpack.c.bf16 %v639_v43, %v632_v29  ;;  %v621_v8 = vand.u32 4294901760, %v620_v42  ;;  %v8718_v42 = vsub.f32 %v139_v21, %v8682_v47 }
  0x8a   :  { %7534 = vmatpush3.bf16.msra.mxu0 %v8672_v39  ;;  %10936 = vst [vmem:[#allocation38_spill] sm:$0xff] %v8694_v59  ;;  %10939 = vst [vmem:[#allocation41_spill] sm:$0xff] %v8715_v28  ;;  %v628_v44 = vand.u32 4294901760, %v627_v45  ;;  %v8726_v33 = vsub.f32 %v142_v31, %v8692_v56  ;;  %v8729_v9 = vsub.f32 %v145_v37, %v8694_v59  ;;  %v8731_v16 = vand.u32 4294901760, %v148_v61 }
  0x8b   :  { %6371 = vmatprep.subr.mxu0 %v8674_v40  ;;  %v641_v11 = vsub.f32 %v639_v43, %v640_v54  ;;  %v8707_v15 = vpack.c.bf16 %v640_v54, %v633_v53  ;;  %10940 = vst [vmem:[#allocation42_spill] sm:$0xff] %v8718_v42  ;;  %v7535_v43 = vpack.c.bf16 %v614_v52, %v607_v7  ;;  %v154_v21 = vsel %vm113_vm1, %v34_v13, 0 }
  0x8c   :  { %v634_v54 = vsub.f32 %v632_v29, %v633_v53  ;;  %10941 = vst [vmem:[#allocation43_spill] sm:$0xff] %v8726_v33  ;;  %10942 = vst [vmem:[#allocation44_spill] sm:$0xff] %v8729_v9  ;;  %v7539_v7 = vpack.c.bf16 %v628_v44, %v621_v8  ;;  %v8736_v29 = vand.u32 4294901760, %v8702_v12  ;;  %v157_v52 = vsel %vm113_vm1, %v35_v14, 0  ;;  %v36_v8 = vld [vmem:[%s10673_s1 + $0x78] sm:$0xff] }
  0x8d   :  { %10937 = vst [vmem:[#allocation39_spill] sm:$0xff] %v8707_v15  ;;  %10943 = vst [vmem:[#allocation45_spill] sm:$0xff] %v8731_v16  ;;  %v642_v45 = vand.u32 4294901760, %v641_v11  ;;  %v8740_v31 = vand.u32 4294901760, %v325_v58  ;;  %v345_v37 = vsub.f32 %v8666_v30, %v8712_v26  ;;  %v8745_v53 = vand.u32 4294901760, %v8718_v42 }
  0x8e   :  { %6372 = vmatpush3.msra.mxu0 %v8674_v40  ;;  %10944 = vst [vmem:[#allocation46_spill] sm:$0xff] %v8736_v29  ;;  %v8747_v62 = vand.u32 4294901760, %v151_v60  ;;  %v635_v11 = vand.u32 4294901760, %v634_v54  ;;  %v8752_v13 = vand.u32 4294901760, %v335_v22  ;;  %v355_v58 = vsub.f32 %v8680_v46, %v8715_v28 }
  0x8f   :  { %6374 = vmatmul.mubr.f32.vlgmr.msra.gmra.mrb[0].mxu0 %v8634_v63  ;;  %7536 = vmatprep.subr.bf16.mxu0 %v7535_v43  ;;  %10945 = vst [vmem:[#allocation47_spill] sm:$0xff] %v8740_v31  ;;  %10946 = vst [vmem:[#allocation48_spill] sm:$0xff] %v8745_v53  ;;  %v8757_v14 = vand.u32 4294901760, %v8726_v33  ;;  %v8762_v44 = vand.u32 4294901760, %v154_v21  ;;  %v37_v63 = vld [vmem:[%s10673_s1 + $0x80] sm:$0xff]  ;;  %v648_v54 = vsub.f32 %v8702_v12, %v8736_v29  ;;  %v8773_v28 = vand.u32 4294901760, %v8729_v9 }
  0x90   :  { %7538 = vmatpush3.bf16.msra.mxu0 %v7535_v43  ;;  %6376 = vmatprep.mubr.f32.mxu0 %v8636_v0  ;;  %10947 = vst [vmem:[#allocation49_spill] sm:$0xff] %v8747_v62  ;;  %10948 = vst [vmem:[#allocation50_spill] sm:$0xff] %v8752_v13  ;;  %v8760_v43 = vsub.f32 %v148_v61, %v8731_v16  ;;  %v8764_v0 = vand.u32 4294901760, %v157_v52  ;;  %v7543_v22 = vpack.c.bf16 %v642_v45, %v635_v11  ;;  %v38_v11 = vld [vmem:[%s10673_s1 + $0x88] sm:$0xff] }
  0x91   :  { %7540 = vmatprep.subr.bf16.mxu0 %v7539_v7  ;;  %10949 = vst [vmem:[#allocation51_spill] sm:$0xff] %v8757_v14  ;;  %10951 = vst [vmem:[#allocation53_spill] sm:$0xff] %v8762_v44  ;;  %v160_v61 = vsel %vm113_vm1, %v36_v8, 0  ;;  %v8777_v26 = vand.u32 4294901760, %v345_v37  ;;  %v365_v15 = vsub.f32 %v8718_v42, %v8745_v53  ;;  %v8782_v1 = vsub.f32 %v151_v60, %v8747_v62  ;;  %v39_v60 = vld [vmem:[%s10673_s1 + $0x90] sm:$0xff] }
  0x92   :  { %10950 = vst [vmem:[#allocation52_spill] sm:$0xff] %v8760_v43  ;;  %10952 = vst [vmem:[#allocation54_spill] sm:$0xff] %v8764_v0  ;;  %v163_v45 = vsel %vm113_vm1, %v37_v63, 0  ;;  %v8789_v8 = vand.u32 4294901760, %v8760_v43  ;;  %v8795_v37 = vsub.f32 %v157_v52, %v8764_v0  ;;  %v649_v63 = vand.u32 4294901760, %v648_v54 }
  0x93   :  { %6377 = vmatmul.mubr.f32.gmra.mrb[2].mxu0 %v8646_v10  ;;  %10953 = vst [vmem:[#allocation55_spill] sm:$0xff] %v8773_v28  ;;  %10954 = vst [vmem:[#allocation56_spill] sm:$0xff] %v8777_v26  ;;  %v8803_v10 = vand.u32 4294901760, %v355_v58  ;;  %v375_v53 = vsub.f32 %v8726_v33, %v8757_v14  ;;  %v8810_v52 = vand.u32 4294901760, %v365_v15  ;;  %v8813_v29 = vand.u32 4294901760, %v8782_v1 }
  0x94   :  { %7542 = vmatpush3.bf16.msra.mxu0 %v7539_v7  ;;  %6379 = vmatprep.mubr.f32.mxu0 %v8740_v31  ;;  %10955 = vst [vmem:[#allocation57_spill] sm:$0xff] %v8782_v1  ;;  %10956 = vst [vmem:[#allocation58_spill] sm:$0xff] %v8789_v8  ;;  %v8792_v7 = vsub.f32 %v154_v21, %v8762_v44  ;;  %v8797_v31 = vand.u32 4294901760, %v160_v61  ;;  %v385_v21 = vsub.f32 %v8729_v9, %v8773_v28 }
  0x95   :  { %7544 = vmatprep.subr.bf16.mxu0 %v7543_v22  ;;  %10958 = vst [vmem:[#allocation60_spill] sm:$0xff] %v8795_v37  ;;  %10960 = vst [vmem:[#allocation62_spill] sm:$0xff] %v8803_v10  ;;  %v8815_v36 = vand.u32 4294901760, %v163_v45  ;;  %v166_v54 = vsel %vm113_vm1, %v38_v11, 0  ;;  %v169_v58 = vsel %vm113_vm1, %v39_v60, 0  ;;  %v41_v11 = vld [vmem:[%s10673_s1 + $0xa0] sm:$0xff]  ;;  %v8839_v60 = vpack.c.bf16 %v8619_v51, %v8568_v24 }
  0x96   :  { %10957 = vst [vmem:[#allocation59_spill] sm:$0xff] %v8792_v7  ;;  %10959 = vst [vmem:[#allocation61_spill] sm:$0xff] %v8797_v31  ;;  %v8825_v15 = vand.u32 4294901760, %v8792_v7  ;;  %v8831_v28 = vsub.f32 %v160_v61, %v8797_v31  ;;  %v8843_v14 = vand.u32 4294901760, %v385_v21  ;;  %v8845_v49 = vand.u32 4294901760, %v166_v54 }
  0x97   :  { %6380 = vmatmul.mubr.f32.gmra.mrb[4].mxu0 %v8752_v13  ;;  %10961 = vst [vmem:[#allocation63_spill] sm:$0xff] %v8810_v52  ;;  %10962 = vst [vmem:[#allocation64_spill] sm:$0xff] %v8813_v29  ;;  %v40_v13 = vld [vmem:[%s10673_s1 + $0x98] sm:$0xff]  ;;  %v405_v61 = vsub.f32 %v8782_v1, %v8813_v29  ;;  %v8851_v34 = vsub.f32 %v163_v45, %v8815_v36  ;;  %v175_v21 = vsel %vm113_vm1, %v41_v11, 0 }
  0x98   :  { %7546 = vmatpush3.bf16.msra.mxu0 %v7543_v22  ;;  %6382 = vmatprep.mubr.f32.mxu0 %v8777_v26  ;;  %10963 = vst [vmem:[#allocation65_spill] sm:$0xff] %v8815_v36  ;;  %v395_v22 = vsub.f32 %v8760_v43, %v8789_v8  ;;  %10964 = vst [vmem:[#allocation66_spill] sm:$0xff] %v8825_v15  ;;  %v8828_v26 = vand.u32 4294901760, %v8795_v37  ;;  %v8841_v8 = vand.u32 4294901760, %v375_v53  ;;  %v172_v32 = vsel %vm113_vm1, %v40_v13, 0  ;;  %v42_v53 = vld [vmem:[%s10673_s1 + $0xa8] sm:$0xff] }
  0x99   :  { %6433 = vmatprep.subr.mxu0 %v649_v63  ;;  %10966 = vst [vmem:[#allocation68_spill] sm:$0xff] %v8831_v28  ;;  %10968 = vst [vmem:[#allocation70_spill] sm:$0xff] %v8843_v14  ;;  %v415_v45 = vsub.f32 %v8792_v7, %v8825_v15  ;;  %v8871_v29 = vand.u32 4294901760, %v8831_v28  ;;  %v8875_v6 = vsub.f32 %v166_v54, %v8845_v49  ;;  %v8877_v1 = vand.u32 4294901760, %v172_v32  ;;  %v44_v54 = vld [vmem:[%s10673_s1 + $0xb8] sm:$0xff] }
  0x9a   :  { %10965 = vst [vmem:[#allocation67_spill] sm:$0xff] %v8828_v26  ;;  %10967 = vst [vmem:[#allocation69_spill] sm:$0xff] %v8841_v8  ;;  %v425_v13 = vsub.f32 %v8795_v37, %v8828_v26  ;;  %v178_v11 = vsel %vm113_vm1, %v42_v53, 0  ;;  %v8882_v15 = vand.u32 4294901760, %v405_v61  ;;  %v8885_v26 = vand.u32 4294901760, %v8851_v34  ;;  %v45_v53 = vld [vmem:[%s10673_s1 + $0xc0] sm:$0xff] }
  0x9b   :  { %6383 = vmatmul.mubr.f32.gmra.mrb[6].mxu0 %v8803_v10  ;;  %10969 = vst [vmem:[#allocation71_spill] sm:$0xff] %v8845_v49  ;;  %10970 = vst [vmem:[#allocation72_spill] sm:$0xff] %v8851_v34  ;;  %v8853_v10 = vand.u32 4294901760, %v169_v58  ;;  %v435_v61 = vsub.f32 %v8831_v28, %v8871_v29  ;;  %v8910_v43 = vand.u32 4294901760, %v8875_v6  ;;  %v8913_v9 = vsub.f32 %v172_v32, %v8877_v1  ;;  %v46_v32 = vld [vmem:[%s10673_s1 + $0xc8] sm:$0xff] }
  0x9c   :  { %6434 = vmatpush3.msra.mxu0 %v649_v63  ;;  %6385 = vmatprep.mubr.f32.mxu0 %v8810_v52  ;;  %v43_v63 = vld [vmem:[%s10673_s1 + $0xb0] sm:$0xff]  ;;  %v8864_v52 = vand.u32 4294901760, %v395_v22  ;;  %10973 = vst [vmem:[#allocation75_spill] sm:$0xff] %v8871_v29  ;;  %10974 = vst [vmem:[#allocation76_spill] sm:$0xff] %v8875_v6  ;;  %v445_v29 = vsub.f32 %v8851_v34, %v8885_v26 }
  0x9d   :  { %10971 = vst [vmem:[#allocation73_spill] sm:$0xff] %v8853_v10  ;;  %7548 = vmatprep.subr.bf16.mxu0 %v8839_v60  ;;  %10975 = vst [vmem:[#allocation77_spill] sm:$0xff] %v8877_v1  ;;  %v181_v22 = vsel %vm113_vm1, %v43_v63, 0  ;;  %v8888_v37 = vsub.f32 %v169_v58, %v8853_v10  ;;  %v8898_v63 = vand.u32 4294901760, %v415_v45  ;;  %v8907_v58 = vand.u32 4294901760, %v425_v13 }
  0x9e   :  { %10972 = vst [vmem:[#allocation74_spill] sm:$0xff] %v8864_v52  ;;  %10976 = vst [vmem:[#allocation78_spill] sm:$0xff] %v8882_v15  ;;  %v8904_v7 = vand.u32 4294901760, %v181_v22  ;;  %v184_v45 = vsel %vm113_vm1, %v44_v54, 0  ;;  %v187_v13 = vsel %vm113_vm1, %v45_v53, 0  ;;  %v455_v53 = vsub.f32 %v8875_v6, %v8910_v43 }
  0x9f   :  { %6386 = vmatmul.mubr.f32.gmra.mrb[8].mxu0 %v8841_v8  ;;  %10977 = vst [vmem:[#allocation79_spill] sm:$0xff] %v8885_v26  ;;  %10978 = vst [vmem:[#allocation80_spill] sm:$0xff] %v8888_v37  ;;  %v8890_v8 = vand.u32 4294901760, %v175_v21  ;;  %v8920_v28 = vand.u32 4294901760, %v8888_v37  ;;  %v47_v26 = vld [vmem:[%s10673_s1 + $0xd0] sm:$0xff]  ;;  %v8946_v34 = vand.u32 4294901760, %v8913_v9 }
  0xa0   :  { %6388 = vmatprep.mubr.f32.mxu0 %v8843_v14  ;;  %10980 = vst [vmem:[#allocation82_spill] sm:$0xff] %v8898_v63  ;;  %v8902_v14 = vand.u32 4294901760, %v178_v11  ;;  %10982 = vst [vmem:[#allocation84_spill] sm:$0xff] %v8904_v7  ;;  %v8933_v54 = vsub.f32 %v181_v22, %v8904_v7  ;;  %v8951_v22 = vand.u32 4294901760, %v445_v29 }
  0xa1   :  { %10979 = vst [vmem:[#allocation81_spill] sm:$0xff] %v8890_v8  ;;  %10983 = vst [vmem:[#allocation85_spill] sm:$0xff] %v8907_v58  ;;  %v465_v42 = vsub.f32 %v8888_v37, %v8920_v28 }
  0xa2   :  { %10981 = vst [vmem:[#allocation83_spill] sm:$0xff] %v8902_v14  ;;  %10984 = vst [vmem:[#allocation86_spill] sm:$0xff] %v8910_v43  ;;  %v8930_v33 = vsub.f32 %v178_v11, %v8902_v14  ;;  %v8948_v11 = vand.u32 4294901760, %v187_v13  ;;  %v48_v43 = vld [vmem:[%s10673_s1 + $0xd8] sm:$0xff]  ;;  %v8967_v29 = vand.u32 4294901760, %v8933_v54 }
  0xa3   :  { %6389 = vmatmul.mubr.f32.gmra.mrb[10].mxu0 %v8864_v52  ;;  %10985 = vst [vmem:[#allocation87_spill] sm:$0xff] %v8913_v9  ;;  %10986 = vst [vmem:[#allocation88_spill] sm:$0xff] %v8920_v28  ;;  %v8923_v52 = vsub.f32 %v175_v21, %v8890_v8  ;;  %v8941_v21 = vand.u32 4294901760, %v435_v61  ;;  %v190_v61 = vsel %vm113_vm1, %v46_v32, 0  ;;  %v49_v28 = vld [vmem:[%s10673_s1 + $0xe0] sm:$0xff]  ;;  %v475_v32 = vsub.f32 %v8913_v9, %v8946_v34 }
  0xa4   :  { %6391 = vmatprep.mubr.f32.mxu0 %v8882_v15  ;;  %10988 = vst [vmem:[#allocation90_spill] sm:$0xff] %v8930_v33  ;;  %10989 = vst [vmem:[#allocation91_spill] sm:$0xff] %v8933_v54  ;;  %v8935_v15 = vand.u32 4294901760, %v184_v45  ;;  %v8964_v6 = vand.u32 4294901760, %v8930_v33  ;;  %v8981_v37 = vsub.f32 %v187_v13, %v8948_v11  ;;  %v8983_v24 = vand.u32 4294901760, %v190_v61  ;;  %v50_v13 = vld [vmem:[%s10673_s1 + $0xe8] sm:$0xff] }
  0xa5   :  { %10987 = vst [vmem:[#allocation89_spill] sm:$0xff] %v8923_v52  ;;  %10991 = vst [vmem:[#allocation93_spill] sm:$0xff] %v8941_v21  ;;  %v8956_v51 = vand.u32 4294901760, %v8923_v52 }
  0xa6   :  { %10990 = vst [vmem:[#allocation92_spill] sm:$0xff] %v8935_v15  ;;  %10992 = vst [vmem:[#allocation94_spill] sm:$0xff] %v8946_v34  ;;  %v495_v34 = vsub.f32 %v8930_v33, %v8964_v6 }
  0xa7   :  { %6392 = vmatmul.mubr.f32.gmra.mrb[12].mxu0 %v8898_v63  ;;  %10993 = vst [vmem:[#allocation95_spill] sm:$0xff] %v8948_v11  ;;  %10994 = vst [vmem:[#allocation96_spill] sm:$0xff] %v8951_v22  ;;  %v193_v63 = vsel %vm113_vm1, %v47_v26, 0  ;;  %v8976_v26 = vand.u32 4294901760, %v455_v53  ;;  %v485_v46 = vsub.f32 %v8923_v52, %v8956_v51  ;;  %v196_v53 = vsel %vm113_vm1, %v48_v43, 0 }
  0xa8   :  { %6394 = vmatprep.mubr.f32.mxu0 %v8907_v58  ;;  %10995 = vst [vmem:[#allocation97_spill] sm:$0xff] %v8956_v51  ;;  %10996 = vst [vmem:[#allocation98_spill] sm:$0xff] %v8964_v6  ;;  %v8970_v58 = vsub.f32 %v184_v45, %v8935_v15  ;;  %v8986_v45 = vand.u32 4294901760, %v465_v42  ;;  %v8990_v40 = vand.u32 4294901760, %v193_v63  ;;  %v505_v42 = vsub.f32 %v8933_v54, %v8967_v29  ;;  %v51_v51 = vld [vmem:[%s10673_s1 + $0xf0] sm:$0xff] }
  0xa9   :  { %10997 = vst [vmem:[#allocation99_spill] sm:$0xff] %v8967_v29  ;;  %10999 = vst [vmem:[#allocation101_spill] sm:$0xff] %v8976_v26  ;;  %v9011_v43 = vand.u32 4294901760, %v8981_v37  ;;  %v9014_v52 = vsub.f32 %v190_v61, %v8983_v24  ;;  %v9016_v6 = vand.u32 4294901760, %v196_v53  ;;  %v9019_v29 = vand.u32 4294901760, %v485_v46  ;;  %v52_v61 = vld [vmem:[%s10673_s1 + $0xf8] sm:$0xff] }
  0xaa   :  { %10998 = vst [vmem:[#allocation100_spill] sm:$0xff] %v8970_v58  ;;  %11000 = vst [vmem:[#allocation102_spill] sm:$0xff] %v8981_v37  ;;  %v9022_v54 = vsub.f32 %v193_v63, %v8990_v40  ;;  %v9031_v9 = vand.u32 4294901760, %v495_v34  ;;  %v9033_v30 = vand.u32 4294901760, %v505_v42 }
  0xab   :  { %6395 = vmatmul.mubr.f32.gmra.mrb[14].mxu0 %v8941_v21  ;;  %11001 = vst [vmem:[#allocation103_spill] sm:$0xff] %v8983_v24  ;;  %11002 = vst [vmem:[#allocation104_spill] sm:$0xff] %v8986_v45  ;;  %v199_v21 = vsel %vm113_vm1, %v49_v28, 0  ;;  %v9008_v28 = vand.u32 4294901760, %v475_v32  ;;  %v202_v32 = vsel %vm113_vm1, %v50_v13, 0  ;;  %v525_v63 = vsub.f32 %v8981_v37, %v9011_v43 }
  0xac   :  { %6397 = vmatprep.mubr.f32.mxu0 %v8951_v22  ;;  %11003 = vst [vmem:[#allocation105_spill] sm:$0xff] %v8990_v40  ;;  %v9002_v22 = vand.u32 4294901760, %v8970_v58  ;;  %11006 = vst [vmem:[#allocation108_spill] sm:$0xff] %v9011_v43  ;;  %v9024_v33 = vand.u32 4294901760, %v199_v21  ;;  %v9041_v13 = vand.u32 4294901760, %v9014_v52  ;;  %v9050_v34 = vand.u32 4294901760, %v9022_v54 }
  0xad   :  { %11005 = vst [vmem:[#allocation107_spill] sm:$0xff] %v9008_v28  ;;  %11007 = vst [vmem:[#allocation109_spill] sm:$0xff] %v9014_v52  ;;  %v208_v43 = vsel %vm113_vm1, %v52_v61, 0 }
  0xae   :  { %11004 = vst [vmem:[#allocation106_spill] sm:$0xff] %v9002_v22  ;;  %11008 = vst [vmem:[#allocation110_spill] sm:$0xff] %v9016_v6  ;;  %v515_v46 = vsub.f32 %v8970_v58, %v9002_v22  ;;  %v9053_v42 = vsub.f32 %v199_v21, %v9024_v33  ;;  %v9069_v58 = vand.u32 4294901760, %v208_v43  ;;  %v9072_v21 = vand.u32 4294901760, %v525_v63 }
  0xaf   :  { %6398 = vmatmul.mubr.f32.gmra.mrb[16].mxu0 %v8976_v26  ;;  %11009 = vst [vmem:[#allocation111_spill] sm:$0xff] %v9019_v29  ;;  %11010 = vst [vmem:[#allocation112_spill] sm:$0xff] %v9022_v54  ;;  %v205_v26 = vsel %vm113_vm1, %v51_v51, 0  ;;  %v9044_v51 = vsub.f32 %v196_v53, %v9016_v6  ;;  %v535_v53 = vsub.f32 %v9014_v52, %v9041_v13 }
  0xb0   :  { %6400 = vmatprep.mubr.f32.mxu0 %v8986_v45  ;;  %11011 = vst [vmem:[#allocation113_spill] sm:$0xff] %v9024_v33  ;;  %11012 = vst [vmem:[#allocation114_spill] sm:$0xff] %v9031_v9  ;;  %v9046_v45 = vand.u32 4294901760, %v202_v32  ;;  %v9058_v22 = vand.u32 4294901760, %v515_v46  ;;  %v545_v61 = vsub.f32 %v9022_v54, %v9050_v34  ;;  %v9077_v46 = vand.u32 4294901760, %v9053_v42 }
  0xb1   :  { %11013 = vst [vmem:[#allocation115_spill] sm:$0xff] %v9033_v30  ;;  %11014 = vst [vmem:[#allocation116_spill] sm:$0xff] %v9041_v13  ;;  %v9064_v37 = vand.u32 4294901760, %v9044_v51  ;;  %v9083_v13 = vand.u32 4294901760, %v535_v53  ;;  %v9091_v63 = vsub.f32 %v208_v43, %v9069_v58 }
  0xb2   :  { %11015 = vst [vmem:[#allocation117_spill] sm:$0xff] %v9044_v51  ;;  %11016 = vst [vmem:[#allocation118_spill] sm:$0xff] %v9046_v45 }
  0xb3   :  { %6401 = vmatmul.mubr.f32.gmra.mrb[18].mxu0 %v9008_v28  ;;  %11017 = vst [vmem:[#allocation119_spill] sm:$0xff] %v9050_v34  ;;  %11018 = vst [vmem:[#allocation120_spill] sm:$0xff] %v9053_v42  ;;  %v9055_v28 = vand.u32 4294901760, %v205_v26  ;;  %v9094_v34 = vand.u32 4294901760, %v545_v61  ;;  %v9107_v43 = vand.u32 4294901760, %v9091_v63 }
  0xb4   :  { %6403 = vmatprep.mubr.f32.mxu0 %v9019_v29  ;;  %11020 = vst [vmem:[#allocation122_spill] sm:$0xff] %v9058_v22  ;;  %11021 = vst [vmem:[#allocation123_spill] sm:$0xff] %v9064_v37  ;;  %v9067_v29 = vsub.f32 %v202_v32, %v9046_v45  ;;  %v555_v32 = vsub.f32 %v9044_v51, %v9064_v37 }
  0xb5   :  { %11019 = vst [vmem:[#allocation121_spill] sm:$0xff] %v9055_v28  ;;  %11023 = vst [vmem:[#allocation125_spill] sm:$0xff] %v9069_v58 }
  0xb6   :  { %11022 = vst [vmem:[#allocation124_spill] sm:$0xff] %v9067_v29  ;;  %11024 = vst [vmem:[#allocation126_spill] sm:$0xff] %v9072_v21  ;;  %v9102_v53 = vand.u32 4294901760, %v555_v32  ;;  %v595_v32 = vsub.f32 %v9091_v63, %v9107_v43 }
  0xb7   :  { %6404 = vmatmul.mubr.f32.gmra.mrb[20].mxu0 %v9031_v9  ;;  %11025 = vst [vmem:[#allocation127_spill] sm:$0xff] %v9077_v46  ;;  %v9080_v9 = vsub.f32 %v205_v26, %v9055_v28  ;;  %11027 = vst [vmem:[#allocation129_spill] sm:$0xff] %v9083_v13  ;;  %v565_v26 = vsub.f32 %v9053_v42, %v9077_v46 }
  0xb8   :  { %6406 = vmatprep.mubr.f32.mxu0 %v9033_v30  ;;  %v9088_v30 = vand.u32 4294901760, %v9067_v29  ;;  %11029 = vst [vmem:[#allocation131_spill] sm:$0xff] %v9091_v63  ;;  %11031 = vst [vmem:[#allocation133_spill] sm:$0xff] %v9107_v43 }
  0xb9   :  { %11026 = vst [vmem:[#allocation128_spill] sm:$0xff] %v9080_v9  ;;  %v9110_v61 = vand.u32 4294901760, %v565_v26 }
  0xba   :  { %11028 = vst [vmem:[#allocation130_spill] sm:$0xff] %v9088_v30  ;;  %v575_v37 = vsub.f32 %v9067_v29, %v9088_v30  ;;  %v9123_v30 = vand.u32 4294901760, %v595_v32 }
  0xbb   :  { %6407 = vmatmul.mubr.f32.gmra.mrb[22].mxu0 %v9058_v22  ;;  %v9099_v22 = vand.u32 4294901760, %v9080_v9 }
  0xbc   :  { %6409 = vmatprep.mubr.f32.mxu0 %v9072_v21  ;;  %v9115_v46 = vand.u32 4294901760, %v575_v37  ;;  %11034 = vst [vmem:[#allocation136_spill] sm:$0xff] %v9123_v30  ;;  %v11038_v37 = vld [vmem:[#allocation14_spill] sm:$0xff] }
  0xbd   :  { %11030 = vst [vmem:[#allocation132_spill] sm:$0xff] %v9099_v22  ;;  %v585_v21 = vsub.f32 %v9080_v9, %v9099_v22 }
  0xbe   :  { %11032 = vst [vmem:[#allocation134_spill] sm:$0xff] %v9115_v46 }
  0xbf   :  { %6410 = vmatmul.mubr.f32.gmra.mrb[24].mxu0 %v9083_v13  ;;  %v9120_v13 = vand.u32 4294901760, %v585_v21  ;;  %v11040_v21 = vld [vmem:[#allocation23_spill] sm:$0xff] }
  0xc0   :  { %6412 = vmatprep.mubr.f32.mxu0 %v9094_v34  ;;  %v11041_v26 = vand.u32 4294901760, %v11040_v21  ;;  %v11051_v21 = vld [vmem:[#allocation76_spill] sm:$0xff] }
  0xc1   :  { %11033 = vst [vmem:[#allocation135_spill] sm:$0xff] %v9120_v13 }
  0xc3   :  { %6413 = vmatmul.mubr.f32.gmra.mrb[26].mxu0 %v9102_v53 }
  0xc4   :  { %6415 = vmatprep.mubr.f32.mxu0 %v9110_v61 }
  0xc7   :  { %6416 = vmatmul.mubr.f32.gmra.mrb[28].mxu0 %v9115_v46  ;;  %v11097_v46 = vmov 0.0  }
  0xc8   :  { %6418 = vmatprep.mubr.f32.mxu0 %v9120_v13 }
  0xcb   :  { %6419 = vmatmul.mubr.f32.gmra.mrb[30].mxu0 %v9123_v30 }
  0xcc   :  { %6435 = vmatprep.mubr.f32.mxu0 %v8521_v3 }
  0xcf   :  { %6436 = vmatmul.mubr.f32.vlgmr.msra.gmra.mrb[0].mxu0 %v8554_v17 }
  0xd0   :  { %7550 = vmatpush3.bf16.msra.mxu0 %v8839_v60  ;;  %6438 = vmatprep.mubr.f32.mxu0 %v8556_v18  ;;  %v11039_v60 = vand.u32 4294901760, %v11038_v37  ;;  %v11049_v37 = vld [vmem:[#allocation68_spill] sm:$0xff] }
  0xd1   :  { %7552 = vmatprep.subr.bf16.mxu0 %v8670_v38 }
  0xd2   :  { %v7571_v32 = vpack.c.bf16 %v11041_v26, %v11039_v60  ;;  %v11050_v60 = vld [vmem:[#allocation72_spill] sm:$0xff] }
  0xd3   :  { %6439 = vmatmul.mubr.f32.gmra.mrb[2].mxu0 %v8558_v19  ;;  %v11052_v26 = vld [vmem:[#allocation80_spill] sm:$0xff] }
  0xd4   :  { %7554 = vmatpush3.bf16.msra.mxu0 %v8670_v38  ;;  %6441 = vmatprep.mubr.f32.mxu0 %v8590_v35  ;;  %v11035_v38 = vld [vmem:[#allocation32_spill] sm:$0xff] }
  0xd5   :  { %7556 = vmatprep.subr.bf16.mxu0 %v8687_v55 }
  0xd7   :  { %6442 = vmatmul.mubr.f32.gmra.mrb[4].mxu0 %v8595_v41 }
  0xd8   :  { %7558 = vmatpush3.bf16.msra.mxu0 %v8687_v55  ;;  %6444 = vmatprep.mubr.f32.mxu0 %v8641_v2  ;;  %v11036_v55 = vld [vmem:[#allocation33_spill] sm:$0xff] }
  0xd9   :  { %6495 = vmatprep.subr.mxu0 %v8702_v12 }
  0xdb   :  { %6445 = vmatmul.mubr.f32.gmra.mrb[6].mxu0 %v8657_v20 }
  0xdc   :  { %6496 = vmatpush3.msra.mxu0 %v8702_v12  ;;  %6447 = vmatprep.mubr.f32.mxu0 %v8682_v47  ;;  %v11037_v12 = vld [vmem:[#allocation34_spill] sm:$0xff] }
  0xdd   :  { %7560 = vmatprep.subr.bf16.mxu0 %v8617_v50 }
  0xdf   :  { %6448 = vmatmul.mubr.f32.gmra.mrb[8].mxu0 %v8692_v56 }
  0xe0   :  { %6450 = vmatprep.mubr.f32.mxu0 %v8694_v59 }
  0xe3   :  { %6451 = vmatmul.mubr.f32.gmra.mrb[10].mxu0 %v8731_v16 }
  0xe4   :  { %6453 = vmatprep.mubr.f32.mxu0 %v8747_v62 }
  0xe7   :  { %6454 = vmatmul.mubr.f32.gmra.mrb[12].mxu0 %v8762_v44 }
  0xe8   :  { %6456 = vmatprep.mubr.f32.mxu0 %v8764_v0 }
  0xeb   :  { %6457 = vmatmul.mubr.f32.gmra.mrb[14].mxu0 %v8797_v31 }
  0xec   :  { %6459 = vmatprep.mubr.f32.mxu0 %v8815_v36 }
  0xef   :  { %6460 = vmatmul.mubr.f32.gmra.mrb[16].mxu0 %v8845_v49 }
  0xf0   :  { %6462 = vmatprep.mubr.f32.mxu0 %v8853_v10 }
  0xf3   :  { %6463 = vmatmul.mubr.f32.gmra.mrb[18].mxu0 %v8877_v1 }
  0xf4   :  { %6465 = vmatprep.mubr.f32.mxu0 %v8890_v8 }
  0xf7   :  { %6466 = vmatmul.mubr.f32.gmra.mrb[20].mxu0 %v8902_v14 }
  0xf8   :  { %6468 = vmatprep.mubr.f32.mxu0 %v8904_v7 }
  0xfb   :  { %6469 = vmatmul.mubr.f32.gmra.mrb[22].mxu0 %v8935_v15 }
  0xfc   :  { %6471 = vmatprep.mubr.f32.mxu0 %v8948_v11 }
  0xff   :  { %6472 = vmatmul.mubr.f32.gmra.mrb[24].mxu0 %v8983_v24 }
 0x100   :  { %6474 = vmatprep.mubr.f32.mxu0 %v8990_v40 }
 0x103   :  { %6475 = vmatmul.mubr.f32.gmra.mrb[26].mxu0 %v9016_v6 }
 0x104   :  { %6477 = vmatprep.mubr.f32.mxu0 %v9024_v33 }
 0x107   :  { %6478 = vmatmul.mubr.f32.gmra.mrb[28].mxu0 %v9046_v45 }
 0x108   :  { %6480 = vmatprep.mubr.f32.mxu0 %v9055_v28 }
 0x10b   :  { %6481 = vmatmul.mubr.f32.gmra.mrb[30].mxu0 %v9069_v58 }
 0x10c   :  { %6497 = vmatprep.mubr.f32.mxu0 %v8526_v4 }
 0x10f   :  { %6498 = vmatmul.mubr.f32.vlgmr.msra.gmra.mrb[0].mxu0 %v8566_v23  ;;  %v11047_v23 = vld [vmem:[#allocation59_spill] sm:$0xff] }
 0x110   :  { %7562 = vmatpush3.bf16.msra.mxu0 %v8617_v50  ;;  %6500 = vmatprep.mubr.f32.mxu0 %v8571_v25  ;;  %v11045_v25 = vld [vmem:[#allocation52_spill] sm:$0xff] }
 0x111   :  { %7564 = vmatprep.subr.bf16.mxu0 %v8643_v5 }
 0x113   :  { %6501 = vmatmul.mubr.f32.gmra.mrb[2].mxu0 %v8577_v27  ;;  %v11043_v27 = vld [vmem:[#allocation43_spill] sm:$0xff] }
 0x114   :  { %7566 = vmatpush3.bf16.msra.mxu0 %v8643_v5  ;;  %6503 = vmatprep.mubr.f32.mxu0 %v8612_v48  ;;  %v11042_v48 = vld [vmem:[#allocation42_spill] sm:$0xff] }
 0x115   :  { %7568 = vmatprep.subr.bf16.mxu0 %v8672_v39 }
 0x117   :  { %6504 = vmatmul.mubr.f32.gmra.mrb[4].mxu0 %v8625_v57  ;;  %v11044_v57 = vld [vmem:[#allocation44_spill] sm:$0xff] }
 0x118   :  { %7570 = vmatpush3.bf16.msra.mxu0 %v8672_v39  ;;  %6506 = vmatprep.mubr.f32.mxu0 %v11035_v38  ;;  %v11046_v38 = vld [vmem:[#allocation57_spill] sm:$0xff] }
 0x119   :  { %6557 = vmatprep.subr.mxu0 %v11036_v55 }
 0x11b   :  { %6507 = vmatmul.mubr.f32.gmra.mrb[6].mxu0 %v11037_v12  ;;  %v11048_v12 = vld [vmem:[#allocation60_spill] sm:$0xff] }
 0x11c   :  { %6558 = vmatpush3.msra.mxu0 %v11036_v55  ;;  %6509 = vmatprep.mubr.f32.mxu0 %v11042_v48  ;;  %v11053_v48 = vld [vmem:[#allocation87_spill] sm:$0xff] }
 0x11d   :  { %7572 = vmatprep.subr.bf16.mxu0 %v7571_v32 }
 0x11f   :  { %6510 = vmatmul.mubr.f32.gmra.mrb[8].mxu0 %v11043_v27  ;;  %v11054_v27 = vld [vmem:[#allocation89_spill] sm:$0xff] }
 0x120   :  { %6512 = vmatprep.mubr.f32.mxu0 %v11044_v57  ;;  %v11055_v57 = vld [vmem:[#allocation90_spill] sm:$0xff] }
 0x123   :  { %6513 = vmatmul.mubr.f32.gmra.mrb[10].mxu0 %v11045_v25  ;;  %v11056_v25 = vld [vmem:[#allocation91_spill] sm:$0xff] }
 0x124   :  { %6515 = vmatprep.mubr.f32.mxu0 %v11046_v38  ;;  %v11057_v38 = vld [vmem:[#allocation100_spill] sm:$0xff] }
 0x127   :  { %6516 = vmatmul.mubr.f32.gmra.mrb[12].mxu0 %v11047_v23  ;;  %v11058_v23 = vld [vmem:[#allocation102_spill] sm:$0xff] }
 0x128   :  { %6518 = vmatprep.mubr.f32.mxu0 %v11048_v12 }
 0x12b   :  { %6519 = vmatmul.mubr.f32.gmra.mrb[14].mxu0 %v11049_v37 }
 0x12c   :  { %6521 = vmatprep.mubr.f32.mxu0 %v11050_v60 }
 0x12f   :  { %6522 = vmatmul.mubr.f32.gmra.mrb[16].mxu0 %v11051_v21 }
 0x130   :  { %6524 = vmatprep.mubr.f32.mxu0 %v11052_v26 }
 0x133   :  { %6525 = vmatmul.mubr.f32.gmra.mrb[18].mxu0 %v11053_v48 }
 0x134   :  { %6527 = vmatprep.mubr.f32.mxu0 %v11054_v27 }
 0x137   :  { %6528 = vmatmul.mubr.f32.gmra.mrb[20].mxu0 %v11055_v57  ;;  %v11059_v57 = vld [vmem:[#allocation8_spill] sm:$0xff] }
 0x138   :  { %6530 = vmatprep.mubr.f32.mxu0 %v11056_v25  ;;  %v11060_v25 = vld [vmem:[#allocation17_spill] sm:$0xff] }
 0x13b   :  { %6531 = vmatmul.mubr.f32.gmra.mrb[22].mxu0 %v11057_v38 }
 0x13c   :  { %6533 = vmatprep.mubr.f32.mxu0 %v11058_v23  ;;  %v11061_v23 = vld [vmem:[#allocation18_spill] sm:$0xff] }
 0x13f   :  { %6534 = vmatmul.mubr.f32.gmra.mrb[24].mxu0 %v9014_v52  ;;  %v11062_v52 = vld [vmem:[#allocation36_spill] sm:$0xff] }
 0x140   :  { %6536 = vmatprep.mubr.f32.mxu0 %v9022_v54  ;;  %v11063_v54 = vld [vmem:[#allocation20_spill] sm:$0xff] }
 0x143   :  { %6537 = vmatmul.mubr.f32.gmra.mrb[26].mxu0 %v9044_v51  ;;  %v11081_v51 = vld [vmem:[#allocation94_spill] sm:$0xff] }
 0x144   :  { %6539 = vmatprep.mubr.f32.mxu0 %v9053_v42  ;;  %v11064_v42 = vld [vmem:[#allocation27_spill] sm:$0xff] }
 0x147   :  { %6540 = vmatmul.mubr.f32.gmra.mrb[28].mxu0 %v9067_v29  ;;  %v11065_v29 = vld [vmem:[#allocation39_spill] sm:$0xff] }
 0x148   :  { %6542 = vmatprep.mubr.f32.mxu0 %v9080_v9  ;;  %v11066_v9 = vld [vmem:[#allocation30_spill] sm:$0xff] }
 0x14b   :  { %6543 = vmatmul.mubr.f32.gmra.mrb[30].mxu0 %v9091_v63  ;;  %v11077_v63 = vld [vmem:[#allocation75_spill] sm:$0xff] }
 0x14c   :  { %6559 = vmatprep.mubr.f32.mxu0 %v11059_v57  ;;  %v11067_v57 = vld [vmem:[#allocation40_spill] sm:$0xff] }
 0x14f   :  { %6560 = vmatmul.mubr.f32.vlgmr.msra.gmra.mrb[0].mxu0 %v11060_v25  ;;  %v11068_v25 = vld [vmem:[#allocation46_spill] sm:$0xff] }
 0x150   :  { %7574 = vmatpush3.bf16.msra.mxu0 %v7571_v32  ;;  %6562 = vmatprep.mubr.f32.mxu0 %v11061_v23  ;;  %v11069_v32 = vld [vmem:[#allocation41_spill] sm:$0xff]  ;;  %v11070_v23 = vld [vmem:[#allocation48_spill] sm:$0xff] }
 0x151   :  { %7576 = vmatprep.subr.bf16.mxu0 %v11062_v52 }
 0x153   :  { %6563 = vmatmul.mubr.f32.gmra.mrb[2].mxu0 %v11063_v54  ;;  %v11073_v54 = vld [vmem:[#allocation58_spill] sm:$0xff] }
 0x154   :  { %7578 = vmatpush3.bf16.msra.mxu0 %v11062_v52  ;;  %6565 = vmatprep.mubr.f32.mxu0 %v11064_v42  ;;  %v11071_v52 = vld [vmem:[#allocation51_spill] sm:$0xff] }
 0x155   :  { %7580 = vmatprep.subr.bf16.mxu0 %v11065_v29  ;;  %v11072_v42 = vld [vmem:[#allocation55_spill] sm:$0xff] }
 0x157   :  { %6566 = vmatmul.mubr.f32.gmra.mrb[4].mxu0 %v11066_v9  ;;  %v11074_v9 = vld [vmem:[#allocation64_spill] sm:$0xff] }
 0x158   :  { %7582 = vmatpush3.bf16.msra.mxu0 %v11065_v29  ;;  %6568 = vmatprep.mubr.f32.mxu0 %v11067_v57  ;;  %v11075_v29 = vld [vmem:[#allocation66_spill] sm:$0xff]  ;;  %v11076_v57 = vld [vmem:[#allocation67_spill] sm:$0xff] }
 0x159   :  { %6619 = vmatprep.subr.mxu0 %v11068_v25 }
 0x15b   :  { %6569 = vmatmul.mubr.f32.gmra.mrb[6].mxu0 %v11069_v32  ;;  %v11078_v32 = vld [vmem:[#allocation79_spill] sm:$0xff] }
 0x15c   :  { %6620 = vmatpush3.msra.mxu0 %v11068_v25  ;;  %6571 = vmatprep.mubr.f32.mxu0 %v11070_v23  ;;  %v11079_v25 = vld [vmem:[#allocation86_spill] sm:$0xff]  ;;  %v11080_v23 = vld [vmem:[#allocation88_spill] sm:$0xff] }
 0x15d   :  { %7584 = vmatprep.subr.bf16.mxu0 %v8617_v50 }
 0x15f   :  { %6572 = vmatmul.mubr.f32.gmra.mrb[8].mxu0 %v11071_v52  ;;  %v11082_v52 = vld [vmem:[#allocation97_spill] sm:$0xff] }
 0x160   :  { %6574 = vmatprep.mubr.f32.mxu0 %v11072_v42  ;;  %v11083_v42 = vld [vmem:[#allocation98_spill] sm:$0xff] }
 0x163   :  { %6575 = vmatmul.mubr.f32.gmra.mrb[10].mxu0 %v11073_v54  ;;  %v11084_v54 = vld [vmem:[#allocation99_spill] sm:$0xff] }
 0x164   :  { %6577 = vmatprep.mubr.f32.mxu0 %v11074_v9  ;;  %v11085_v9 = vld [vmem:[#allocation106_spill] sm:$0xff] }
 0x167   :  { %6578 = vmatmul.mubr.f32.gmra.mrb[12].mxu0 %v11075_v29  ;;  %v11086_v29 = vld [vmem:[#allocation108_spill] sm:$0xff] }
 0x168   :  { %6580 = vmatprep.mubr.f32.mxu0 %v11076_v57  ;;  %v11087_v57 = vld [vmem:[#allocation116_spill] sm:$0xff] }
 0x16b   :  { %6581 = vmatmul.mubr.f32.gmra.mrb[14].mxu0 %v11077_v63  ;;  %v11088_v63 = vld [vmem:[#allocation119_spill] sm:$0xff] }
 0x16c   :  { %6583 = vmatprep.mubr.f32.mxu0 %v11078_v32  ;;  %v11089_v32 = vld [vmem:[#allocation123_spill] sm:$0xff] }
 0x16f   :  { %6584 = vmatmul.mubr.f32.gmra.mrb[16].mxu0 %v11079_v25  ;;  %v11090_v25 = vld [vmem:[#allocation127_spill] sm:$0xff] }
 0x170   :  { %6586 = vmatprep.mubr.f32.mxu0 %v11080_v23  ;;  %v11091_v23 = vld [vmem:[#allocation130_spill] sm:$0xff] }
 0x173   :  { %6587 = vmatmul.mubr.f32.gmra.mrb[18].mxu0 %v11081_v51 }
 0x174   :  { %6589 = vmatprep.mubr.f32.mxu0 %v11082_v52 }
 0x177   :  { %6590 = vmatmul.mubr.f32.gmra.mrb[20].mxu0 %v11083_v42 }
 0x178   :  { %6592 = vmatprep.mubr.f32.mxu0 %v11084_v54 }
 0x17b   :  { %6593 = vmatmul.mubr.f32.gmra.mrb[22].mxu0 %v11085_v9 }
 0x17c   :  { %6595 = vmatprep.mubr.f32.mxu0 %v11086_v29 }
 0x17f   :  { %6596 = vmatmul.mubr.f32.gmra.mrb[24].mxu0 %v11087_v57 }
 0x180   :  { %6598 = vmatprep.mubr.f32.mxu0 %v11088_v63 }
 0x183   :  { %6599 = vmatmul.mubr.f32.gmra.mrb[26].mxu0 %v11089_v32 }
 0x184   :  { %6601 = vmatprep.mubr.f32.mxu0 %v11090_v25 }
 0x187   :  { %6602 = vmatmul.mubr.f32.gmra.mrb[28].mxu0 %v11091_v23 }
 0x188   :  { %6604 = vmatprep.mubr.f32.mxu0 %v9099_v22 }
 0x18b   :  { %6605 = vmatmul.mubr.f32.gmra.mrb[30].mxu0 %v9107_v43 }
 0x18c   :  { %6621 = vmatprep.mubr.f32.mxu0 %v8521_v3 }
 0x18f   :  { %6622 = vmatmul.mubr.f32.vlgmr.msra.gmra.mrb[0].mxu0 %v8554_v17 }
 0x190   :  { %7586 = vmatpush3.bf16.msra.mxu0 %v8617_v50  ;;  %6624 = vmatprep.mubr.f32.mxu0 %v8556_v18 }
 0x191   :  { %7588 = vmatprep.subr.bf16.mxu0 %v8643_v5 }
 0x193   :  { %6625 = vmatmul.mubr.f32.gmra.mrb[2].mxu0 %v8558_v19 }
 0x194   :  { %7590 = vmatpush3.bf16.msra.mxu0 %v8643_v5  ;;  %6627 = vmatprep.mubr.f32.mxu0 %v8590_v35 }
 0x195   :  { %7592 = vmatprep.subr.bf16.mxu0 %v8672_v39 }
 0x197   :  { %6628 = vmatmul.mubr.f32.gmra.mrb[4].mxu0 %v8595_v41 }
 0x198   :  { %7594 = vmatpush3.bf16.msra.mxu0 %v8672_v39  ;;  %6630 = vmatprep.mubr.f32.mxu0 %v8641_v2 }
 0x199   :  { %6681 = vmatprep.subr.mxu0 %v11036_v55 }
 0x19b   :  { %6631 = vmatmul.mubr.f32.gmra.mrb[6].mxu0 %v8657_v20 }
 0x19c   :  { %6682 = vmatpush3.msra.mxu0 %v11036_v55  ;;  %6633 = vmatprep.mubr.f32.mxu0 %v8682_v47 }
 0x19f   :  { %6634 = vmatmul.mubr.f32.gmra.mrb[8].mxu0 %v8692_v56 }
 0x1a0   :  { %6636 = vmatprep.mubr.f32.mxu0 %v8694_v59 }
 0x1a3   :  { %6637 = vmatmul.mubr.f32.gmra.mrb[10].mxu0 %v8731_v16 }
 0x1a4   :  { %6639 = vmatprep.mubr.f32.mxu0 %v8747_v62 }
 0x1a7   :  { %6640 = vmatmul.mubr.f32.gmra.mrb[12].mxu0 %v8762_v44 }
 0x1a8   :  { %6642 = vmatprep.mubr.f32.mxu0 %v8764_v0 }
 0x1ab   :  { %6643 = vmatmul.mubr.f32.gmra.mrb[14].mxu0 %v8797_v31 }
 0x1ac   :  { %6645 = vmatprep.mubr.f32.mxu0 %v8815_v36 }
 0x1af   :  { %6646 = vmatmul.mubr.f32.gmra.mrb[16].mxu0 %v8845_v49 }
 0x1b0   :  { %6648 = vmatprep.mubr.f32.mxu0 %v8853_v10 }
 0x1b3   :  { %6649 = vmatmul.mubr.f32.gmra.mrb[18].mxu0 %v8877_v1 }
 0x1b4   :  { %6651 = vmatprep.mubr.f32.mxu0 %v8890_v8 }
 0x1b7   :  { %6652 = vmatmul.mubr.f32.gmra.mrb[20].mxu0 %v8902_v14 }
 0x1b8   :  { %6654 = vmatprep.mubr.f32.mxu0 %v8904_v7 }
 0x1bb   :  { %6655 = vmatmul.mubr.f32.gmra.mrb[22].mxu0 %v8935_v15 }
 0x1bc   :  { %6657 = vmatprep.mubr.f32.mxu0 %v8948_v11 }
 0x1bf   :  { %6658 = vmatmul.mubr.f32.gmra.mrb[24].mxu0 %v8983_v24 }
 0x1c0   :  { %6660 = vmatprep.mubr.f32.mxu0 %v8990_v40 }
 0x1c3   :  { %6661 = vmatmul.mubr.f32.gmra.mrb[26].mxu0 %v9016_v6 }
 0x1c4   :  { %6663 = vmatprep.mubr.f32.mxu0 %v9024_v33 }
 0x1c7   :  { %6664 = vmatmul.mubr.f32.gmra.mrb[28].mxu0 %v9046_v45 }
 0x1c8   :  { %6666 = vmatprep.mubr.f32.mxu0 %v9055_v28 }
 0x1cb   :  { %6667 = vmatmul.mubr.f32.gmra.mrb[30].mxu0 %v9069_v58 }
 0x1cc   :  { %6683 = vmatprep.mubr.f32.mxu0 %v8521_v3 }
 0x1cf   :  { %6684 = vmatmul.mubr.f32.vlgmr.msra.gmra.mrb[0].mxu0 %v8554_v17 }
 0x1d0   :  { %6686 = vmatprep.mubr.f32.mxu0 %v8556_v18 }
 0x1d3   :  { %6687 = vmatmul.mubr.f32.gmra.mrb[2].mxu0 %v8558_v19 }
 0x1d4   :  { %6689 = vmatprep.mubr.f32.mxu0 %v8590_v35 }
 0x1d7   :  { %6690 = vmatmul.mubr.f32.gmra.mrb[4].mxu0 %v8595_v41 }
 0x1d8   :  { %6692 = vmatprep.mubr.f32.mxu0 %v8641_v2 }
 0x1db   :  { %6693 = vmatmul.mubr.f32.gmra.mrb[6].mxu0 %v8657_v20 }
 0x1dc   :  { %6695 = vmatprep.mubr.f32.mxu0 %v8682_v47 }
 0x1df   :  { %6696 = vmatmul.mubr.f32.gmra.mrb[8].mxu0 %v8692_v56 }
 0x1e0   :  { %6698 = vmatprep.mubr.f32.mxu0 %v8694_v59 }
 0x1e3   :  { %6699 = vmatmul.mubr.f32.gmra.mrb[10].mxu0 %v8731_v16 }
 0x1e4   :  { %6701 = vmatprep.mubr.f32.mxu0 %v8747_v62 }
 0x1e7   :  { %6702 = vmatmul.mubr.f32.gmra.mrb[12].mxu0 %v8762_v44 }
 0x1e8   :  { %6704 = vmatprep.mubr.f32.mxu0 %v8764_v0 }
 0x1eb   :  { %6705 = vmatmul.mubr.f32.gmra.mrb[14].mxu0 %v8797_v31 }
 0x1ec   :  { %6707 = vmatprep.mubr.f32.mxu0 %v8815_v36 }
 0x1ef   :  { %6708 = vmatmul.mubr.f32.gmra.mrb[16].mxu0 %v8845_v49 }
 0x1f0   :  { %6710 = vmatprep.mubr.f32.mxu0 %v8853_v10 }
 0x1f3   :  { %6711 = vmatmul.mubr.f32.gmra.mrb[18].mxu0 %v8877_v1 }
 0x1f4   :  { %6713 = vmatprep.mubr.f32.mxu0 %v8890_v8 }
 0x1f7   :  { %6714 = vmatmul.mubr.f32.gmra.mrb[20].mxu0 %v8902_v14 }
 0x1f8   :  { %6716 = vmatprep.mubr.f32.mxu0 %v8904_v7 }
 0x1fb   :  { %6717 = vmatmul.mubr.f32.gmra.mrb[22].mxu0 %v8935_v15 }
 0x1fc   :  { %6719 = vmatprep.mubr.f32.mxu0 %v8948_v11 }
 0x1ff   :  { %6720 = vmatmul.mubr.f32.gmra.mrb[24].mxu0 %v8983_v24 }
 0x200   :  { %6722 = vmatprep.mubr.f32.mxu0 %v8990_v40 }
 0x203   :  { %6723 = vmatmul.mubr.f32.gmra.mrb[26].mxu0 %v9016_v6 }
 0x204   :  { %6725 = vmatprep.mubr.f32.mxu0 %v9024_v33 }
 0x207   :  { %6726 = vmatmul.mubr.f32.gmra.mrb[28].mxu0 %v9046_v45 }
 0x208   :  { %6728 = vmatprep.mubr.f32.mxu0 %v9055_v28 }
 0x20b   :  { %6729 = vmatmul.mubr.f32.gmra.mrb[30].mxu0 %v9069_v58 }
 0x2a2   :  { %v9320_v50 = vpop.f32.mrb[0].mxu0 }
 0x2a3   :  { %v9322_v5 = vpop.f32.mrb[1].mxu0  ;;  %v2070_v39 = vsel %vm68_vm0, %v9320_v50, -inf }
 0x2a4   :  { %2071 = vmax.xlane.f32.xlu1 %v2070_v39  ;;  %v2067_v55 = vsel %vm68_vm0, %v9322_v5, -inf }
 0x2a5   :  { %2068 = vmax.xlane.f32.xlu0 %v2067_v55 }
 0x2a6   :  { %v9328_v43 = vpop.f32.mrb[2].mxu0 }
 0x2a7   :  { %v9330_v22 = vpop.f32.mrb[3].mxu0  ;;  %v2076_v23 = vsel %vm68_vm0, %v9328_v43, -inf }
 0x2a8   :  { %v2073_v63 = vsel %vm68_vm0, %v9330_v22, -inf }
 0x2a9   :  { %2077 = vmax.xlane.f32.xlu0 %v2076_v23 }
 0x2aa   :  { %v9334_v25 = vpop.f32.mrb[4].mxu0 }
 0x2ab   :  { %v9336_v32 = vpop.f32.mrb[5].mxu0  ;;  %v2082_v29 = vsel %vm68_vm0, %v9334_v25, -inf }
 0x2ac   :  { %v2079_v39 = vsel %vm68_vm0, %v9336_v32, -inf }
 0x2ad   :  { %2074 = vmax.xlane.f32.xlu0 %v2073_v63  ;;  %2080 = vmax.xlane.f32.xlu1 %v2079_v39 }
 0x2ae   :  { %v9342_v55 = vpop.f32.mrb[6].mxu0 }
 0x2af   :  { %v9344_v57 = vpop.f32.mrb[7].mxu0  ;;  %v2088_v63 = vsel %vm68_vm0, %v9342_v55, -inf }
 0x2b0   :  { %v2085_v23 = vsel %vm68_vm0, %v9344_v57, -inf }
 0x2b1   :  { %2083 = vmax.xlane.f32.xlu0 %v2082_v29  ;;  %2086 = vmax.xlane.f32.xlu1 %v2085_v23 }
 0x2b2   :  { %v9350_v9 = vpop.f32.mrb[8].mxu0 }
 0x2b3   :  { %v9352_v54 = vpop.f32.mrb[9].mxu0  ;;  %v2094_v29 = vsel %vm68_vm0, %v9350_v9, -inf }
 0x2b4   :  { %v2091_v39 = vsel %vm68_vm0, %v9352_v54, -inf }
 0x2b5   :  { %2089 = vmax.xlane.f32.xlu0 %v2088_v63  ;;  %2092 = vmax.xlane.f32.xlu1 %v2091_v39 }
 0x2b6   :  { %v9358_v42 = vpop.f32.mrb[10].mxu0 }
 0x2b7   :  { %v9360_v52 = vpop.f32.mrb[11].mxu0  ;;  %v2100_v63 = vsel %vm68_vm0, %v9358_v42, -inf }
 0x2b8   :  { %v2097_v23 = vsel %vm68_vm0, %v9360_v52, -inf }
 0x2b9   :  { %2095 = vmax.xlane.f32.xlu0 %v2094_v29  ;;  %2098 = vmax.xlane.f32.xlu1 %v2097_v23 }
 0x2ba   :  { %v9366_v51 = vpop.f32.mrb[12].mxu0 }
 0x2bb   :  { %v9368_v38 = vpop.f32.mrb[13].mxu0  ;;  %v2106_v29 = vsel %vm68_vm0, %v9366_v51, -inf }
 0x2bc   :  { %v2103_v39 = vsel %vm68_vm0, %v9368_v38, -inf }
 0x2bd   :  { %2101 = vmax.xlane.f32.xlu0 %v2100_v63  ;;  %2104 = vmax.xlane.f32.xlu1 %v2103_v39 }
 0x2be   :  { %v9374_v27 = vpop.f32.mrb[14].mxu0 }
 0x2bf   :  { %v9376_v48 = vpop.f32.mrb[15].mxu0  ;;  %v2112_v63 = vsel %vm68_vm0, %v9374_v27, -inf }
 0x2c0   :  { %v2109_v23 = vsel %vm68_vm0, %v9376_v48, -inf }
 0x2c1   :  { %2107 = vmax.xlane.f32.xlu0 %v2106_v29  ;;  %2110 = vmax.xlane.f32.xlu1 %v2109_v23 }
 0x2c2   :  { %v9382_v26 = vpop.f32.mrb[16].mxu0 }
 0x2c3   :  { %v9384_v21 = vpop.f32.mrb[17].mxu0 }
 0x2c5   :  { %2113 = vmax.xlane.f32.xlu0 %v2112_v63 }
 0x2c6   :  { %v9388_v39 = vpop.f32.mrb[18].mxu0 }
 0x2c7   :  { %v9390_v60 = vpop.f32.mrb[19].mxu0 }
 0x2ca   :  { %v9392_v37 = vpop.f32.mrb[20].mxu0 }
 0x2cb   :  { %v9394_v12 = vpop.f32.mrb[21].mxu0 }
 0x2ce   :  { %v9396_v4 = vpop.f32.mrb[22].mxu0 }
 0x2cf   :  { %v9398_v29 = vpop.f32.mrb[23].mxu0 }
 0x2d2   :  { %v9400_v23 = vpop.f32.mrb[24].mxu0 }
 0x2d3   :  { %v9402_v58 = vpop.f32.mrb[25].mxu0 }
 0x2d6   :  { %v9404_v28 = vpop.f32.mrb[26].mxu0 }
 0x2d7   :  { %v9406_v45 = vpop.f32.mrb[27].mxu0 }
 0x2da   :  { %v9408_v63 = vpop.f32.mrb[28].mxu0 }
 0x2db   :  { %v9410_v33 = vpop.f32.mrb[29].mxu0 }
 0x2de   :  { %v9412_v6 = vpop.f32.mrb[30].mxu0 }
 0x2df   :  { %v9414_v40 = vpop.f32.mrb[31].mxu0 }
 0x331   :  { %v2072_v24 = vpop.xlane.xlu1 %2071 }
 0x332   :  { %v2116_v11 = vsub.f32 %v9320_v50, %v2072_v24  ;;  %v2069_v15 = vpop.xlane.xlu0 %2068 }
 0x333   :  { %v2115_v7 = vsub.f32 %v9322_v5, %v2069_v15 }
 0x334   :  { %v2133_v14 = vmul.f32 1.442695, %v2116_v11 }
 0x335   :  { %v2131_v8 = vmul.f32 1.442695, %v2115_v7 }
 0x336   :  { %8312 = vpow2.f32 %v2133_v14  ;;  %v2078_v1 = vpop.xlane.xlu0 %2077 }
 0x337   :  { %8314 = vpow2.f32 %v2131_v8  ;;  %v2118_v10 = vsub.f32 %v9328_v43, %v2078_v1 }
 0x339   :  { %v2137_v49 = vmul.f32 1.442695, %v2118_v10 }
 0x33a   :  { %v2075_v36 = vpop.xlane.xlu0 %2074  ;;  %v2081_v31 = vpop.xlane.xlu1 %2080 }
 0x33b   :  { %8316 = vpow2.f32 %v2137_v49  ;;  %v2117_v0 = vsub.f32 %v9330_v22, %v2075_v36  ;;  %v2119_v44 = vsub.f32 %v9336_v32, %v2081_v31 }
 0x33d   :  { %v2135_v62 = vmul.f32 1.442695, %v2117_v0  ;;  %v2139_v24 = vmul.f32 1.442695, %v2119_v44 }
 0x33e   :  { %v2084_v50 = vpop.xlane.xlu0 %2083  ;;  %v2087_v16 = vpop.xlane.xlu1 %2086 }
 0x33f   :  { %8318 = vpow2.f32 %v2135_v62  ;;  %v2120_v7 = vsub.f32 %v9334_v25, %v2084_v50  ;;  %v2121_v14 = vsub.f32 %v9344_v57, %v2087_v16 }
 0x340   :  { %v9423_v8 = vpop.eup %8312  ;;  %8320 = vpow2.f32 %v2139_v24 }
 0x341   :  { %v9425_v1 = vpop.eup %8314  ;;  %v2141_v10 = vmul.f32 1.442695, %v2120_v7  ;;  %v2143_v49 = vmul.f32 1.442695, %v2121_v14  ;;  %v2166_v36 = vsel %vm68_vm0, %v9423_v8, 0.0 }
 0x342   :  { %v2090_v31 = vpop.xlane.xlu0 %2089  ;;  %v2093_v0 = vpop.xlane.xlu1 %2092  ;;  %2167 = vadd.xlane.f32.xlu0 %v2166_v36  ;;  %v2163_v62 = vsel %vm68_vm0, %v9425_v1, 0.0 }
 0x343   :  { %8322 = vpow2.f32 %v2141_v10  ;;  %v2122_v44 = vsub.f32 %v9342_v55, %v2090_v31  ;;  %v2123_v57 = vsub.f32 %v9352_v54, %v2093_v0  ;;  %2164 = vadd.xlane.f32.xlu1 %v2163_v62 }
 0x344   :  { %8324 = vpow2.f32 %v2143_v49 }
 0x345   :  { %v9433_v16 = vpop.eup %8316  ;;  %v2145_v15 = vmul.f32 1.442695, %v2122_v44  ;;  %v2147_v11 = vmul.f32 1.442695, %v2123_v57 }
 0x346   :  { %v2096_v22 = vpop.xlane.xlu0 %2095  ;;  %v2099_v43 = vpop.xlane.xlu1 %2098  ;;  %v2172_v32 = vsel %vm68_vm0, %v9433_v16, 0.0 }
 0x347   :  { %8326 = vpow2.f32 %v2145_v15  ;;  %v2124_v25 = vsub.f32 %v9350_v9, %v2096_v22  ;;  %v2125_v5 = vsub.f32 %v9360_v52, %v2099_v43  ;;  %2173 = vadd.xlane.f32.xlu0 %v2172_v32 }
 0x348   :  { %8328 = vpow2.f32 %v2147_v11 }
 0x349   :  { %v9439_v55 = vpop.eup %8318  ;;  %v2149_v54 = vmul.f32 1.442695, %v2124_v25  ;;  %v2151_v24 = vmul.f32 1.442695, %v2125_v5 }
 0x34a   :  { %v2102_v50 = vpop.xlane.xlu0 %2101  ;;  %v2105_v7 = vpop.xlane.xlu1 %2104  ;;  %v2169_v14 = vsel %vm68_vm0, %v9439_v55, 0.0 }
 0x34b   :  { %v9443_v10 = vpop.eup %8320  ;;  %8330 = vpow2.f32 %v2149_v54  ;;  %v2126_v49 = vsub.f32 %v9358_v42, %v2102_v50  ;;  %v2127_v9 = vsub.f32 %v9368_v38, %v2105_v7  ;;  %2170 = vadd.xlane.f32.xlu1 %v2169_v14 }
 0x34c   :  { %8332 = vpow2.f32 %v2151_v24  ;;  %v2175_v57 = vsel %vm68_vm0, %v9443_v10, 0.0 }
 0x34d   :  { %v9447_v52 = vpop.eup %8322  ;;  %v2153_v36 = vmul.f32 1.442695, %v2126_v49  ;;  %v2155_v31 = vmul.f32 1.442695, %v2127_v9 }
 0x34e   :  { %v2108_v0 = vpop.xlane.xlu0 %2107  ;;  %v2111_v62 = vpop.xlane.xlu1 %2110  ;;  %v2178_v44 = vsel %vm68_vm0, %v9447_v52, 0.0 }
 0x34f   :  { %v9453_v15 = vpop.eup %8324  ;;  %8334 = vpow2.f32 %v2153_v36  ;;  %v2128_v42 = vsub.f32 %v9366_v51, %v2108_v0  ;;  %v2129_v38 = vsub.f32 %v9376_v48, %v2111_v62  ;;  %2179 = vadd.xlane.f32.xlu0 %v2178_v44  ;;  %2176 = vadd.xlane.f32.xlu1 %v2175_v57 }
 0x350   :  { %8336 = vpow2.f32 %v2155_v31  ;;  %v2181_v5 = vsel %vm68_vm0, %v9453_v15, 0.0 }
 0x351   :  { %v9457_v11 = vpop.eup %8326  ;;  %v2157_v22 = vmul.f32 1.442695, %v2128_v42  ;;  %v2159_v43 = vmul.f32 1.442695, %v2129_v38 }
 0x352   :  { %v2114_v32 = vpop.xlane.xlu0 %2113  ;;  %v2184_v25 = vsel %vm68_vm0, %v9457_v11, 0.0  ;;  %v9463_v54 = vpop.eup %8328 }
 0x353   :  { %8338 = vpow2.f32 %v2157_v22  ;;  %v2130_v51 = vsub.f32 %v9374_v27, %v2114_v32  ;;  %2185 = vadd.xlane.f32.xlu0 %v2184_v25  ;;  %2182 = vadd.xlane.f32.xlu1 %v2181_v5  ;;  %v2187_v7 = vsel %vm68_vm0, %v9463_v54, 0.0  ;;  %v10871_v22 = vmov 0.0|0.0   ;;  %v5681_v32 = vld [vmem:[%s10672_s0 + $0x8] sm:$0xff] }
 0x354   :  { %8340 = vpow2.f32 %v2159_v43  ;;  %7595 = vmatprep.subr.bf16.mxu1 %v10871_v22  ;;  %7811 = vmatprep.subr.bf16.mxu0 %v10871_v22  ;;  %v10869_v43 = vmov 0.0  }
 0x355   :  { %v9466_v48 = vpop.eup %8330  ;;  %v2161_v24 = vmul.f32 1.442695, %v2130_v51  ;;  %6763 = vmatprep.mubr.msk.f32.mxu1 %vm8475_vm2, %v10869_v43  ;;  %7345 = vmatprep.mubr.msk.f32.mxu0 %vm8475_vm2, %v10869_v43 }
 0x356   :  { %v2190_v50 = vsel %vm68_vm0, %v9466_v48, 0.0  ;;  %v9472_v14 = vpop.eup %8332 }
 0x357   :  { %8342 = vpow2.f32 %v2161_v24  ;;  %2191 = vadd.xlane.f32.xlu0 %v2190_v50  ;;  %2188 = vadd.xlane.f32.xlu1 %v2187_v7  ;;  %v2193_v9 = vsel %vm68_vm0, %v9472_v14, 0.0  ;;  %v53_v50 = vld [vmem:[%s10674_s2] sm:$0xf] }
 0x359   :  { %v9474_v49 = vpop.eup %8334 }
 0x35a   :  { %v2196_v27 = vsel %vm68_vm0, %v9474_v49, 0.0  ;;  %v9480_v36 = vpop.eup %8336 }
 0x35b   :  { %2197 = vadd.xlane.f32.xlu0 %v2196_v27  ;;  %2194 = vadd.xlane.f32.xlu1 %v2193_v9  ;;  %v2199_v62 = vsel %vm68_vm0, %v9480_v36, 0.0 }
 0x35d   :  { %v9482_v31 = vpop.eup %8338 }
 0x35e   :  { %v2202_v0 = vsel %vm68_vm0, %v9482_v31, 0.0  ;;  %v9488_v44 = vpop.eup %8340 }
 0x35f   :  { %2203 = vadd.xlane.f32.xlu0 %v2202_v0  ;;  %2200 = vadd.xlane.f32.xlu1 %v2199_v62  ;;  %v2205_v38 = vsel %vm68_vm0, %v9488_v44, 0.0  ;;  %v9515_v0 = vand.u32 4294901760, %v53_v50 }
 0x361   :  { %v9490_v57 = vpop.eup %8342 }
 0x362   :  { %v2208_v42 = vsel %vm68_vm0, %v9490_v57, 0.0 }
 0x363   :  { %2209 = vadd.xlane.f32.xlu0 %v2208_v42  ;;  %2206 = vadd.xlane.f32.xlu1 %v2205_v38 }
 0x374   :  { %2919 = vrot.lane.b32.xlu1 %v5681_v32, %s8469_s21 }
 0x378   :  { %2931 = vrot.lane.b32.xlu1 %v5681_v32, %s8468_s20 }
 0x379   :  { %2925 = vrot.lane.b32.xlu0 %v5681_v32, %s8471_s25 }
 0x37c   :  { %2937 = vrot.lane.b32.xlu1 %v5681_v32, %s8470_s24 }
 0x37d   :  { %2943 = vrot.lane.b32.xlu0 %v5681_v32, %s8472_s28 }
 0x380   :  { %2949 = vrot.lane.b32.xlu1 %v5681_v32, %s8473_s29 }
 0x3cf   :  { %v2168_v25 = vpop.xlane.xlu0 %2167 }
 0x3d0   :  { %8344 = vrcp.f32 %v2168_v25  ;;  %v2165_v5 = vpop.xlane.xlu1 %2164 }
 0x3d1   :  { %8346 = vrcp.f32 %v2165_v5 }
 0x3d4   :  { %v2174_v51 = vpop.xlane.xlu0 %2173 }
 0x3d5   :  { %8348 = vrcp.f32 %v2174_v51 }
 0x3d8   :  { %v2171_v24 = vpop.xlane.xlu1 %2170 }
 0x3d9   :  { %8350 = vrcp.f32 %v2171_v24  ;;  %v9521_v24 = vsub.f32 %v53_v50, %v9515_v0 }
 0x3da   :  { %v8345_v7 = vpop.eup %8344 }
 0x3db   :  { %v8347_v27 = vpop.eup %8346  ;;  %v2228_v9 = vmul.f32 %v8345_v7, %v9423_v8 }
 0x3dc   :  { %v2180_v62 = vpop.xlane.xlu0 %2179  ;;  %v2177_v42 = vpop.xlane.xlu1 %2176  ;;  %v2227_v38 = vmul.f32 %v8347_v27, %v9425_v1 }
 0x3dd   :  { %8352 = vrcp.f32 %v2180_v62  ;;  %v2244_v32 = vmul.f32 %v9382_v26, %v2228_v9  ;;  %v9532_v9 = vand.u32 4294901760, %v9521_v24 }
 0x3de   :  { %8354 = vrcp.f32 %v2177_v42  ;;  %v2243_v25 = vmul.f32 %v2227_v38, %v9384_v21 }
 0x3df   :  { %v8349_v5 = vpop.eup %8348  ;;  %v2263_v51 = vand.u32 4294901760, %v2244_v32 }
 0x3e0   :  { %v2186_v43 = vpop.xlane.xlu0 %2185  ;;  %v2183_v22 = vpop.xlane.xlu1 %2182  ;;  %v2260_v8 = vand.u32 4294901760, %v2243_v25  ;;  %v2230_v7 = vmul.f32 %v8349_v5, %v9433_v16 }
 0x3e1   :  { %8356 = vrcp.f32 %v2186_v43  ;;  %v9524_v59 = vsub.f32 %v2244_v32, %v2263_v51 }
 0x3e2   :  { %8358 = vrcp.f32 %v2183_v22  ;;  %v9526_v1 = vpack.c.bf16 %v2263_v51, %v2260_v8  ;;  %v9528_v26 = vsub.f32 %v2243_v25, %v2260_v8  ;;  %v2246_v21 = vmul.f32 %v9388_v39, %v2230_v7 }
 0x3e3   :  { %v8351_v27 = vpop.eup %8350  ;;  %v2360_v50 = vand.u32 4294901760, %v9524_v59  ;;  %v11092_v39 = vmov 0.0|0.0  }
 0x3e4   :  { %v2192_v62 = vpop.xlane.xlu0 %2191  ;;  %v2189_v42 = vpop.xlane.xlu1 %2188  ;;  %7597 = vmatpush3.bf16.msra.mxu1 %v9526_v1  ;;  %v2229_v16 = vmul.f32 %v8351_v27, %v9439_v55  ;;  %v2269_v43 = vand.u32 4294901760, %v2246_v21  ;;  %v2353_v22 = vand.u32 4294901760, %v9528_v26  ;;  %v2343_v55 = vsub.f32 %v9521_v24, %v9532_v9 }
 0x3e5   :  { %8360 = vrcp.f32 %v2192_v62  ;;  %7598 = vmatprep.subr.bf16.mxu1 %v11092_v39  ;;  %v2361_v32 = vsub.f32 %v9524_v59, %v2360_v50 }
 0x3e6   :  { %8362 = vrcp.f32 %v2189_v42  ;;  %v2245_v25 = vmul.f32 %v2229_v16, %v9390_v60  ;;  %v9543_v5 = vsub.f32 %v2246_v21, %v2269_v43  ;;  %v2354_v51 = vsub.f32 %v9528_v26, %v2353_v22 }
 0x3e7   :  { %v8353_v8 = vpop.eup %8352  ;;  %v2362_v7 = vand.u32 4294901760, %v2361_v32  ;;  %v9548_v27 = vpack.c.bf16 %v2360_v50, %v2353_v22  ;;  %v9559_v41 = vand.u32 4294901760, %v2343_v55 }
 0x3e8   :  { %v8355_v38 = vpop.eup %8354  ;;  %v2198_v62 = vpop.xlane.xlu0 %2197  ;;  %v2266_v47 = vand.u32 4294901760, %v2245_v25  ;;  %v2232_v20 = vmul.f32 %v8353_v8, %v9447_v52  ;;  %v2355_v42 = vand.u32 4294901760, %v2354_v51  ;;  %v2374_v60 = vand.u32 4294901760, %v9543_v5 }
 0x3e9   :  { %v2195_v56 = vpop.xlane.xlu1 %2194  ;;  %8364 = vrcp.f32 %v2198_v62  ;;  %v2231_v21 = vmul.f32 %v8355_v38, %v9443_v10 }
 0x3ea   :  { %8366 = vrcp.f32 %v2195_v56  ;;  %v9553_v16 = vpack.c.bf16 %v2269_v43, %v2266_v47  ;;  %v9555_v2 = vsub.f32 %v2245_v25, %v2266_v47  ;;  %v2248_v50 = vmul.f32 %v9392_v37, %v2232_v20 }
 0x3eb   :  { %v8357_v22 = vpop.eup %8356  ;;  %v2247_v32 = vmul.f32 %v2231_v21, %v9394_v12  ;;  %v9561_v35 = vpack.c.bf16 %v2362_v7, %v2355_v42  ;;  %v2375_v52 = vsub.f32 %v9543_v5, %v2374_v60 }
 0x3ec   :  { %v8359_v51 = vpop.eup %8358  ;;  %v2204_v8 = vpop.xlane.xlu0 %2203  ;;  %7600 = vmatpush3.bf16.msra.mxu1 %v9553_v16  ;;  %v2275_v56 = vand.u32 4294901760, %v2248_v50  ;;  %v2234_v47 = vmul.f32 %v8357_v22, %v9457_v11  ;;  %v2367_v10 = vand.u32 4294901760, %v9555_v2 }
 0x3ed   :  { %v2201_v62 = vpop.xlane.xlu1 %2200  ;;  %8368 = vrcp.f32 %v2204_v8  ;;  %7601 = vmatprep.subr.bf16.mxu1 %v11092_v39  ;;  %v2272_v12 = vand.u32 4294901760, %v2247_v32  ;;  %v2233_v37 = vmul.f32 %v8359_v51, %v9453_v15  ;;  %v2376_v43 = vand.u32 4294901760, %v2375_v52 }
 0x3ee   :  { %8370 = vrcp.f32 %v2201_v62  ;;  %v9571_v38 = vsub.f32 %v2248_v50, %v2275_v56  ;;  %v2250_v25 = vmul.f32 %v9396_v4, %v2234_v47  ;;  %v2368_v55 = vsub.f32 %v9555_v2, %v2367_v10 }
 0x3ef   :  { %v8361_v11 = vpop.eup %8360  ;;  %v9575_v7 = vpack.c.bf16 %v2275_v56, %v2272_v12  ;;  %v9577_v42 = vsub.f32 %v2247_v32, %v2272_v12  ;;  %v2249_v21 = vmul.f32 %v2233_v37, %v9398_v29  ;;  %v9580_v22 = vpack.c.bf16 %v2374_v60, %v2367_v10 }
 0x3f0   :  { %v8363_v8 = vpop.eup %8362  ;;  %v2210_v20 = vpop.xlane.xlu0 %2209  ;;  %v2281_v52 = vand.u32 4294901760, %v2250_v25  ;;  %v2236_v50 = vmul.f32 %v8361_v11, %v9466_v48  ;;  %v2369_v51 = vand.u32 4294901760, %v2368_v55  ;;  %v10889_v4 = vand.u32 4294901760, %v9571_v38 }
 0x3f1   :  { %v2207_v15 = vpop.xlane.xlu1 %2206  ;;  %8372 = vrcp.f32 %v2210_v20  ;;  %7603 = vmatpush3.bf16.msra.mxu1 %v9575_v7  ;;  %v2278_v62 = vand.u32 4294901760, %v2249_v21  ;;  %v2235_v32 = vmul.f32 %v8363_v8, %v9463_v54  ;;  %v10890_v56 = vand.u32 4294901760, %v9577_v42 }
 0x3f2   :  { %8374 = vrcp.f32 %v2207_v15  ;;  %7604 = vmatprep.subr.bf16.mxu1 %v11092_v39  ;;  %v9588_v29 = vsub.f32 %v2250_v25, %v2281_v52  ;;  %v2252_v60 = vmul.f32 %v9400_v23, %v2236_v50  ;;  %v9591_v47 = vpack.c.bf16 %v2376_v43, %v2369_v51 }
 0x3f3   :  { %v8365_v48 = vpop.eup %8364  ;;  %v9593_v10 = vpack.c.bf16 %v2281_v52, %v2278_v62  ;;  %v9595_v20 = vsub.f32 %v2249_v21, %v2278_v62  ;;  %v2251_v12 = vmul.f32 %v2235_v32, %v9402_v58  ;;  %v2382_v54 = vsub.f32 %v9577_v42, %v10890_v56 }
 0x3f4   :  { %v8367_v37 = vpop.eup %8366  ;;  %v2287_v55 = vand.u32 4294901760, %v2252_v60  ;;  %v2238_v25 = vmul.f32 %v8365_v48, %v9474_v49  ;;  %v2389_v23 = vsub.f32 %v9571_v38, %v10889_v4  ;;  %v10887_v43 = vand.u32 4294901760, %v9588_v29 }
 0x3f5   :  { %7606 = vmatpush3.bf16.msra.mxu1 %v9593_v10  ;;  %v2284_v11 = vand.u32 4294901760, %v2251_v12  ;;  %v2237_v21 = vmul.f32 %v8367_v37, %v9472_v14  ;;  %v2383_v58 = vand.u32 4294901760, %v2382_v54  ;;  %v10888_v8 = vand.u32 4294901760, %v9595_v20 }
 0x3f6   :  { %7607 = vmatprep.subr.bf16.mxu1 %v11092_v39  ;;  %v9610_v15 = vsub.f32 %v2252_v60, %v2287_v55  ;;  %v2254_v49 = vmul.f32 %v9404_v28, %v2238_v25  ;;  %v2390_v52 = vand.u32 4294901760, %v2389_v23  ;;  %v2403_v50 = vsub.f32 %v9588_v29, %v10887_v43 }
 0x3f7   :  { %v8369_v51 = vpop.eup %8368  ;;  %v9616_v62 = vpack.c.bf16 %v2287_v55, %v2284_v11  ;;  %v9618_v32 = vsub.f32 %v2251_v12, %v2284_v11  ;;  %v2253_v14 = vmul.f32 %v2237_v21, %v9406_v45  ;;  %v2396_v48 = vsub.f32 %v9595_v20, %v10888_v8 }
 0x3f8   :  { %v8371_v60 = vpop.eup %8370  ;;  %v2293_v54 = vand.u32 4294901760, %v2254_v49  ;;  %v2240_v28 = vmul.f32 %v8369_v51, %v9482_v31  ;;  %v9625_v37 = vpack.c.bf16 %v2390_v52, %v2383_v58  ;;  %v2404_v25 = vand.u32 4294901760, %v2403_v50 }
 0x3f9   :  { %7609 = vmatpush3.bf16.msra.mxu1 %v9616_v62  ;;  %v2290_v23 = vand.u32 4294901760, %v2253_v14  ;;  %v2239_v55 = vmul.f32 %v8371_v60, %v9480_v36  ;;  %v2397_v12 = vand.u32 4294901760, %v2396_v48  ;;  %v2409_v11 = vand.u32 4294901760, %v9618_v32 }
 0x3fa   :  { %7610 = vmatprep.subr.bf16.mxu1 %v11092_v39  ;;  %v9631_v45 = vsub.f32 %v2254_v49, %v2293_v54  ;;  %v2256_v21 = vmul.f32 %v9408_v63, %v2240_v28  ;;  %v2416_v43 = vand.u32 4294901760, %v9610_v15 }
 0x3fb   :  { %v8373_v58 = vpop.eup %8372  ;;  %v9637_v52 = vpack.c.bf16 %v2293_v54, %v2290_v23  ;;  %v9639_v50 = vsub.f32 %v2253_v14, %v2290_v23  ;;  %v2255_v36 = vmul.f32 %v2239_v55, %v9410_v33  ;;  %v9642_v51 = vpack.c.bf16 %v2404_v25, %v2397_v12 }
 0x3fc   :  { %v8375_v48 = vpop.eup %8374  ;;  %v2299_v60 = vand.u32 4294901760, %v2256_v21  ;;  %v2242_v49 = vmul.f32 %v8373_v58, %v9490_v57  ;;  %v2410_v63 = vsub.f32 %v9618_v32, %v2409_v11  ;;  %v2417_v28 = vsub.f32 %v9610_v15, %v2416_v43 }
 0x3fd   :  { %7612 = vmatpush3.bf16.msra.mxu1 %v9637_v52  ;;  %v2296_v31 = vand.u32 4294901760, %v2255_v36  ;;  %v2241_v54 = vmul.f32 %v8375_v48, %v9488_v44  ;;  %v2423_v14 = vand.u32 4294901760, %v9639_v50  ;;  %v2430_v23 = vand.u32 4294901760, %v9631_v45 }
 0x3fe   :  { %7613 = vmatprep.subr.bf16.mxu1 %v11092_v39  ;;  %v9652_v33 = vsub.f32 %v2256_v21, %v2299_v60  ;;  %v2258_v25 = vmul.f32 %v9412_v6, %v2242_v49  ;;  %v2411_v57 = vand.u32 4294901760, %v2410_v63  ;;  %v2418_v55 = vand.u32 4294901760, %v2417_v28 }
 0x3ff   :  { %v9655_v12 = vpack.c.bf16 %v2299_v60, %v2296_v31  ;;  %v9657_v58 = vsub.f32 %v2255_v36, %v2296_v31  ;;  %v2257_v8 = vmul.f32 %v2241_v54, %v9414_v40  ;;  %v2424_v44 = vsub.f32 %v9639_v50, %v2423_v14 }
 0x400   :  { %v2305_v48 = vand.u32 4294901760, %v2258_v25  ;;  %v7632_v4 = vpack.c.bf16 %v2418_v55, %v2411_v57  ;;  %v2431_v56 = vsub.f32 %v9631_v45, %v2430_v23  ;;  %v2444_v19 = vand.u32 4294901760, %v9652_v33 }
 0x401   :  { %7615 = vmatpush3.bf16.msra.mxu1 %v9655_v12  ;;  %v2302_v21 = vand.u32 4294901760, %v2257_v8  ;;  %v2425_v6 = vand.u32 4294901760, %v2424_v44  ;;  %v2437_v49 = vand.u32 4294901760, %v9657_v58  ;;  %v11094_v63 = vand.u32 4294901760, %v9571_v38 }
 0x402   :  { %7616 = vmatprep.subr.bf16.mxu1 %v11092_v39  ;;  %v9668_v40 = vsub.f32 %v2258_v25, %v2305_v48  ;;  %v2432_v36 = vand.u32 4294901760, %v2431_v56  ;;  %v2445_v60 = vsub.f32 %v9652_v33, %v2444_v19  ;;  %v9701_v56 = vpack.c.bf16 %v2416_v43, %v2409_v11  ;;  %v9741_v11 = vld [vmem:[#allocation2] sm:$0xff] }
 0x403   :  { %v9673_v28 = vpack.c.bf16 %v2305_v48, %v2302_v21  ;;  %v9675_v54 = vsub.f32 %v2257_v8, %v2302_v21  ;;  %v2438_v57 = vsub.f32 %v9657_v58, %v2437_v49  ;;  %v11093_v21 = vand.u32 4294901760, %v9577_v42 }
 0x404   :  { %v7635_v44 = vpack.c.bf16 %v2432_v36, %v2425_v6  ;;  %v2446_v31 = vand.u32 4294901760, %v2445_v60  ;;  %v2458_v25 = vand.u32 4294901760, %v9668_v40  ;;  %v11095_v36 = vand.u32 4294901760, %v9595_v20 }
 0x405   :  { %7618 = vmatpush3.bf16.msra.mxu1 %v9673_v28  ;;  %v2439_v18 = vand.u32 4294901760, %v2438_v57  ;;  %v2451_v48 = vand.u32 4294901760, %v9675_v54  ;;  %v9691_v55 = vpack.c.bf16 %v11094_v63, %v11093_v21  ;;  %v11096_v60 = vand.u32 4294901760, %v9588_v29 }
 0x406   :  { %7619 = vmatprep.subr.bf16.mxu1 %v11092_v39  ;;  %v2459_v6 = vsub.f32 %v9668_v40, %v2458_v25  ;;  %v9703_v17 = vpack.c.bf16 %v2430_v23, %v2423_v14  ;;  %v9706_v30 = vpack.c.bf16 %v2444_v19, %v2437_v49  ;;  %v2961_v14 = vand.u32 4294901760, %v9741_v11 }
 0x407   :  { %v9699_v57 = vpack.c.bf16 %v11096_v60, %v11095_v36  ;;  %v7638_v8 = vpack.c.bf16 %v2446_v31, %v2439_v18  ;;  %v2452_v3 = vsub.f32 %v9675_v54, %v2451_v48  ;;  %v9708_v63 = vpack.c.bf16 %v2458_v25, %v2451_v48  ;;  %v2920_v18 = vpop.permute.xlu1 %2919 }
 0x408   :  { %6764 = vmatmul.mubr.f32.vlgmr.msra.gmra.mrb[0].mxu1 %v9559_v41  ;;  %v2460_v21 = vand.u32 4294901760, %v2459_v6  ;;  %2922 = vst.msk [vmem:[#allocation2 + $0x8] sm:$0xff] %vm68_vm0, %v2920_v18  ;;  %v11100_v23 = vpack.c.bf16 %v9571_v38, %v9577_v42  ;;  %v11101_v42 = vpack.c.bf16 %v9588_v29, %v9595_v20  ;;  %v11102_v20 = vpack.c.bf16 %v9610_v15, %v9618_v32 }
 0x409   :  { %7621 = vmatpush3.bf16.msra.mxu1 %v9561_v35  ;;  %v2453_v13 = vand.u32 4294901760, %v2452_v3  ;;  %6798 = vmatprep.mubr.msk.f32.mxu1 %vm8475_vm2, %v11097_v46  ;;  %v2926_v3 = vpop.permute.xlu0 %2925 }
 0x40a   :  { %7622 = vmatprep.subr.bf16.mxu1 %v11092_v39  ;;  %2928 = vst.msk [vmem:[#allocation2 + $0x10] sm:$0xff] %vm68_vm0, %v2926_v3 }
 0x40b   :  { %v7641_v43 = vpack.c.bf16 %v2460_v21, %v2453_v13  ;;  %v2932_v19 = vpop.permute.xlu1 %2931 }
 0x40c   :  { %2934 = vst.msk [vmem:[#allocation2 + $0x18] sm:$0xff] %vm68_vm0, %v2932_v19  ;;  %v11103_v19 = vpack.c.bf16 %v9631_v45, %v9639_v50  ;;  %v11104_v45 = vpack.c.bf16 %v9652_v33, %v9657_v58 }
 0x40d   :  { %7624 = vmatpush3.bf16.msra.mxu1 %v9591_v47  ;;  %v2944_v35 = vpop.permute.xlu0 %2943  ;;  %v11098_v47 = vpack.c.bf16 %v9524_v59, %v9528_v26 }
 0x40e   :  { %7625 = vmatprep.subr.bf16.mxu1 %v11092_v39  ;;  %2946 = vst.msk [vmem:[#allocation2 + $0x28] sm:$0xff] %vm68_vm0, %v2944_v35 }
 0x40f   :  { %v2938_v13 = vpop.permute.xlu1 %2937 }
 0x410   :  { %2940 = vst.msk [vmem:[#allocation2 + $0x20] sm:$0xff] %vm68_vm0, %v2938_v13 }
 0x411   :  { %7627 = vmatpush3.bf16.msra.mxu1 %v9625_v37  ;;  %v11099_v37 = vpack.c.bf16 %v9543_v5, %v9555_v2  ;;  %v9748_v26 = vld [vmem:[#allocation2 + $0x10] sm:$0xff] }
 0x412   :  { %7628 = vmatprep.subr.bf16.mxu1 %v11092_v39  ;;  %v2967_v2 = vand.u32 4294901760, %v9748_v26 }
 0x413   :  { %v9753_v49 = vld [vmem:[#allocation2 + $0x18] sm:$0xff] }
 0x414   :  { %v2970_v5 = vand.u32 4294901760, %v9753_v49 }
 0x415   :  { %7630 = vmatpush3.bf16.msra.mxu1 %v9642_v51  ;;  %v9743_v51 = vld [vmem:[#allocation2 + $0x8] sm:$0xff] }
 0x416   :  { %7631 = vmatprep.subr.bf16.mxu1 %v11092_v39  ;;  %v2964_v59 = vand.u32 4294901760, %v9743_v51  ;;  %v9773_v25 = vld [vmem:[#allocation2 + $0x28] sm:$0xff]  ;;  %v9788_v29 = vsub.f32 %v9753_v49, %v2970_v5 }
 0x417   :  { %v9758_v31 = vld [vmem:[#allocation2 + $0x20] sm:$0xff]  ;;  %v2976_v6 = vand.u32 4294901760, %v9773_v25 }
 0x418   :  { %v9768_v38 = vsub.f32 %v9743_v51, %v2964_v59  ;;  %v2973_v48 = vand.u32 4294901760, %v9758_v31  ;;  %v3376_v18 = vand.u32 4294901760, %v9788_v29 }
 0x419   :  { %7633 = vmatpush3.bf16.msra.mxu1 %v7632_v4  ;;  %v2950_v4 = vpop.permute.xlu1 %2949  ;;  %v9810_v15 = vsub.f32 %v9773_v25, %v2976_v6  ;;  %v11113_v25 = vld [vmem:[#allocation62_spill] sm:$0xff] }
 0x41a   :  { %7634 = vmatprep.subr.bf16.mxu1 %v11092_v39  ;;  %2952 = vst.msk [vmem:[#allocation2 + $0x30] sm:$0xff] %vm68_vm0, %v2950_v4  ;;  %v3362_v60 = vand.u32 4294901760, %v9768_v38  ;;  %v9805_v3 = vsub.f32 %v9758_v31, %v2973_v48 }
 0x41b   :  { %v3390_v4 = vand.u32 4294901760, %v9810_v15 }
 0x41c   :  { %v3383_v13 = vand.u32 4294901760, %v9805_v3 }
 0x41d   :  { %7636 = vmatpush3.bf16.msra.mxu1 %v7635_v44  ;;  %v9763_v44 = vsub.f32 %v9741_v11, %v2961_v14 }
 0x41e   :  { %7637 = vmatprep.subr.bf16.mxu1 %v11092_v39  ;;  %v9840_v50 = vpack.c.bf16 %v3390_v4, %v3383_v13 }
 0x41f   :  { %v3355_v36 = vand.u32 4294901760, %v9763_v44 }
 0x421   :  { %7639 = vmatpush3.bf16.msra.mxu1 %v7638_v8  ;;  %v9780_v8 = vsub.f32 %v9748_v26, %v2967_v2  ;;  %v9798_v21 = vpack.c.bf16 %v3362_v60, %v3355_v36  ;;  %v11109_v26 = vld [vmem:[#allocation29_spill] sm:$0xff] }
 0x422   :  { %7640 = vmatprep.subr.bf16.mxu1 %v11092_v39 }
 0x423   :  { %v9814_v32 = vpack.c.bf16 %v9788_v29, %v9780_v8 }
 0x425   :  { %7642 = vmatpush3.bf16.msra.mxu1 %v7641_v43  ;;  %v3369_v43 = vand.u32 4294901760, %v9780_v8 }
 0x426   :  { %7643 = vmatprep.subr.bf16.mxu1 %v11092_v39 }
 0x427   :  { %v9824_v35 = vpack.c.bf16 %v3376_v18, %v3369_v43 }
 0x428   :  { %6799 = vmatmul.mubr.f32.vlgmr.msra.gmra.mrb[0].mxu1 %v9515_v0 }
 0x429   :  { %7645 = vmatpush3.bf16.msra.mxu1 %v11098_v47  ;;  %6833 = vmatprep.mubr.msk.f32.mxu1 %vm8475_vm2, %v11097_v46  ;;  %v9830_v47 = vpack.c.bf16 %v9810_v15, %v9805_v3 }
 0x42a   :  { %7646 = vmatprep.subr.bf16.mxu1 %v11092_v39 }
 0x42d   :  { %7648 = vmatpush3.bf16.msra.mxu1 %v11099_v37  ;;  %v11105_v37 = vpack.c.bf16 %v9668_v40, %v9675_v54  ;;  %v3391_v54 = vsub.f32 %v9810_v15, %v3390_v4  ;;  %v11125_v15 = vld [vmem:[#allocation107_spill] sm:$0xff] }
 0x42e   :  { %7649 = vmatprep.subr.bf16.mxu1 %v11092_v39  ;;  %v11128_v4 = vld [vmem:[#allocation115_spill] sm:$0xff] }
 0x42f   :  { %v3392_v51 = vand.u32 4294901760, %v3391_v54  ;;  %v11146_v54 = vld [vmem:[#allocation45_spill] sm:$0xff] }
 0x431   :  { %7651 = vmatpush3.bf16.msra.mxu1 %v11100_v23 }
 0x432   :  { %7652 = vmatprep.subr.bf16.mxu1 %v11092_v39 }
 0x435   :  { %7654 = vmatpush3.bf16.msra.mxu1 %v11101_v42  ;;  %v11112_v42 = vld [vmem:[#allocation56_spill] sm:$0xff] }
 0x436   :  { %7655 = vmatprep.subr.bf16.mxu1 %v11092_v39 }
 0x439   :  { %7657 = vmatpush3.bf16.msra.mxu1 %v11102_v20  ;;  %v11119_v20 = vld [vmem:[#allocation82_spill] sm:$0xff] }
 0x43a   :  { %7658 = vmatprep.subr.bf16.mxu1 %v11092_v39 }
 0x43d   :  { %7660 = vmatpush3.bf16.msra.mxu1 %v11103_v19  ;;  %v11126_v19 = vld [vmem:[#allocation111_spill] sm:$0xff] }
 0x43e   :  { %7661 = vmatprep.subr.bf16.mxu1 %v11092_v39 }
 0x441   :  { %7663 = vmatpush3.bf16.msra.mxu1 %v11104_v45  ;;  %v11129_v45 = vld [vmem:[#allocation122_spill] sm:$0xff] }
 0x442   :  { %7664 = vmatprep.subr.bf16.mxu1 %v11092_v39 }
 0x445   :  { %7666 = vmatpush3.bf16.msra.mxu1 %v11105_v37  ;;  %v11130_v37 = vld [vmem:[#allocation126_spill] sm:$0xff] }
 0x446   :  { %7667 = vmatprep.subr.bf16.mxu1 %v11092_v39 }
 0x448   :  { %6834 = vmatmul.mubr.f32.vlgmr.msra.gmra.mrb[0].mxu1 %v9521_v24 }
 0x449   :  { %7669 = vmatpush3.bf16.msra.mxu1 %v9526_v1  ;;  %6868 = vmatprep.mubr.msk.f32.mxu1 %vm8475_vm2, %v11097_v46 }
 0x44a   :  { %7670 = vmatprep.subr.bf16.mxu1 %v11092_v39 }
 0x44d   :  { %7672 = vmatpush3.bf16.msra.mxu1 %v9553_v16 }
 0x44e   :  { %7673 = vmatprep.subr.bf16.mxu1 %v11092_v39 }
 0x451   :  { %7675 = vmatpush3.bf16.msra.mxu1 %v9575_v7 }
 0x452   :  { %7676 = vmatprep.subr.bf16.mxu1 %v11092_v39 }
 0x455   :  { %7678 = vmatpush3.bf16.msra.mxu1 %v9593_v10 }
 0x456   :  { %7679 = vmatprep.subr.bf16.mxu1 %v11092_v39 }
 0x459   :  { %7681 = vmatpush3.bf16.msra.mxu1 %v9616_v62 }
 0x45a   :  { %7682 = vmatprep.subr.bf16.mxu1 %v11092_v39 }
 0x45d   :  { %7684 = vmatpush3.bf16.msra.mxu1 %v9637_v52 }
 0x45e   :  { %7685 = vmatprep.subr.bf16.mxu1 %v11092_v39 }
 0x461   :  { %7687 = vmatpush3.bf16.msra.mxu1 %v9655_v12 }
 0x462   :  { %7688 = vmatprep.subr.bf16.mxu1 %v11092_v39 }
 0x465   :  { %7690 = vmatpush3.bf16.msra.mxu1 %v9673_v28 }
 0x466   :  { %7691 = vmatprep.subr.bf16.mxu1 %v11092_v39 }
 0x468   :  { %6869 = vmatmul.mubr.f32.vlgmr.msra.gmra.mrb[0].mxu1 %v9532_v9 }
 0x469   :  { %7693 = vmatpush3.bf16.msra.mxu1 %v9548_v27  ;;  %6903 = vmatprep.mubr.msk.f32.mxu1 %vm8475_vm2, %v11097_v46  ;;  %v9923_v27 = vpack.c.bf16 %v2976_v6, %v2973_v48  ;;  %v7763_v48 = vpack.c.bf16 %v9768_v38, %v9763_v44  ;;  %v11115_v6 = vld [vmem:[#allocation69_spill] sm:$0xff] }
 0x46a   :  { %7694 = vmatprep.subr.bf16.mxu1 %v11092_v39 }
 0x46d   :  { %7696 = vmatpush3.bf16.msra.mxu1 %v9580_v22  ;;  %v3363_v22 = vsub.f32 %v9768_v38, %v3362_v60  ;;  %v11117_v60 = vld [vmem:[#allocation74_spill] sm:$0xff]  ;;  %v11124_v38 = vld [vmem:[#allocation104_spill] sm:$0xff] }
 0x46e   :  { %7697 = vmatprep.subr.bf16.mxu1 %v11092_v39 }
 0x471   :  { %7699 = vmatpush3.bf16.msra.mxu1 %v9691_v55 }
 0x472   :  { %7700 = vmatprep.subr.bf16.mxu1 %v11092_v39 }
 0x475   :  { %7702 = vmatpush3.bf16.msra.mxu1 %v9699_v57  ;;  %v11107_v57 = vld [vmem:[#allocation25_spill] sm:$0xff] }
 0x476   :  { %7703 = vmatprep.subr.bf16.mxu1 %v11092_v39 }
 0x479   :  { %7705 = vmatpush3.bf16.msra.mxu1 %v9701_v56 }
 0x47a   :  { %7706 = vmatprep.subr.bf16.mxu1 %v11092_v39 }
 0x47d   :  { %7708 = vmatpush3.bf16.msra.mxu1 %v9703_v17  ;;  %v9905_v17 = vpack.c.bf16 %v2964_v59, %v2961_v14  ;;  %v11108_v59 = vld [vmem:[#allocation26_spill] sm:$0xff] }
 0x47e   :  { %7709 = vmatprep.subr.bf16.mxu1 %v11092_v39 }
 0x481   :  { %7711 = vmatpush3.bf16.msra.mxu1 %v9706_v30  ;;  %v9913_v30 = vpack.c.bf16 %v2970_v5, %v2967_v2  ;;  %v11110_v2 = vld [vmem:[#allocation47_spill] sm:$0xff]  ;;  %v11111_v5 = vld [vmem:[#allocation50_spill] sm:$0xff] }
 0x482   :  { %7712 = vmatprep.subr.bf16.mxu1 %v11092_v39 }
 0x485   :  { %7714 = vmatpush3.bf16.msra.mxu1 %v9708_v63 }
 0x486   :  { %7715 = vmatprep.subr.bf16.mxu1 %v11092_v39 }
 0x488   :  { %6904 = vmatmul.mubr.f32.vlgmr.msra.gmra.mrb[0].mxu1 %v9515_v0 }
 0x489   :  { %7717 = vmatpush3.bf16.msra.mxu1 %v9526_v1  ;;  %6938 = vmatprep.mubr.msk.f32.mxu1 %vm8475_vm2, %v11097_v46  ;;  %v11106_v1 = vld [vmem:[#allocation9_spill] sm:$0xff] }
 0x48a   :  { %7718 = vmatprep.subr.bf16.mxu1 %v11092_v39 }
 0x48d   :  { %7720 = vmatpush3.bf16.msra.mxu1 %v9553_v16  ;;  %v2959_v16 = vld [vmem:[#allocation2 + $0x30] sm:$0xff] }
 0x48e   :  { %7721 = vmatprep.subr.bf16.mxu1 %v11092_v39 }
 0x491   :  { %7723 = vmatpush3.bf16.msra.mxu1 %v9575_v7  ;;  %v3356_v7 = vsub.f32 %v9763_v44, %v3355_v36  ;;  %v11116_v36 = vld [vmem:[#allocation70_spill] sm:$0xff]  ;;  %v11123_v44 = vld [vmem:[#allocation101_spill] sm:$0xff] }
 0x492   :  { %7724 = vmatprep.subr.bf16.mxu1 %v11092_v39 }
 0x493   :  { %v3357_v33 = vand.u32 4294901760, %v3356_v7  ;;  %v11133_v7 = vld [vmem:[#allocation135_spill] sm:$0xff] }
 0x495   :  { %7726 = vmatpush3.bf16.msra.mxu1 %v9593_v10  ;;  %v3370_v10 = vsub.f32 %v9780_v8, %v3369_v43  ;;  %v11114_v8 = vld [vmem:[#allocation63_spill] sm:$0xff]  ;;  %v11120_v43 = vld [vmem:[#allocation85_spill] sm:$0xff] }
 0x496   :  { %7727 = vmatprep.subr.bf16.mxu1 %v11092_v39 }
 0x497   :  { %v3371_v58 = vand.u32 4294901760, %v3370_v10  ;;  %v11135_v10 = vld [vmem:[#allocation6_spill] sm:$0xff] }
 0x499   :  { %7729 = vmatpush3.bf16.msra.mxu1 %v9616_v62  ;;  %v9936_v62 = vand.u32 4294901760, %v2959_v16 }
 0x49a   :  { %7730 = vmatprep.subr.bf16.mxu1 %v11092_v39 }
 0x49b   :  { %v9950_v55 = vsub.f32 %v2959_v16, %v9936_v62  ;;  %v11132_v16 = vld [vmem:[#allocation134_spill] sm:$0xff] }
 0x49d   :  { %7732 = vmatpush3.bf16.msra.mxu1 %v9637_v52  ;;  %v3377_v52 = vsub.f32 %v9788_v29, %v3376_v18  ;;  %v9955_v14 = vand.u32 4294901760, %v9950_v55  ;;  %v11118_v29 = vld [vmem:[#allocation78_spill] sm:$0xff]  ;;  %v11121_v18 = vld [vmem:[#allocation93_spill] sm:$0xff] }
 0x49e   :  { %7733 = vmatprep.subr.bf16.mxu1 %v11092_v39 }
 0x49f   :  { %v3378_v40 = vand.u32 4294901760, %v3377_v52  ;;  %v3398_v49 = vsub.f32 %v9950_v55, %v9955_v14  ;;  %v11136_v52 = vld [vmem:[#allocation10_spill] sm:$0xff] }
 0x4a1   :  { %7735 = vmatpush3.bf16.msra.mxu1 %v9655_v12  ;;  %v3364_v12 = vand.u32 4294901760, %v3363_v22  ;;  %v7755_v63 = vpack.c.bf16 %v3378_v40, %v3371_v58  ;;  %v3399_v31 = vand.u32 4294901760, %v3398_v49  ;;  %v11134_v22 = vld [vmem:[#allocation136_spill] sm:$0xff]  ;;  %v11142_v58 = vld [vmem:[#allocation31_spill] sm:$0xff] }
 0x4a2   :  { %7736 = vmatprep.subr.bf16.mxu1 %v11092_v39  ;;  %v11143_v40 = vld [vmem:[#allocation35_spill] sm:$0xff]  ;;  %v11157_v49 = vld [vmem:[#allocation84_spill] sm:$0xff] }
 0x4a3   :  { %v7751_v56 = vpack.c.bf16 %v3364_v12, %v3357_v33  ;;  %v11137_v33 = vld [vmem:[#allocation11_spill] sm:$0xff]  ;;  %v11141_v12 = vld [vmem:[#allocation28_spill] sm:$0xff] }
 0x4a5   :  { %7738 = vmatpush3.bf16.msra.mxu1 %v9673_v28  ;;  %v3384_v28 = vsub.f32 %v9805_v3, %v3383_v13  ;;  %v11122_v3 = vld [vmem:[#allocation96_spill] sm:$0xff]  ;;  %v11127_v13 = vld [vmem:[#allocation114_spill] sm:$0xff] }
 0x4a6   :  { %7740 = vmatprep.subr.bf16.mxu1 %v9905_v17 }
 0x4a7   :  { %v3385_v11 = vand.u32 4294901760, %v3384_v28  ;;  %v11145_v28 = vld [vmem:[#allocation38_spill] sm:$0xff] }
 0x4a8   :  { %6939 = vmatmul.mubr.f32.vlgmr.msra.gmra.mrb[0].mxu1 %v9515_v0 }
 0x4a9   :  { %7742 = vmatpush3.bf16.msra.mxu1 %v9905_v17  ;;  %6955 = vmatprep.mubr.f32.mxu1 %v11106_v1  ;;  %v7759_v23 = vpack.c.bf16 %v3392_v51, %v3385_v11  ;;  %v11131_v1 = vld [vmem:[#allocation129_spill] sm:$0xff] }
 0x4aa   :  { %7744 = vmatprep.subr.bf16.mxu1 %v9913_v30  ;;  %v11151_v11 = vld [vmem:[#allocation65_spill] sm:$0xff] }
 0x4ab   :  { %v11153_v51 = vld [vmem:[#allocation73_spill] sm:$0xff] }
 0x4ad   :  { %7746 = vmatpush3.bf16.msra.mxu1 %v9913_v30 }
 0x4ae   :  { %7748 = vmatprep.subr.bf16.mxu1 %v9923_v27 }
 0x4b1   :  { %7750 = vmatpush3.bf16.msra.mxu1 %v9923_v27 }
 0x4b2   :  { %6953 = vmatprep.subr.mxu1 %v9936_v62 }
 0x4b5   :  { %6954 = vmatpush3.msra.mxu1 %v9936_v62 }
 0x4b6   :  { %6956 = vmatmul.mubr.f32.vlgmr.msra.gmra.mrb[2].mxu1 %v11107_v57  ;;  %7752 = vmatprep.subr.bf16.mxu1 %v7751_v56  ;;  %v11149_v57 = vld [vmem:[#allocation54_spill] sm:$0xff] }
 0x4b7   :  { %7754 = vmatpush3.bf16.msra.mxu1 %v7751_v56  ;;  %6958 = vmatprep.mubr.f32.mxu1 %v11108_v59  ;;  %v11147_v56 = vld [vmem:[#allocation49_spill] sm:$0xff] }
 0x4b8   :  { %7756 = vmatprep.subr.bf16.mxu1 %v7755_v63  ;;  %v11154_v59 = vld [vmem:[#allocation77_spill] sm:$0xff] }
 0x4ba   :  { %6959 = vmatmul.mubr.f32.gmra.mrb[4].mxu1 %v11109_v26  ;;  %v11155_v26 = vld [vmem:[#allocation81_spill] sm:$0xff] }
 0x4bb   :  { %7758 = vmatpush3.bf16.msra.mxu1 %v7755_v63  ;;  %6961 = vmatprep.mubr.f32.mxu1 %v11110_v2  ;;  %v11150_v63 = vld [vmem:[#allocation61_spill] sm:$0xff]  ;;  %v11158_v2 = vld [vmem:[#allocation92_spill] sm:$0xff] }
 0x4bc   :  { %7760 = vmatprep.subr.bf16.mxu1 %v7759_v23 }
 0x4be   :  { %6962 = vmatmul.mubr.f32.gmra.mrb[6].mxu1 %v11111_v5  ;;  %v11159_v5 = vld [vmem:[#allocation95_spill] sm:$0xff] }
 0x4bf   :  { %7762 = vmatpush3.bf16.msra.mxu1 %v7759_v23  ;;  %6964 = vmatprep.mubr.f32.mxu1 %v11112_v42  ;;  %v11156_v23 = vld [vmem:[#allocation83_spill] sm:$0xff]  ;;  %v11161_v42 = vld [vmem:[#allocation105_spill] sm:$0xff] }
 0x4c0   :  { %7015 = vmatprep.subr.mxu1 %v3399_v31 }
 0x4c2   :  { %6965 = vmatmul.mubr.f32.gmra.mrb[8].mxu1 %v11113_v25  ;;  %v11162_v25 = vld [vmem:[#allocation110_spill] sm:$0xff] }
 0x4c3   :  { %7016 = vmatpush3.msra.mxu1 %v3399_v31  ;;  %6967 = vmatprep.mubr.f32.mxu1 %v11114_v8  ;;  %v11160_v31 = vld [vmem:[#allocation103_spill] sm:$0xff]  ;;  %v11164_v8 = vld [vmem:[#allocation118_spill] sm:$0xff] }
 0x4c4   :  { %7764 = vmatprep.subr.bf16.mxu1 %v7763_v48 }
 0x4c6   :  { %6968 = vmatmul.mubr.f32.gmra.mrb[10].mxu1 %v11115_v6  ;;  %v11165_v6 = vld [vmem:[#allocation121_spill] sm:$0xff] }
 0x4c7   :  { %6970 = vmatprep.mubr.f32.mxu1 %v11116_v36  ;;  %v11166_v36 = vld [vmem:[#allocation125_spill] sm:$0xff] }
 0x4ca   :  { %6971 = vmatmul.mubr.f32.gmra.mrb[12].mxu1 %v11117_v60  ;;  %v11167_v60 = vld [vmem:[#allocation7_spill] sm:$0xff] }
 0x4cb   :  { %6973 = vmatprep.mubr.f32.mxu1 %v11118_v29  ;;  %v11168_v29 = vld [vmem:[#allocation13_spill] sm:$0xff] }
 0x4ce   :  { %6974 = vmatmul.mubr.f32.gmra.mrb[14].mxu1 %v11119_v20  ;;  %v11169_v20 = vld [vmem:[#allocation15_spill] sm:$0xff] }
 0x4cf   :  { %6976 = vmatprep.mubr.f32.mxu1 %v11120_v43  ;;  %v11170_v43 = vld [vmem:[#allocation16_spill] sm:$0xff] }
 0x4d2   :  { %6977 = vmatmul.mubr.f32.gmra.mrb[16].mxu1 %v11121_v18  ;;  %v11171_v18 = vld [vmem:[#allocation22_spill] sm:$0xff] }
 0x4d3   :  { %6979 = vmatprep.mubr.f32.mxu1 %v11122_v3  ;;  %v11172_v3 = vld [vmem:[#allocation24_spill] sm:$0xff] }
 0x4d6   :  { %6980 = vmatmul.mubr.f32.gmra.mrb[18].mxu1 %v11123_v44  ;;  %v11173_v44 = vld [vmem:[#allocation32_spill] sm:$0xff] }
 0x4d7   :  { %6982 = vmatprep.mubr.f32.mxu1 %v11124_v38  ;;  %v11174_v38 = vld [vmem:[#allocation34_spill] sm:$0xff] }
 0x4da   :  { %6983 = vmatmul.mubr.f32.gmra.mrb[20].mxu1 %v11125_v15  ;;  %v11175_v15 = vld [vmem:[#allocation42_spill] sm:$0xff] }
 0x4db   :  { %6985 = vmatprep.mubr.f32.mxu1 %v11126_v19  ;;  %v11176_v19 = vld [vmem:[#allocation43_spill] sm:$0xff] }
 0x4de   :  { %6986 = vmatmul.mubr.f32.gmra.mrb[22].mxu1 %v11127_v13  ;;  %v11177_v13 = vld [vmem:[#allocation44_spill] sm:$0xff] }
 0x4df   :  { %6988 = vmatprep.mubr.f32.mxu1 %v11128_v4  ;;  %v11178_v4 = vld [vmem:[#allocation52_spill] sm:$0xff] }
 0x4e2   :  { %6989 = vmatmul.mubr.f32.gmra.mrb[24].mxu1 %v11129_v45  ;;  %v11179_v45 = vld [vmem:[#allocation57_spill] sm:$0xff] }
 0x4e3   :  { %6991 = vmatprep.mubr.f32.mxu1 %v11130_v37  ;;  %v11180_v37 = vld [vmem:[#allocation59_spill] sm:$0xff] }
 0x4e6   :  { %6992 = vmatmul.mubr.f32.gmra.mrb[26].mxu1 %v11131_v1  ;;  %v11181_v1 = vld [vmem:[#allocation60_spill] sm:$0xff] }
 0x4e7   :  { %6994 = vmatprep.mubr.f32.mxu1 %v9094_v34  ;;  %v11138_v34 = vld [vmem:[#allocation12_spill] sm:$0xff] }
 0x4ea   :  { %6995 = vmatmul.mubr.f32.gmra.mrb[28].mxu1 %v9102_v53  ;;  %v11139_v53 = vld [vmem:[#allocation19_spill] sm:$0xff] }
 0x4eb   :  { %6997 = vmatprep.mubr.f32.mxu1 %v9110_v61  ;;  %v11140_v61 = vld [vmem:[#allocation21_spill] sm:$0xff] }
 0x4ee   :  { %6998 = vmatmul.mubr.f32.gmra.mrb[30].mxu1 %v11132_v16  ;;  %v11182_v16 = vld [vmem:[#allocation68_spill] sm:$0xff] }
 0x4ef   :  { %7000 = vmatprep.mubr.f32.mxu1 %v11133_v7  ;;  %v11183_v7 = vld [vmem:[#allocation72_spill] sm:$0xff] }
 0x4f2   :  { %7001 = vmatmul.mubr.f32.gmra.mrb[32].mxu1 %v11134_v22  ;;  %v11184_v22 = vld [vmem:[#allocation76_spill] sm:$0xff] }
 0x4f3   :  { %7017 = vmatprep.mubr.f32.mxu1 %v11135_v10 }
 0x4f6   :  { %7018 = vmatmul.mubr.f32.vlgmr.msra.gmra.mrb[2].mxu1 %v11136_v52 }
 0x4f7   :  { %7766 = vmatpush3.bf16.msra.mxu1 %v7763_v48  ;;  %7020 = vmatprep.mubr.f32.mxu1 %v11137_v33  ;;  %v11163_v48 = vld [vmem:[#allocation113_spill] sm:$0xff] }
 0x4f8   :  { %7768 = vmatprep.subr.bf16.mxu1 %v9814_v32 }
 0x4fa   :  { %7021 = vmatmul.mubr.f32.gmra.mrb[4].mxu1 %v11138_v34 }
 0x4fb   :  { %7770 = vmatpush3.bf16.msra.mxu1 %v9814_v32  ;;  %7023 = vmatprep.mubr.f32.mxu1 %v11139_v53  ;;  %v11144_v32 = vld [vmem:[#allocation37_spill] sm:$0xff] }
 0x4fc   :  { %7772 = vmatprep.subr.bf16.mxu1 %v9830_v47 }
 0x4fe   :  { %7024 = vmatmul.mubr.f32.gmra.mrb[6].mxu1 %v11140_v61 }
 0x4ff   :  { %7774 = vmatpush3.bf16.msra.mxu1 %v9830_v47  ;;  %7026 = vmatprep.mubr.f32.mxu1 %v11141_v12  ;;  %v11148_v47 = vld [vmem:[#allocation53_spill] sm:$0xff] }
 0x500   :  { %7077 = vmatprep.subr.mxu1 %v9950_v55 }
 0x502   :  { %7027 = vmatmul.mubr.f32.gmra.mrb[8].mxu1 %v11142_v58 }
 0x503   :  { %7078 = vmatpush3.msra.mxu1 %v9950_v55  ;;  %7029 = vmatprep.mubr.f32.mxu1 %v11143_v40  ;;  %v11152_v55 = vld [vmem:[#allocation71_spill] sm:$0xff] }
 0x504   :  { %7776 = vmatprep.subr.bf16.mxu1 %v9905_v17 }
 0x506   :  { %7030 = vmatmul.mubr.f32.gmra.mrb[10].mxu1 %v11144_v32 }
 0x507   :  { %7032 = vmatprep.mubr.f32.mxu1 %v11145_v28 }
 0x50a   :  { %7033 = vmatmul.mubr.f32.gmra.mrb[12].mxu1 %v11146_v54 }
 0x50b   :  { %7035 = vmatprep.mubr.f32.mxu1 %v11147_v56 }
 0x50e   :  { %7036 = vmatmul.mubr.f32.gmra.mrb[14].mxu1 %v11148_v47 }
 0x50f   :  { %7038 = vmatprep.mubr.f32.mxu1 %v11149_v57 }
 0x512   :  { %7039 = vmatmul.mubr.f32.gmra.mrb[16].mxu1 %v11150_v63 }
 0x513   :  { %7041 = vmatprep.mubr.f32.mxu1 %v11151_v11 }
 0x516   :  { %7042 = vmatmul.mubr.f32.gmra.mrb[18].mxu1 %v11152_v55 }
 0x517   :  { %7044 = vmatprep.mubr.f32.mxu1 %v11153_v51 }
 0x51a   :  { %7045 = vmatmul.mubr.f32.gmra.mrb[20].mxu1 %v11154_v59 }
 0x51b   :  { %7047 = vmatprep.mubr.f32.mxu1 %v11155_v26 }
 0x51e   :  { %7048 = vmatmul.mubr.f32.gmra.mrb[22].mxu1 %v11156_v23 }
 0x51f   :  { %7050 = vmatprep.mubr.f32.mxu1 %v11157_v49 }
 0x522   :  { %7051 = vmatmul.mubr.f32.gmra.mrb[24].mxu1 %v11158_v2 }
 0x523   :  { %7053 = vmatprep.mubr.f32.mxu1 %v11159_v5 }
 0x526   :  { %7054 = vmatmul.mubr.f32.gmra.mrb[26].mxu1 %v11160_v31 }
 0x527   :  { %7056 = vmatprep.mubr.f32.mxu1 %v11161_v42 }
 0x52a   :  { %7057 = vmatmul.mubr.f32.gmra.mrb[28].mxu1 %v11162_v25 }
 0x52b   :  { %7059 = vmatprep.mubr.f32.mxu1 %v11163_v48 }
 0x52e   :  { %7060 = vmatmul.mubr.f32.gmra.mrb[30].mxu1 %v11164_v8 }
 0x52f   :  { %7062 = vmatprep.mubr.f32.mxu1 %v11165_v6 }
 0x532   :  { %7063 = vmatmul.mubr.f32.gmra.mrb[32].mxu1 %v11166_v36 }
 0x533   :  { %7079 = vmatprep.mubr.f32.mxu1 %v11167_v60  ;;  %v11185_v60 = vld [vmem:[#allocation80_spill] sm:$0xff] }
 0x536   :  { %7080 = vmatmul.mubr.f32.vlgmr.msra.gmra.mrb[2].mxu1 %v11168_v29  ;;  %v11186_v29 = vld [vmem:[#allocation87_spill] sm:$0xff] }
 0x537   :  { %7778 = vmatpush3.bf16.msra.mxu1 %v9905_v17  ;;  %7082 = vmatprep.mubr.f32.mxu1 %v11169_v20  ;;  %v11187_v20 = vld [vmem:[#allocation89_spill] sm:$0xff] }
 0x538   :  { %7780 = vmatprep.subr.bf16.mxu1 %v9913_v30 }
 0x53a   :  { %7083 = vmatmul.mubr.f32.gmra.mrb[4].mxu1 %v11170_v43  ;;  %v11188_v43 = vld [vmem:[#allocation90_spill] sm:$0xff] }
 0x53b   :  { %7782 = vmatpush3.bf16.msra.mxu1 %v9913_v30  ;;  %7085 = vmatprep.mubr.f32.mxu1 %v11171_v18  ;;  %v11189_v18 = vld [vmem:[#allocation91_spill] sm:$0xff] }
 0x53c   :  { %7784 = vmatprep.subr.bf16.mxu1 %v9923_v27 }
 0x53e   :  { %7086 = vmatmul.mubr.f32.gmra.mrb[6].mxu1 %v11172_v3  ;;  %v11190_v3 = vld [vmem:[#allocation100_spill] sm:$0xff] }
 0x53f   :  { %7786 = vmatpush3.bf16.msra.mxu1 %v9923_v27  ;;  %7088 = vmatprep.mubr.f32.mxu1 %v11173_v44  ;;  %v11191_v44 = vld [vmem:[#allocation102_spill] sm:$0xff] }
 0x540   :  { %7139 = vmatprep.subr.mxu1 %v9936_v62 }
 0x542   :  { %7089 = vmatmul.mubr.f32.gmra.mrb[8].mxu1 %v11174_v38  ;;  %v11192_v38 = vld [vmem:[#allocation109_spill] sm:$0xff] }
 0x543   :  { %7140 = vmatpush3.msra.mxu1 %v9936_v62  ;;  %7091 = vmatprep.mubr.f32.mxu1 %v11175_v15  ;;  %v11193_v15 = vld [vmem:[#allocation112_spill] sm:$0xff] }
 0x544   :  { %7788 = vmatprep.subr.bf16.mxu1 %v9798_v21 }
 0x546   :  { %7092 = vmatmul.mubr.f32.gmra.mrb[10].mxu1 %v11176_v19  ;;  %v11194_v19 = vld [vmem:[#allocation117_spill] sm:$0xff] }
 0x547   :  { %7094 = vmatprep.mubr.f32.mxu1 %v11177_v13  ;;  %v11195_v13 = vld [vmem:[#allocation120_spill] sm:$0xff] }
 0x54a   :  { %7095 = vmatmul.mubr.f32.gmra.mrb[12].mxu1 %v11178_v4  ;;  %v11196_v4 = vld [vmem:[#allocation124_spill] sm:$0xff] }
 0x54b   :  { %7097 = vmatprep.mubr.f32.mxu1 %v11179_v45  ;;  %v11197_v45 = vld [vmem:[#allocation128_spill] sm:$0xff] }
 0x54e   :  { %7098 = vmatmul.mubr.f32.gmra.mrb[14].mxu1 %v11180_v37  ;;  %v11198_v37 = vld [vmem:[#allocation131_spill] sm:$0xff] }
 0x54f   :  { %7100 = vmatprep.mubr.f32.mxu1 %v11181_v1  ;;  %v11199_v1 = vld [vmem:[#allocation8_spill] sm:$0xff] }
 0x552   :  { %7101 = vmatmul.mubr.f32.gmra.mrb[16].mxu1 %v11182_v16  ;;  %v11200_v16 = vld [vmem:[#allocation17_spill] sm:$0xff] }
 0x553   :  { %7103 = vmatprep.mubr.f32.mxu1 %v11183_v7  ;;  %v11201_v7 = vld [vmem:[#allocation18_spill] sm:$0xff] }
 0x556   :  { %7104 = vmatmul.mubr.f32.gmra.mrb[18].mxu1 %v11184_v22  ;;  %v11202_v22 = vld [vmem:[#allocation20_spill] sm:$0xff] }
 0x557   :  { %7106 = vmatprep.mubr.f32.mxu1 %v11185_v60 }
 0x55a   :  { %7107 = vmatmul.mubr.f32.gmra.mrb[20].mxu1 %v11186_v29  ;;  %v11203_v29 = vld [vmem:[#allocation27_spill] sm:$0xff] }
 0x55b   :  { %7109 = vmatprep.mubr.f32.mxu1 %v11187_v20 }
 0x55e   :  { %7110 = vmatmul.mubr.f32.gmra.mrb[22].mxu1 %v11188_v43  ;;  %v11204_v43 = vld [vmem:[#allocation30_spill] sm:$0xff] }
 0x55f   :  { %7112 = vmatprep.mubr.f32.mxu1 %v11189_v18  ;;  %v11206_v18 = vld [vmem:[#allocation41_spill] sm:$0xff] }
 0x562   :  { %7113 = vmatmul.mubr.f32.gmra.mrb[24].mxu1 %v11190_v3  ;;  %v11208_v3 = vld [vmem:[#allocation51_spill] sm:$0xff] }
 0x563   :  { %7115 = vmatprep.mubr.f32.mxu1 %v11191_v44  ;;  %v11209_v44 = vld [vmem:[#allocation55_spill] sm:$0xff] }
 0x566   :  { %7116 = vmatmul.mubr.f32.gmra.mrb[26].mxu1 %v11192_v38  ;;  %v11210_v38 = vld [vmem:[#allocation58_spill] sm:$0xff] }
 0x567   :  { %7118 = vmatprep.mubr.f32.mxu1 %v11193_v15  ;;  %v11211_v15 = vld [vmem:[#allocation64_spill] sm:$0xff] }
 0x56a   :  { %7119 = vmatmul.mubr.f32.gmra.mrb[28].mxu1 %v11194_v19  ;;  %v11213_v19 = vld [vmem:[#allocation67_spill] sm:$0xff] }
 0x56b   :  { %7121 = vmatprep.mubr.f32.mxu1 %v11195_v13  ;;  %v11214_v13 = vld [vmem:[#allocation75_spill] sm:$0xff] }
 0x56e   :  { %7122 = vmatmul.mubr.f32.gmra.mrb[30].mxu1 %v11196_v4  ;;  %v11215_v4 = vld [vmem:[#allocation79_spill] sm:$0xff] }
 0x56f   :  { %7124 = vmatprep.mubr.f32.mxu1 %v11197_v45  ;;  %v11217_v45 = vld [vmem:[#allocation88_spill] sm:$0xff] }
 0x572   :  { %7125 = vmatmul.mubr.f32.gmra.mrb[32].mxu1 %v11198_v37  ;;  %v11218_v37 = vld [vmem:[#allocation94_spill] sm:$0xff] }
 0x573   :  { %7141 = vmatprep.mubr.f32.mxu1 %v11199_v1  ;;  %v11219_v1 = vld [vmem:[#allocation97_spill] sm:$0xff] }
 0x576   :  { %7142 = vmatmul.mubr.f32.vlgmr.msra.gmra.mrb[2].mxu1 %v11200_v16  ;;  %v11220_v16 = vld [vmem:[#allocation98_spill] sm:$0xff] }
 0x577   :  { %7790 = vmatpush3.bf16.msra.mxu1 %v9798_v21  ;;  %7144 = vmatprep.mubr.f32.mxu1 %v11201_v7  ;;  %v11205_v21 = vld [vmem:[#allocation40_spill] sm:$0xff]  ;;  %v11221_v7 = vld [vmem:[#allocation99_spill] sm:$0xff] }
 0x578   :  { %7792 = vmatprep.subr.bf16.mxu1 %v9824_v35 }
 0x57a   :  { %7145 = vmatmul.mubr.f32.gmra.mrb[4].mxu1 %v11202_v22  ;;  %v11222_v22 = vld [vmem:[#allocation106_spill] sm:$0xff] }
 0x57b   :  { %7794 = vmatpush3.bf16.msra.mxu1 %v9824_v35  ;;  %v10077_v60 = vpop.f32.mrb[0].mxu1  ;;  %7147 = vmatprep.mubr.f32.mxu1 %v11203_v29  ;;  %v11207_v35 = vld [vmem:[#allocation48_spill] sm:$0xff] }
 0x57c   :  { %7796 = vmatprep.subr.bf16.mxu1 %v9840_v50  ;;  %v6940_v20 = vpop.f32.mrb[1].mxu1  ;;  %v11223_v29 = vld [vmem:[#allocation108_spill] sm:$0xff] }
 0x57d   :  { %v11224_v20 = vld [vmem:[#allocation116_spill] sm:$0xff] }
 0x57e   :  { %7148 = vmatmul.mubr.f32.gmra.mrb[6].mxu1 %v11204_v43  ;;  %v11225_v43 = vld [vmem:[#allocation119_spill] sm:$0xff] }
 0x57f   :  { %7798 = vmatpush3.bf16.msra.mxu1 %v9840_v50  ;;  %7150 = vmatprep.mubr.f32.mxu1 %v11205_v21  ;;  %v11212_v50 = vld [vmem:[#allocation66_spill] sm:$0xff]  ;;  %v11226_v21 = vld [vmem:[#allocation123_spill] sm:$0xff] }
 0x580   :  { %7201 = vmatprep.subr.mxu1 %v9955_v14 }
 0x582   :  { %7151 = vmatmul.mubr.f32.gmra.mrb[8].mxu1 %v11206_v18  ;;  %v11227_v18 = vld [vmem:[#allocation127_spill] sm:$0xff] }
 0x583   :  { %7202 = vmatpush3.msra.mxu1 %v9955_v14  ;;  %7153 = vmatprep.mubr.f32.mxu1 %v11207_v35  ;;  %v11216_v14 = vld [vmem:[#allocation86_spill] sm:$0xff] }
 0x584   :  { %7800 = vmatprep.subr.bf16.mxu1 %v9905_v17  ;;  %v11228_v35 = vld [vmem:[#allocation130_spill] sm:$0xff] }
 0x586   :  { %7154 = vmatmul.mubr.f32.gmra.mrb[10].mxu1 %v11208_v3  ;;  %v11229_v3 = vld [vmem:[#allocation132_spill] sm:$0xff] }
 0x587   :  { %7156 = vmatprep.mubr.f32.mxu1 %v11209_v44  ;;  %v11230_v44 = vld [vmem:[#allocation133_spill] sm:$0xff] }
 0x58a   :  { %7157 = vmatmul.mubr.f32.gmra.mrb[12].mxu1 %v11210_v38 }
 0x58b   :  { %7159 = vmatprep.mubr.f32.mxu1 %v11211_v15 }
 0x58e   :  { %7160 = vmatmul.mubr.f32.gmra.mrb[14].mxu1 %v11212_v50 }
 0x58f   :  { %7162 = vmatprep.mubr.f32.mxu1 %v11213_v19 }
 0x592   :  { %7163 = vmatmul.mubr.f32.gmra.mrb[16].mxu1 %v11214_v13 }
 0x593   :  { %7165 = vmatprep.mubr.f32.mxu1 %v11215_v4 }
 0x596   :  { %7166 = vmatmul.mubr.f32.gmra.mrb[18].mxu1 %v11216_v14 }
 0x597   :  { %7168 = vmatprep.mubr.f32.mxu1 %v11217_v45 }
 0x59a   :  { %7169 = vmatmul.mubr.f32.gmra.mrb[20].mxu1 %v11218_v37 }
 0x59b   :  { %7171 = vmatprep.mubr.f32.mxu1 %v11219_v1 }
 0x59e   :  { %7172 = vmatmul.mubr.f32.gmra.mrb[22].mxu1 %v11220_v16 }
 0x59f   :  { %7174 = vmatprep.mubr.f32.mxu1 %v11221_v7 }
 0x5a2   :  { %7175 = vmatmul.mubr.f32.gmra.mrb[24].mxu1 %v11222_v22  ;;  %v8477_v22 = vmov 0  }
 0x5a3   :  { %7177 = vmatprep.mubr.f32.mxu1 %v11223_v29  ;;  %8310 = vset.pattern.permute.xlu1 %v8477_v22 }
 0x5a4   :  { %8311 = vset.pattern.permute.xlu0 %v8477_v22 }
 0x5a6   :  { %7178 = vmatmul.mubr.f32.gmra.mrb[26].mxu1 %v11224_v20 }
 0x5a7   :  { %7180 = vmatprep.mubr.f32.mxu1 %v11225_v43 }
 0x5aa   :  { %7181 = vmatmul.mubr.f32.gmra.mrb[28].mxu1 %v11226_v21 }
 0x5ab   :  { %7183 = vmatprep.mubr.f32.mxu1 %v11227_v18 }
 0x5ae   :  { %7184 = vmatmul.mubr.f32.gmra.mrb[30].mxu1 %v11228_v35 }
 0x5af   :  { %7186 = vmatprep.mubr.f32.mxu1 %v11229_v3 }
 0x5b2   :  { %7187 = vmatmul.mubr.f32.gmra.mrb[32].mxu1 %v11230_v44 }
 0x5b3   :  { %7203 = vmatprep.mubr.f32.mxu1 %v11135_v10 }
 0x5b6   :  { %7204 = vmatmul.mubr.f32.vlgmr.msra.gmra.mrb[2].mxu1 %v11136_v52 }
 0x5b7   :  { %7802 = vmatpush3.bf16.msra.mxu1 %v9905_v17  ;;  %7206 = vmatprep.mubr.f32.mxu1 %v11137_v33 }
 0x5b8   :  { %7804 = vmatprep.subr.bf16.mxu1 %v9913_v30 }
 0x5ba   :  { %7207 = vmatmul.mubr.f32.gmra.mrb[4].mxu1 %v11138_v34 }
 0x5bb   :  { %7806 = vmatpush3.bf16.msra.mxu1 %v9913_v30  ;;  %7209 = vmatprep.mubr.f32.mxu1 %v11139_v53 }
 0x5bc   :  { %7808 = vmatprep.subr.bf16.mxu1 %v9923_v27 }
 0x5be   :  { %7210 = vmatmul.mubr.f32.gmra.mrb[6].mxu1 %v11140_v61 }
 0x5bf   :  { %7810 = vmatpush3.bf16.msra.mxu1 %v9923_v27  ;;  %7212 = vmatprep.mubr.f32.mxu1 %v11141_v12 }
 0x5c0   :  { %7263 = vmatprep.subr.mxu1 %v9936_v62 }
 0x5c2   :  { %7213 = vmatmul.mubr.f32.gmra.mrb[8].mxu1 %v11142_v58 }
 0x5c3   :  { %7264 = vmatpush3.msra.mxu1 %v9936_v62  ;;  %7215 = vmatprep.mubr.f32.mxu1 %v11143_v40 }
 0x5c6   :  { %7216 = vmatmul.mubr.f32.gmra.mrb[10].mxu1 %v11144_v32 }
 0x5c7   :  { %7218 = vmatprep.mubr.f32.mxu1 %v11145_v28 }
 0x5ca   :  { %7219 = vmatmul.mubr.f32.gmra.mrb[12].mxu1 %v11146_v54 }
 0x5cb   :  { %7221 = vmatprep.mubr.f32.mxu1 %v11147_v56 }
 0x5ce   :  { %7222 = vmatmul.mubr.f32.gmra.mrb[14].mxu1 %v11148_v47 }
 0x5cf   :  { %7224 = vmatprep.mubr.f32.mxu1 %v11149_v57 }
 0x5d2   :  { %7225 = vmatmul.mubr.f32.gmra.mrb[16].mxu1 %v11150_v63 }
 0x5d3   :  { %7227 = vmatprep.mubr.f32.mxu1 %v11151_v11 }
 0x5d6   :  { %7228 = vmatmul.mubr.f32.gmra.mrb[18].mxu1 %v11152_v55 }
 0x5d7   :  { %7230 = vmatprep.mubr.f32.mxu1 %v11153_v51 }
 0x5da   :  { %7231 = vmatmul.mubr.f32.gmra.mrb[20].mxu1 %v11154_v59 }
 0x5db   :  { %7233 = vmatprep.mubr.f32.mxu1 %v11155_v26 }
 0x5de   :  { %7234 = vmatmul.mubr.f32.gmra.mrb[22].mxu1 %v11156_v23 }
 0x5df   :  { %7236 = vmatprep.mubr.f32.mxu1 %v11157_v49 }
 0x5e2   :  { %7237 = vmatmul.mubr.f32.gmra.mrb[24].mxu1 %v11158_v2 }
 0x5e3   :  { %7239 = vmatprep.mubr.f32.mxu1 %v11159_v5 }
 0x5e6   :  { %7240 = vmatmul.mubr.f32.gmra.mrb[26].mxu1 %v11160_v31 }
 0x5e7   :  { %7242 = vmatprep.mubr.f32.mxu1 %v11161_v42 }
 0x5ea   :  { %7243 = vmatmul.mubr.f32.gmra.mrb[28].mxu1 %v11162_v25 }
 0x5eb   :  { %7245 = vmatprep.mubr.f32.mxu1 %v11163_v48 }
 0x5ee   :  { %7246 = vmatmul.mubr.f32.gmra.mrb[30].mxu1 %v11164_v8 }
 0x5ef   :  { %7248 = vmatprep.mubr.f32.mxu1 %v11165_v6 }
 0x5f2   :  { %7249 = vmatmul.mubr.f32.gmra.mrb[32].mxu1 %v11166_v36 }
 0x5f3   :  { %7265 = vmatprep.mubr.f32.mxu1 %v11135_v10 }
 0x5f6   :  { %7266 = vmatmul.mubr.f32.vlgmr.msra.gmra.mrb[2].mxu1 %v11136_v52 }
 0x5f7   :  { %7268 = vmatprep.mubr.f32.mxu1 %v11137_v33 }
 0x5fa   :  { %7269 = vmatmul.mubr.f32.gmra.mrb[4].mxu1 %v11138_v34 }
 0x5fb   :  { %7271 = vmatprep.mubr.f32.mxu1 %v11139_v53 }
 0x5fe   :  { %7272 = vmatmul.mubr.f32.gmra.mrb[6].mxu1 %v11140_v61 }
 0x5ff   :  { %7274 = vmatprep.mubr.f32.mxu1 %v11141_v12 }
 0x602   :  { %7275 = vmatmul.mubr.f32.gmra.mrb[8].mxu1 %v11142_v58 }
 0x603   :  { %7277 = vmatprep.mubr.f32.mxu1 %v11143_v40 }
 0x606   :  { %7278 = vmatmul.mubr.f32.gmra.mrb[10].mxu1 %v11144_v32 }
 0x607   :  { %7280 = vmatprep.mubr.f32.mxu1 %v11145_v28 }
 0x60a   :  { %7281 = vmatmul.mubr.f32.gmra.mrb[12].mxu1 %v11146_v54 }
 0x60b   :  { %7283 = vmatprep.mubr.f32.mxu1 %v11147_v56 }
 0x60e   :  { %7284 = vmatmul.mubr.f32.gmra.mrb[14].mxu1 %v11148_v47 }
 0x60f   :  { %7286 = vmatprep.mubr.f32.mxu1 %v11149_v57 }
 0x612   :  { %7287 = vmatmul.mubr.f32.gmra.mrb[16].mxu1 %v11150_v63 }
 0x613   :  { %7289 = vmatprep.mubr.f32.mxu1 %v11151_v11 }
 0x616   :  { %7290 = vmatmul.mubr.f32.gmra.mrb[18].mxu1 %v11152_v55 }
 0x617   :  { %7292 = vmatprep.mubr.f32.mxu1 %v11153_v51 }
 0x61a   :  { %7293 = vmatmul.mubr.f32.gmra.mrb[20].mxu1 %v11154_v59 }
 0x61b   :  { %7295 = vmatprep.mubr.f32.mxu1 %v11155_v26 }
 0x61e   :  { %7296 = vmatmul.mubr.f32.gmra.mrb[22].mxu1 %v11156_v23 }
 0x61f   :  { %7298 = vmatprep.mubr.f32.mxu1 %v11157_v49 }
 0x622   :  { %7299 = vmatmul.mubr.f32.gmra.mrb[24].mxu1 %v11158_v2 }
 0x623   :  { %7301 = vmatprep.mubr.f32.mxu1 %v11159_v5 }
 0x626   :  { %7302 = vmatmul.mubr.f32.gmra.mrb[26].mxu1 %v11160_v31 }
 0x627   :  { %7304 = vmatprep.mubr.f32.mxu1 %v11161_v42 }
 0x62a   :  { %7305 = vmatmul.mubr.f32.gmra.mrb[28].mxu1 %v11162_v25 }
 0x62b   :  { %7307 = vmatprep.mubr.f32.mxu1 %v11163_v48 }
 0x62e   :  { %7308 = vmatmul.mubr.f32.gmra.mrb[30].mxu1 %v11164_v8 }
 0x62f   :  { %7310 = vmatprep.mubr.f32.mxu1 %v11165_v6 }
 0x632   :  { %7311 = vmatmul.mubr.f32.gmra.mrb[32].mxu1 %v11166_v36 }
 0x6c9   :  { %v10183_v17 = vpop.f32.mrb[2].mxu1 }
 0x6ca   :  { %v10185_v30 = vpop.f32.mrb[3].mxu1  ;;  %v4820_v27 = vsel %vm68_vm0, %v10183_v17, -inf }
 0x6cb   :  { %4821 = vmax.xlane.f32.xlu1 %v4820_v27  ;;  %v4817_v62 = vsel %vm68_vm0, %v10185_v30, -inf }
 0x6cc   :  { %4818 = vmax.xlane.f32.xlu0 %v4817_v62 }
 0x6cd   :  { %v10191_v10 = vpop.f32.mrb[4].mxu1 }
 0x6ce   :  { %v10193_v52 = vpop.f32.mrb[5].mxu1  ;;  %v4826_v33 = vsel %vm68_vm0, %v10191_v10, -inf }
 0x6cf   :  { %v4823_v61 = vsel %vm68_vm0, %v10193_v52, -inf }
 0x6d0   :  { %4827 = vmax.xlane.f32.xlu0 %v4826_v33 }
 0x6d1   :  { %v10197_v34 = vpop.f32.mrb[6].mxu1 }
 0x6d2   :  { %v10199_v53 = vpop.f32.mrb[7].mxu1  ;;  %v4832_v32 = vsel %vm68_vm0, %v10197_v34, -inf }
 0x6d3   :  { %v4829_v12 = vsel %vm68_vm0, %v10199_v53, -inf }
 0x6d4   :  { %4824 = vmax.xlane.f32.xlu0 %v4823_v61  ;;  %4830 = vmax.xlane.f32.xlu1 %v4829_v12 }
 0x6d5   :  { %v10205_v58 = vpop.f32.mrb[8].mxu1 }
 0x6d6   :  { %v10207_v40 = vpop.f32.mrb[9].mxu1  ;;  %v4838_v47 = vsel %vm68_vm0, %v10205_v58, -inf }
 0x6d7   :  { %v4835_v28 = vsel %vm68_vm0, %v10207_v40, -inf }
 0x6d8   :  { %4833 = vmax.xlane.f32.xlu0 %v4832_v32  ;;  %4836 = vmax.xlane.f32.xlu1 %v4835_v28 }
 0x6d9   :  { %v10213_v54 = vpop.f32.mrb[10].mxu1 }
 0x6da   :  { %v10215_v56 = vpop.f32.mrb[11].mxu1  ;;  %v4844_v55 = vsel %vm68_vm0, %v10213_v54, -inf }
 0x6db   :  { %v4841_v57 = vsel %vm68_vm0, %v10215_v56, -inf }
 0x6dc   :  { %4839 = vmax.xlane.f32.xlu0 %v4838_v47  ;;  %4842 = vmax.xlane.f32.xlu1 %v4841_v57 }
 0x6dd   :  { %v10221_v63 = vpop.f32.mrb[12].mxu1 }
 0x6de   :  { %v10223_v11 = vpop.f32.mrb[13].mxu1  ;;  %v4850_v23 = vsel %vm68_vm0, %v10221_v63, -inf }
 0x6df   :  { %v4847_v51 = vsel %vm68_vm0, %v10223_v11, -inf }
 0x6e0   :  { %4845 = vmax.xlane.f32.xlu0 %v4844_v55  ;;  %4848 = vmax.xlane.f32.xlu1 %v4847_v51 }
 0x6e1   :  { %v10229_v59 = vpop.f32.mrb[14].mxu1 }
 0x6e2   :  { %v10231_v26 = vpop.f32.mrb[15].mxu1  ;;  %v4856_v31 = vsel %vm68_vm0, %v10229_v59, -inf }
 0x6e3   :  { %v4853_v49 = vsel %vm68_vm0, %v10231_v26, -inf }
 0x6e4   :  { %4851 = vmax.xlane.f32.xlu0 %v4850_v23  ;;  %4854 = vmax.xlane.f32.xlu1 %v4853_v49 }
 0x6e5   :  { %v10237_v2 = vpop.f32.mrb[16].mxu1 }
 0x6e6   :  { %v10239_v5 = vpop.f32.mrb[17].mxu1  ;;  %v4862_v8 = vsel %vm68_vm0, %v10237_v2, -inf }
 0x6e7   :  { %v4859_v42 = vsel %vm68_vm0, %v10239_v5, -inf }
 0x6e8   :  { %4857 = vmax.xlane.f32.xlu0 %v4856_v31  ;;  %4860 = vmax.xlane.f32.xlu1 %v4859_v42 }
 0x6e9   :  { %v10245_v25 = vpop.f32.mrb[18].mxu1 }
 0x6ea   :  { %v10247_v48 = vpop.f32.mrb[19].mxu1 }
 0x6ec   :  { %4863 = vmax.xlane.f32.xlu0 %v4862_v8 }
 0x6ed   :  { %v10251_v6 = vpop.f32.mrb[20].mxu1 }
 0x6ee   :  { %v10253_v36 = vpop.f32.mrb[21].mxu1 }
 0x6f1   :  { %v10255_v38 = vpop.f32.mrb[22].mxu1 }
 0x6f2   :  { %v10257_v15 = vpop.f32.mrb[23].mxu1 }
 0x6f5   :  { %v10259_v50 = vpop.f32.mrb[24].mxu1 }
 0x6f6   :  { %v10261_v19 = vpop.f32.mrb[25].mxu1 }
 0x6f9   :  { %v10263_v13 = vpop.f32.mrb[26].mxu1 }
 0x6fa   :  { %v10265_v4 = vpop.f32.mrb[27].mxu1 }
 0x6fd   :  { %v10267_v14 = vpop.f32.mrb[28].mxu1 }
 0x6fe   :  { %v10269_v45 = vpop.f32.mrb[29].mxu1 }
 0x701   :  { %v10271_v37 = vpop.f32.mrb[30].mxu1 }
 0x702   :  { %v10273_v1 = vpop.f32.mrb[31].mxu1 }
 0x705   :  { %v10275_v16 = vpop.f32.mrb[32].mxu1 }
 0x706   :  { %v10277_v7 = vpop.f32.mrb[33].mxu1 }
 0x758   :  { %v4822_v29 = vpop.xlane.xlu1 %4821 }
 0x759   :  { %v4866_v20 = vsub.f32 %v10183_v17, %v4822_v29  ;;  %v4819_v43 = vpop.xlane.xlu0 %4818 }
 0x75a   :  { %v4865_v21 = vsub.f32 %v10185_v30, %v4819_v43 }
 0x75b   :  { %v4883_v18 = vmul.f32 1.442695, %v4866_v20 }
 0x75c   :  { %v4881_v35 = vmul.f32 1.442695, %v4865_v21 }
 0x75d   :  { %8376 = vpow2.f32 %v4883_v18  ;;  %v4828_v3 = vpop.xlane.xlu0 %4827 }
 0x75e   :  { %8378 = vpow2.f32 %v4881_v35  ;;  %v4868_v44 = vsub.f32 %v10191_v10, %v4828_v3 }
 0x760   :  { %v4887_v27 = vmul.f32 1.442695, %v4868_v44 }
 0x761   :  { %v4825_v62 = vpop.xlane.xlu0 %4824  ;;  %v4831_v33 = vpop.xlane.xlu1 %4830 }
 0x762   :  { %8380 = vpow2.f32 %v4887_v27  ;;  %v4867_v61 = vsub.f32 %v10193_v52, %v4825_v62  ;;  %v4869_v12 = vsub.f32 %v10199_v53, %v4831_v33 }
 0x764   :  { %v4885_v32 = vmul.f32 1.442695, %v4867_v61  ;;  %v4889_v17 = vmul.f32 1.442695, %v4869_v12 }
 0x765   :  { %v4834_v28 = vpop.xlane.xlu0 %4833  ;;  %v4837_v47 = vpop.xlane.xlu1 %4836 }
 0x766   :  { %8382 = vpow2.f32 %v4885_v32  ;;  %v4870_v30 = vsub.f32 %v10197_v34, %v4834_v28  ;;  %v4871_v57 = vsub.f32 %v10207_v40, %v4837_v47 }
 0x767   :  { %v10286_v55 = vpop.eup %8376  ;;  %8384 = vpow2.f32 %v4889_v17 }
 0x768   :  { %v10288_v10 = vpop.eup %8378  ;;  %v4891_v51 = vmul.f32 1.442695, %v4870_v30  ;;  %v4893_v23 = vmul.f32 1.442695, %v4871_v57  ;;  %v4916_v52 = vsel %vm68_vm0, %v10286_v55, 0.0 }
 0x769   :  { %v4840_v53 = vpop.xlane.xlu0 %4839  ;;  %v4843_v49 = vpop.xlane.xlu1 %4842  ;;  %4917 = vadd.xlane.f32.xlu0 %v4916_v52  ;;  %v4913_v31 = vsel %vm68_vm0, %v10288_v10, 0.0 }
 0x76a   :  { %8386 = vpow2.f32 %v4891_v51  ;;  %v4872_v34 = vsub.f32 %v10205_v58, %v4840_v53  ;;  %v4873_v40 = vsub.f32 %v10215_v56, %v4843_v49  ;;  %4914 = vadd.xlane.f32.xlu1 %v4913_v31 }
 0x76b   :  { %8388 = vpow2.f32 %v4893_v23 }
 0x76c   :  { %v10296_v42 = vpop.eup %8380  ;;  %v4895_v8 = vmul.f32 1.442695, %v4872_v34  ;;  %v4897_v22 = vmul.f32 1.442695, %v4873_v40 }
 0x76d   :  { %v4846_v29 = vpop.xlane.xlu0 %4845  ;;  %v4849_v20 = vpop.xlane.xlu1 %4848  ;;  %v4922_v43 = vsel %vm68_vm0, %v10296_v42, 0.0 }
 0x76e   :  { %8390 = vpow2.f32 %v4895_v8  ;;  %v4874_v21 = vsub.f32 %v10213_v54, %v4846_v29  ;;  %v4875_v18 = vsub.f32 %v10223_v11, %v4849_v20  ;;  %4923 = vadd.xlane.f32.xlu0 %v4922_v43 }
 0x76f   :  { %8392 = vpow2.f32 %v4897_v22 }
 0x770   :  { %v10302_v58 = vpop.eup %8382  ;;  %v4899_v56 = vmul.f32 1.442695, %v4874_v21  ;;  %v4901_v35 = vmul.f32 1.442695, %v4875_v18 }
 0x771   :  { %v4852_v3 = vpop.xlane.xlu0 %4851  ;;  %v4855_v44 = vpop.xlane.xlu1 %4854  ;;  %v4919_v27 = vsel %vm68_vm0, %v10302_v58, 0.0 }
 0x772   :  { %v10306_v62 = vpop.eup %8384  ;;  %8394 = vpow2.f32 %v4899_v56  ;;  %v4876_v33 = vsub.f32 %v10221_v63, %v4852_v3  ;;  %v4877_v54 = vsub.f32 %v10231_v26, %v4855_v44  ;;  %4920 = vadd.xlane.f32.xlu1 %v4919_v27 }
 0x773   :  { %8396 = vpow2.f32 %v4901_v35  ;;  %v4925_v47 = vsel %vm68_vm0, %v10306_v62, 0.0 }
 0x774   :  { %v10310_v11 = vpop.eup %8386  ;;  %v4903_v61 = vmul.f32 1.442695, %v4876_v33  ;;  %v4905_v12 = vmul.f32 1.442695, %v4877_v54  ;;  %v54_v33 = vld [vmem:[%s10675_s3] sm:$0xf] }
 0x775   :  { %v4858_v32 = vpop.xlane.xlu0 %4857  ;;  %v4861_v17 = vpop.xlane.xlu1 %4860  ;;  %v4928_v28 = vsel %vm68_vm0, %v10310_v11, 0.0  ;;  %v60_v54 = vld [vmem:[%s10676_s4] sm:$0xf]  ;;  %s8478_s3 = smov [#allocation3]  }
 0x776   :  { %v10316_v30 = vpop.eup %8388  ;;  %8398 = vpow2.f32 %v4903_v61  ;;  %v4878_v63 = vsub.f32 %v10229_v59, %v4858_v32  ;;  %v4879_v26 = vsub.f32 %v10239_v5, %v4861_v17  ;;  %4929 = vadd.xlane.f32.xlu0 %v4928_v28  ;;  %4926 = vadd.xlane.f32.xlu1 %v4925_v47  ;;  %v61_v61 = vmul.f32 2.0, %v60_v54  ;;  %s5669_s4 = sshll.u32 %s8478_s3, 4  ;;  %s5670_s4 = int_to_ptr.vmem [resolvable:$true] %s5669_s4 }
 0x777   :  { %8400 = vpow2.f32 %v4905_v12  ;;  %v4931_v49 = vsel %vm68_vm0, %v10316_v30, 0.0  ;;  %s8444_s25 = scalar_lea.vmem %s5670_s4, 128  ;;  %p8449_p1 = scmp.lt.s32.totalorder %s5670_s4, %s5670_s4 }
 0x778   :  { %v10320_v57 = vpop.eup %8390  ;;  %v4907_v51 = vmul.f32 1.442695, %v4878_v63  ;;  %v4909_v23 = vmul.f32 1.442695, %v4879_v26  ;;  %p8445_p0 = scmp.ne.s32.totalorder %s5670_s4, %s8444_s25  ;;  %p8450_p2 = scmp.lt.s32.totalorder %s8444_s25, %s8444_s25 }
 0x779   :  { %v4864_v52 = vpop.xlane.xlu0 %4863  ;;  %v4934_v53 = vsel %vm68_vm0, %v10320_v57, 0.0  ;;  %v10326_v31 = vpop.eup %8392 }
 0x77a   :  { %8402 = vpow2.f32 %v4907_v51  ;;  %v4880_v59 = vsub.f32 %v10237_v2, %v4864_v52  ;;  %4935 = vadd.xlane.f32.xlu0 %v4934_v53  ;;  %4932 = vadd.xlane.f32.xlu1 %v4931_v49  ;;  %v4937_v8 = vsel %vm68_vm0, %v10326_v31, 0.0  ;;  %p8451_p3 = por %p8450_p2, %p8449_p1 }
 0x77b   :  { %8404 = vpow2.f32 %v4909_v23 }
 0x77c   :  { %v10329_v5 = vpop.eup %8394  ;;  %v4911_v34 = vmul.f32 1.442695, %v4880_v59  ;;  %p8452_p4 = pnand %p8451_p3, %p8445_p0 }
 0x77d   :  { %v4940_v40 = vsel %vm68_vm0, %v10329_v5, 0.0  ;;  %v10335_v22 = vpop.eup %8396 }
 0x77e   :  { %8406 = vpow2.f32 %v4911_v34  ;;  %4941 = vadd.xlane.f32.xlu0 %v4940_v40  ;;  %4938 = vadd.xlane.f32.xlu1 %v4937_v8  ;;  %v4943_v20 = vsel %vm68_vm0, %v10335_v22, 0.0 }
 0x780   :  { %v10337_v29 = vpop.eup %8398 }
 0x781   :  { %v4946_v2 = vsel %vm68_vm0, %v10337_v29, 0.0  ;;  %v10343_v43 = vpop.eup %8400 }
 0x782   :  { %4947 = vadd.xlane.f32.xlu0 %v4946_v2  ;;  %4944 = vadd.xlane.f32.xlu1 %v4943_v20  ;;  %v4949_v56 = vsel %vm68_vm0, %v10343_v43, 0.0 }
 0x784   :  { %v10345_v21 = vpop.eup %8402 }
 0x785   :  { %v4952_v18 = vsel %vm68_vm0, %v10345_v21, 0.0  ;;  %v10351_v35 = vpop.eup %8404 }
 0x786   :  { %4953 = vadd.xlane.f32.xlu0 %v4952_v18  ;;  %4950 = vadd.xlane.f32.xlu1 %v4949_v56  ;;  %v4955_v27 = vsel %vm68_vm0, %v10351_v35, 0.0 }
 0x788   :  { %v10353_v3 = vpop.eup %8406 }
 0x789   :  { %v4958_v44 = vsel %vm68_vm0, %v10353_v3, 0.0 }
 0x78a   :  { %4959 = vadd.xlane.f32.xlu0 %v4958_v44  ;;  %4956 = vadd.xlane.f32.xlu1 %v4955_v27 }
 0x79b   :  { %57 = vperm.xlu1 %8310, %v54_v33  }
 0x7a0   :  { %64 = vperm.xlu0 %8311, %v61_v61  }
 0x7f6   :  { %v4918_v12 = vpop.xlane.xlu0 %4917 }
 0x7f7   :  { %8408 = vrcp.f32 %v4918_v12  ;;  %v4915_v32 = vpop.xlane.xlu1 %4914 }
 0x7f8   :  { %8410 = vrcp.f32 %v4915_v32 }
 0x7fb   :  { %v4924_v17 = vpop.xlane.xlu0 %4923 }
 0x7fc   :  { %8412 = vrcp.f32 %v4924_v17 }
 0x7ff   :  { %v4921_v28 = vpop.xlane.xlu1 %4920 }
 0x800   :  { %8414 = vrcp.f32 %v4921_v28 }
 0x801   :  { %v8409_v47 = vpop.eup %8408 }
 0x802   :  { %v8411_v63 = vpop.eup %8410  ;;  %v4978_v26 = vmul.f32 %v8409_v47, %v10286_v55 }
 0x803   :  { %v4977_v51 = vmul.f32 %v8411_v63, %v10288_v10  ;;  %v4930_v23 = vpop.xlane.xlu0 %4929  ;;  %v4927_v52 = vpop.xlane.xlu1 %4926 }
 0x804   :  { %8416 = vrcp.f32 %v4930_v23  ;;  %v4994_v53 = vmul.f32 %v10245_v25, %v4978_v26 }
 0x805   :  { %8418 = vrcp.f32 %v4927_v52  ;;  %v4993_v49 = vmul.f32 %v4977_v51, %v10247_v48 }
 0x806   :  { %v8413_v59 = vpop.eup %8412  ;;  %v5013_v34 = vand.u32 4294901760, %v4994_v53 }
 0x807   :  { %v4980_v40 = vmul.f32 %v8413_v59, %v10296_v42  ;;  %v4936_v8 = vpop.xlane.xlu0 %4935  ;;  %v4933_v2 = vpop.xlane.xlu1 %4932  ;;  %v5010_v20 = vand.u32 4294901760, %v4993_v49 }
 0x808   :  { %8420 = vrcp.f32 %v4936_v8  ;;  %v10370_v18 = vsub.f32 %v4994_v53, %v5013_v34 }
 0x809   :  { %8422 = vrcp.f32 %v4933_v2  ;;  %v10372_v55 = vpack.c.bf16 %v5013_v34, %v5010_v20  ;;  %v10374_v10 = vsub.f32 %v4993_v49, %v5010_v20  ;;  %v4996_v25 = vmul.f32 %v10251_v6, %v4980_v40 }
 0x80a   :  { %v8415_v56 = vpop.eup %8414  ;;  %v5110_v48 = vand.u32 4294901760, %v10370_v18 }
 0x80b   :  { %v4979_v44 = vmul.f32 %v8415_v56, %v10302_v58  ;;  %v4942_v27 = vpop.xlane.xlu0 %4941  ;;  %v4939_v42 = vpop.xlane.xlu1 %4938  ;;  %7813 = vmatpush3.bf16.msra.mxu0 %v10372_v55  ;;  %v5019_v33 = vand.u32 4294901760, %v4996_v25  ;;  %v5103_v54 = vand.u32 4294901760, %v10374_v10 }
 0x80c   :  { %8424 = vrcp.f32 %v4942_v27  ;;  %7814 = vmatprep.subr.bf16.mxu0 %v11092_v39  ;;  %v5111_v6 = vsub.f32 %v10370_v18, %v5110_v48 }
 0x80d   :  { %8426 = vrcp.f32 %v4939_v42  ;;  %v4995_v12 = vmul.f32 %v4979_v44, %v10253_v36  ;;  %v10386_v32 = vsub.f32 %v4996_v25, %v5019_v33  ;;  %v5104_v58 = vsub.f32 %v10374_v10, %v5103_v54 }
 0x80e   :  { %v8417_v17 = vpop.eup %8416  ;;  %v5112_v28 = vand.u32 4294901760, %v5111_v6  ;;  %v10389_v47 = vpack.c.bf16 %v5110_v48, %v5103_v54 }
 0x80f   :  { %v8419_v63 = vpop.eup %8418  ;;  %v4982_v26 = vmul.f32 %v8417_v17, %v10310_v11  ;;  %v4948_v51 = vpop.xlane.xlu0 %4947  ;;  %v5016_v52 = vand.u32 4294901760, %v4995_v12  ;;  %v5105_v53 = vand.u32 4294901760, %v5104_v58  ;;  %v5124_v49 = vand.u32 4294901760, %v10386_v32 }
 0x810   :  { %v4945_v23 = vpop.xlane.xlu1 %4944  ;;  %v4981_v59 = vmul.f32 %v8419_v63, %v10306_v62  ;;  %8428 = vrcp.f32 %v4948_v51 }
 0x811   :  { %8430 = vrcp.f32 %v4945_v23  ;;  %v10394_v36 = vpack.c.bf16 %v5019_v33, %v5016_v52  ;;  %v10396_v34 = vsub.f32 %v4995_v12, %v5016_v52  ;;  %v4998_v40 = vmul.f32 %v10255_v38, %v4982_v26 }
 0x812   :  { %v8421_v8 = vpop.eup %8420  ;;  %v4997_v2 = vmul.f32 %v4981_v59, %v10257_v15  ;;  %v10400_v11 = vpack.c.bf16 %v5112_v28, %v5105_v53  ;;  %v5125_v20 = vsub.f32 %v10386_v32, %v5124_v49 }
 0x813   :  { %v8423_v25 = vpop.eup %8422  ;;  %v4984_v56 = vmul.f32 %v8421_v8, %v10320_v57  ;;  %v4954_v48 = vpop.xlane.xlu0 %4953  ;;  %7816 = vmatpush3.bf16.msra.mxu0 %v10394_v36  ;;  %v5025_v44 = vand.u32 4294901760, %v4998_v40  ;;  %v5117_v27 = vand.u32 4294901760, %v10396_v34 }
 0x814   :  { %v4951_v62 = vpop.xlane.xlu1 %4950  ;;  %v4983_v42 = vmul.f32 %v8423_v25, %v10316_v30  ;;  %8432 = vrcp.f32 %v4954_v48  ;;  %7817 = vmatprep.subr.bf16.mxu0 %v11092_v39  ;;  %v5022_v15 = vand.u32 4294901760, %v4997_v2  ;;  %v5126_v33 = vand.u32 4294901760, %v5125_v20 }
 0x815   :  { %8434 = vrcp.f32 %v4951_v62  ;;  %v10410_v54 = vsub.f32 %v4998_v40, %v5025_v44  ;;  %v5000_v57 = vmul.f32 %v10259_v50, %v4984_v56  ;;  %v5118_v6 = vsub.f32 %v10396_v34, %v5117_v27 }
 0x816   :  { %v8425_v12 = vpop.eup %8424  ;;  %v10414_v58 = vpack.c.bf16 %v5025_v44, %v5022_v15  ;;  %v10416_v17 = vsub.f32 %v4997_v2, %v5022_v15  ;;  %v4999_v30 = vmul.f32 %v4983_v42, %v10261_v19  ;;  %v10419_v28 = vpack.c.bf16 %v5124_v49, %v5117_v27 }
 0x817   :  { %v8427_v63 = vpop.eup %8426  ;;  %v4986_v26 = vmul.f32 %v8425_v12, %v10329_v5  ;;  %v4960_v51 = vpop.xlane.xlu0 %4959  ;;  %v5031_v52 = vand.u32 4294901760, %v5000_v57  ;;  %v5119_v53 = vand.u32 4294901760, %v5118_v6  ;;  %v5138_v50 = vand.u32 4294901760, %v10410_v54 }
 0x818   :  { %v4957_v23 = vpop.xlane.xlu1 %4956  ;;  %v4985_v59 = vmul.f32 %v8427_v63, %v10326_v31  ;;  %8436 = vrcp.f32 %v4960_v51  ;;  %7819 = vmatpush3.bf16.msra.mxu0 %v10414_v58  ;;  %v5028_v40 = vand.u32 4294901760, %v4999_v30  ;;  %v5131_v8 = vand.u32 4294901760, %v10416_v17 }
 0x819   :  { %8438 = vrcp.f32 %v4957_v23  ;;  %7820 = vmatprep.subr.bf16.mxu0 %v11092_v39  ;;  %v10427_v19 = vsub.f32 %v5000_v57, %v5031_v52  ;;  %v5002_v5 = vmul.f32 %v10263_v13, %v4986_v26  ;;  %v10430_v49 = vpack.c.bf16 %v5126_v33, %v5119_v53 }
 0x81a   :  { %v8429_v2 = vpop.eup %8428  ;;  %v10432_v20 = vpack.c.bf16 %v5031_v52, %v5028_v40  ;;  %v10434_v25 = vsub.f32 %v4999_v30, %v5028_v40  ;;  %v5001_v31 = vmul.f32 %v4985_v59, %v10265_v4  ;;  %v5132_v56 = vsub.f32 %v10416_v17, %v5131_v8 }
 0x81b   :  { %v8431_v48 = vpop.eup %8430  ;;  %v4988_v62 = vmul.f32 %v8429_v2, %v10337_v29  ;;  %v5037_v27 = vand.u32 4294901760, %v5002_v5  ;;  %v5139_v13 = vsub.f32 %v10410_v54, %v5138_v50  ;;  %v10903_v42 = vand.u32 4294901760, %v10427_v19 }
 0x81c   :  { %v10441_v44 = vpop.permute.xlu1 %57  ;;  %v4987_v15 = vmul.f32 %v8431_v48, %v10335_v22  ;;  %7822 = vmatpush3.bf16.msra.mxu0 %v10432_v20  ;;  %v5034_v33 = vand.u32 4294901760, %v5001_v31  ;;  %v5133_v57 = vand.u32 4294901760, %v5132_v56  ;;  %v5145_v30 = vand.u32 4294901760, %v10434_v25 }
 0x81d   :  { %v10450_v4 = vadd.f32 %v10077_v60, %v10441_v44  ;;  %7823 = vmatprep.subr.bf16.mxu0 %v11092_v39  ;;  %v10454_v29 = vsub.f32 %v5002_v5, %v5037_v27  ;;  %v5004_v6 = vmul.f32 %v10267_v14, %v4988_v62  ;;  %v5140_v12 = vand.u32 4294901760, %v5139_v13 }
 0x81e   :  { %v8433_v63 = vpop.eup %8432  ;;  %v10460_v26 = vpack.c.bf16 %v5037_v27, %v5034_v33  ;;  %v10462_v60 = vsub.f32 %v5001_v31, %v5034_v33  ;;  %v5003_v51 = vmul.f32 %v4987_v15, %v10269_v45  ;;  %v5146_v14 = vsub.f32 %v10434_v25, %v5145_v30 }
 0x81f   :  { %v2900_v22 = vmul.f32 %v10450_v4, %v10450_v4  ;;  %v8435_v23 = vpop.eup %8434  ;;  %v4990_v52 = vmul.f32 %v8433_v63, %v10345_v21  ;;  %v5043_v53 = vand.u32 4294901760, %v5004_v6  ;;  %v10466_v59 = vpack.c.bf16 %v5140_v12, %v5133_v57 }
 0x820   :  { %v4989_v40 = vmul.f32 %v8435_v23, %v10343_v43  ;;  %7825 = vmatpush3.bf16.msra.mxu0 %v10460_v26  ;;  %v5040_v2 = vand.u32 4294901760, %v5003_v51  ;;  %v5153_v45 = vsub.f32 %v10427_v19, %v10903_v42  ;;  %v5147_v48 = vand.u32 4294901760, %v5146_v14 }
 0x821   :  { %v2902_v5 = vsel %vm2901_vm3, %v2900_v22, 0.0  ;;  %7826 = vmatprep.subr.bf16.mxu0 %v11092_v39  ;;  %v10478_v21 = vsub.f32 %v5004_v6, %v5043_v53  ;;  %v5006_v56 = vmul.f32 %v10271_v37, %v4990_v52  ;;  %v10902_v22 = vand.u32 4294901760, %v10462_v60 }
 0x822   :  { %v2903_v31 = vrot.slane %v2902_v5, 4  ;;  %v8437_v62 = vpop.eup %8436  ;;  %v10481_v27 = vpack.c.bf16 %v5043_v53, %v5040_v2  ;;  %v10483_v43 = vsub.f32 %v5003_v51, %v5040_v2  ;;  %v5005_v13 = vmul.f32 %v4989_v40, %v10273_v1 }
 0x823   :  { %v5154_v15 = vand.u32 4294901760, %v5153_v45  ;;  %v8439_v33 = vpop.eup %8438  ;;  %v4992_v57 = vmul.f32 %v8437_v62, %v10353_v3  ;;  %v5049_v63 = vand.u32 4294901760, %v5006_v56  ;;  %v5166_v51 = vand.u32 4294901760, %v10454_v29 }
 0x824   :  { %v2904_v12 = vadd.f32 %v2903_v31, %v2902_v5  ;;  %v4991_v6 = vmul.f32 %v8439_v33, %v10351_v35  ;;  %7828 = vmatpush3.bf16.msra.mxu0 %v10481_v27  ;;  %v5046_v37 = vand.u32 4294901760, %v5005_v13  ;;  %v5160_v53 = vsub.f32 %v10462_v60, %v10902_v22 }
 0x825   :  { %v10490_v23 = vpack.c.bf16 %v5154_v15, %v5147_v48  ;;  %7829 = vmatprep.subr.bf16.mxu0 %v11092_v39  ;;  %v10494_v1 = vsub.f32 %v5006_v56, %v5049_v63  ;;  %v5008_v3 = vmul.f32 %v10275_v16, %v4992_v57  ;;  %v5167_v5 = vsub.f32 %v10454_v29, %v5166_v51 }
 0x826   :  { %v2905_v52 = vrot.slane %v2904_v12, 2  ;;  %v10500_v14 = vpack.c.bf16 %v5049_v63, %v5046_v37  ;;  %v10502_v35 = vsub.f32 %v5005_v13, %v5046_v37  ;;  %v5007_v40 = vmul.f32 %v4991_v6, %v10277_v7 }
 0x827   :  { %v5055_v45 = vand.u32 4294901760, %v5008_v3  ;;  %v5161_v31 = vand.u32 4294901760, %v5160_v53  ;;  %v5173_v56 = vand.u32 4294901760, %v10483_v43  ;;  %v5168_v48 = vand.u32 4294901760, %v5167_v5 }
 0x828   :  { %v2906_v2 = vadd.f32 %v2905_v52, %v2904_v12  ;;  %7831 = vmatpush3.bf16.msra.mxu0 %v10500_v14  ;;  %v5052_v16 = vand.u32 4294901760, %v5007_v40  ;;  %v5180_v62 = vand.u32 4294901760, %v10478_v21  ;;  %v5187_v15 = vand.u32 4294901760, %v10502_v35 }
 0x829   :  { %7832 = vmatprep.subr.bf16.mxu0 %v11092_v39  ;;  %v10511_v13 = vsub.f32 %v5008_v3, %v5055_v45  ;;  %v5174_v7 = vsub.f32 %v10483_v43, %v5173_v56  ;;  %v5194_v57 = vand.u32 4294901760, %v10494_v1  ;;  %v7848_v6 = vpack.c.bf16 %v5168_v48, %v5161_v31 }
 0x82a   :  { %v2907_v33 = vrot.slane %v2906_v2, 1  ;;  %v10515_v12 = vpack.c.bf16 %v5055_v45, %v5052_v16  ;;  %v10517_v63 = vsub.f32 %v5007_v40, %v5052_v16  ;;  %v5181_v37 = vsub.f32 %v10478_v21, %v5180_v62 }
 0x82b   :  { %v5175_v53 = vand.u32 4294901760, %v5174_v7  ;;  %v5188_v5 = vsub.f32 %v10502_v35, %v5187_v15  ;;  %v5195_v38 = vsub.f32 %v10494_v1, %v5194_v57  ;;  %v5208_v22 = vand.u32 4294901760, %v10511_v13 }
 0x82c   :  { %v2908_v52 = vadd.f32 %v2907_v33, %v2906_v2  ;;  %7834 = vmatpush3.bf16.msra.mxu0 %v10515_v12  ;;  %v5182_v3 = vand.u32 4294901760, %v5181_v37  ;;  %v5201_v61 = vand.u32 4294901760, %v10517_v63  ;;  %v7866_v40 = vpack.c.bf16 %v10410_v54, %v10416_v17 }
 0x82d   :  { %7835 = vmatprep.subr.bf16.mxu0 %v11092_v39  ;;  %v5189_v31 = vand.u32 4294901760, %v5188_v5  ;;  %v5196_v2 = vand.u32 4294901760, %v5195_v38  ;;  %v7869_v16 = vpack.c.bf16 %v10427_v19, %v10434_v25  ;;  %v5209_v7 = vsub.f32 %v10511_v13, %v5208_v22 }
 0x82e   :  { %v2909_v45 = vmax.f32 %v2908_v52, 1e-24  ;;  %v7851_v48 = vpack.c.bf16 %v5182_v3, %v5175_v53  ;;  %v5202_v33 = vsub.f32 %v10517_v63, %v5201_v61  ;;  %v7872_v37 = vpack.c.bf16 %v10454_v29, %v10462_v60 }
 0x82f   :  { %7346 = vmatmul.mubr.f32.vlgmr.msra.gmra.mrb[32].mxu0 %v9559_v41  ;;  %v7854_v42 = vpack.c.bf16 %v5196_v2, %v5189_v31  ;;  %v7875_v52 = vpack.c.bf16 %v10478_v21, %v10483_v43  ;;  %v7878_v38 = vpack.c.bf16 %v10494_v1, %v10502_v35  ;;  %v5210_v5 = vand.u32 4294901760, %v5209_v7 }
 0x830   :  { %8440 = vrsqrt.f32 %v2909_v45  ;;  %7837 = vmatpush3.bf16.msra.mxu0 %v10400_v11  ;;  %v5203_v53 = vand.u32 4294901760, %v5202_v33  ;;  %7380 = vmatprep.mubr.msk.f32.mxu0 %vm8475_vm2, %v11097_v46  ;;  %v7881_v29 = vpack.c.bf16 %v10511_v13, %v10517_v63  ;;  %v10548_v41 = vpack.c.bf16 %v5138_v50, %v5131_v8  ;;  %v10571_v8 = vpop.permute.xlu0 %64 }
 0x831   :  { %7838 = vmatprep.subr.bf16.mxu0 %v11092_v39  ;;  %v11231_v11 = vand.u32 4294901760, %v10427_v19  ;;  %v11232_v43 = vand.u32 4294901760, %v10462_v60  ;;  %v10561_v35 = vpack.c.bf16 %v5180_v62, %v5173_v56  ;;  %v10563_v13 = vpack.c.bf16 %v5194_v57, %v5187_v15 }
 0x832   :  { %v7857_v17 = vpack.c.bf16 %v5210_v5, %v5203_v53  ;;  %v10565_v54 = vpack.c.bf16 %v5208_v22, %v5201_v61  ;;  %v11233_v61 = vpack.c.bf16 %v10370_v18, %v10374_v10 }
 0x833   :  { %v10555_v21 = vpack.c.bf16 %v11231_v11, %v5145_v30  ;;  %v10559_v1 = vpack.c.bf16 %v5166_v51, %v11232_v43 }
 0x834   :  { %7840 = vmatpush3.bf16.msra.mxu0 %v10430_v49  ;;  %v11234_v49 = vpack.c.bf16 %v10386_v32, %v10396_v34 }
 0x835   :  { %7841 = vmatprep.subr.bf16.mxu0 %v11092_v39 }
 0x838   :  { %7843 = vmatpush3.bf16.msra.mxu0 %v10466_v59 }
 0x839   :  { %7844 = vmatprep.subr.bf16.mxu0 %v11092_v39 }
 0x83a   :  { %v8441_v50 = vpop.eup %8440 }
 0x83b   :  { %v2911_v19 = vmul.f32 %v8441_v50, %v10450_v4 }
 0x83c   :  { %7846 = vmatpush3.bf16.msra.mxu0 %v10490_v23 }
 0x83d   :  { %v2912_v25 = vmul.f32 %v2911_v19, %v10571_v8  ;;  %7847 = vmatprep.subr.bf16.mxu0 %v11092_v39 }
 0x83f   :  { %2913 = vst.msk [vmem:[#allocation3] sm:$0xf] %vm2901_vm3, %v2912_v25 }
 0x840   :  { %7849 = vmatpush3.bf16.msra.mxu0 %v7848_v6 }
 0x841   :  { %7850 = vmatprep.subr.bf16.mxu0 %v11092_v39 }
 0x844   :  { %7852 = vmatpush3.bf16.msra.mxu0 %v7851_v48 }
 0x845   :  { %7853 = vmatprep.subr.bf16.mxu0 %v11092_v39 }
 0x848   :  { %7855 = vmatpush3.bf16.msra.mxu0 %v7854_v42 }
 0x849   :  { %7856 = vmatprep.subr.bf16.mxu0 %v11092_v39 }
 0x84c   :  { %7858 = vmatpush3.bf16.msra.mxu0 %v7857_v17 }
 0x84d   :  { %7859 = vmatprep.subr.bf16.mxu0 %v11092_v39 }
 0x84f   :  { %7381 = vmatmul.mubr.f32.vlgmr.msra.gmra.mrb[32].mxu0 %v9515_v0 }
 0x850   :  { %7861 = vmatpush3.bf16.msra.mxu0 %v11233_v61  ;;  %7415 = vmatprep.mubr.msk.f32.mxu0 %vm8475_vm2, %v11097_v46 }
 0x851   :  { %7862 = vmatprep.subr.bf16.mxu0 %v11092_v39 }
 0x854   :  { %7864 = vmatpush3.bf16.msra.mxu0 %v11234_v49 }
 0x855   :  { %7865 = vmatprep.subr.bf16.mxu0 %v11092_v39 }
 0x858   :  { %7867 = vmatpush3.bf16.msra.mxu0 %v7866_v40 }
 0x859   :  { %7868 = vmatprep.subr.bf16.mxu0 %v11092_v39 }
 0x85c   :  { %7870 = vmatpush3.bf16.msra.mxu0 %v7869_v16 }
 0x85d   :  { %7871 = vmatprep.subr.bf16.mxu0 %v11092_v39 }
 0x860   :  { %7873 = vmatpush3.bf16.msra.mxu0 %v7872_v37 }
 0x861   :  { %7874 = vmatprep.subr.bf16.mxu0 %v11092_v39 }
 0x864   :  { %7876 = vmatpush3.bf16.msra.mxu0 %v7875_v52 }
 0x865   :  { %7877 = vmatprep.subr.bf16.mxu0 %v11092_v39 }
 0x868   :  { %7879 = vmatpush3.bf16.msra.mxu0 %v7878_v38 }
 0x869   :  { %7880 = vmatprep.subr.bf16.mxu0 %v11092_v39 }
 0x86c   :  { %7882 = vmatpush3.bf16.msra.mxu0 %v7881_v29 }
 0x86d   :  { %7883 = vmatprep.subr.bf16.mxu0 %v11092_v39 }
 0x86f   :  { %7416 = vmatmul.mubr.f32.vlgmr.msra.gmra.mrb[32].mxu0 %v9521_v24 }
 0x870   :  { %7885 = vmatpush3.bf16.msra.mxu0 %v10372_v55  ;;  %7450 = vmatprep.mubr.msk.f32.mxu0 %vm8475_vm2, %v11097_v46 }
 0x871   :  { %7886 = vmatprep.subr.bf16.mxu0 %v11092_v39 }
 0x874   :  { %7888 = vmatpush3.bf16.msra.mxu0 %v10394_v36 }
 0x875   :  { %7889 = vmatprep.subr.bf16.mxu0 %v11092_v39 }
 0x878   :  { %7891 = vmatpush3.bf16.msra.mxu0 %v10414_v58 }
 0x879   :  { %7892 = vmatprep.subr.bf16.mxu0 %v11092_v39 }
 0x87c   :  { %7894 = vmatpush3.bf16.msra.mxu0 %v10432_v20 }
 0x87d   :  { %7895 = vmatprep.subr.bf16.mxu0 %v11092_v39 }
 0x880   :  { %7897 = vmatpush3.bf16.msra.mxu0 %v10460_v26 }
 0x881   :  { %7898 = vmatprep.subr.bf16.mxu0 %v11092_v39 }
 0x884   :  { %7900 = vmatpush3.bf16.msra.mxu0 %v10481_v27 }
 0x885   :  { %7901 = vmatprep.subr.bf16.mxu0 %v11092_v39 }
 0x888   :  { %7903 = vmatpush3.bf16.msra.mxu0 %v10500_v14 }
 0x889   :  { %7904 = vmatprep.subr.bf16.mxu0 %v11092_v39 }
 0x88c   :  { %7906 = vmatpush3.bf16.msra.mxu0 %v10515_v12 }
 0x88d   :  { %7907 = vmatprep.subr.bf16.mxu0 %v11092_v39 }
 0x88f   :  { %7451 = vmatmul.mubr.f32.vlgmr.msra.gmra.mrb[32].mxu0 %v9532_v9 }
 0x890   :  { %7909 = vmatpush3.bf16.msra.mxu0 %v10389_v47  ;;  %7485 = vmatprep.mubr.msk.f32.mxu0 %vm8475_vm2, %v11097_v46 }
 0x891   :  { %7910 = vmatprep.subr.bf16.mxu0 %v11092_v39 }
 0x894   :  { %7912 = vmatpush3.bf16.msra.mxu0 %v10419_v28 }
 0x895   :  { %7913 = vmatprep.subr.bf16.mxu0 %v11092_v39 }
 0x898   :  { %7915 = vmatpush3.bf16.msra.mxu0 %v10548_v41 }
 0x899   :  { %7916 = vmatprep.subr.bf16.mxu0 %v11092_v39 }
 0x89c   :  { %7918 = vmatpush3.bf16.msra.mxu0 %v10555_v21 }
 0x89d   :  { %7919 = vmatprep.subr.bf16.mxu0 %v11092_v39 }
 0x8a0   :  { %7921 = vmatpush3.bf16.msra.mxu0 %v10559_v1 }
 0x8a1   :  { %7922 = vmatprep.subr.bf16.mxu0 %v11092_v39 }
 0x8a4   :  { %7924 = vmatpush3.bf16.msra.mxu0 %v10561_v35 }
 0x8a5   :  { %7925 = vmatprep.subr.bf16.mxu0 %v11092_v39 }
 0x8a8   :  { %7927 = vmatpush3.bf16.msra.mxu0 %v10563_v13 }
 0x8a9   :  { %7928 = vmatprep.subr.bf16.mxu0 %v11092_v39 }
 0x8ac   :  { %7930 = vmatpush3.bf16.msra.mxu0 %v10565_v54 }
 0x8ad   :  { %7931 = vmatprep.subr.bf16.mxu0 %v11092_v39 }
 0x8af   :  { %7486 = vmatmul.mubr.f32.vlgmr.msra.gmra.mrb[32].mxu0 %v9515_v0 }
 0x8b0   :  { %7933 = vmatpush3.bf16.msra.mxu0 %v10372_v55  ;;  %7520 = vmatprep.mubr.msk.f32.mxu0 %vm8475_vm2, %v11097_v46 }
 0x8b1   :  { %7934 = vmatprep.subr.bf16.mxu0 %v11092_v39 }
 0x8b4   :  { %7936 = vmatpush3.bf16.msra.mxu0 %v10394_v36 }
 0x8b5   :  { %7937 = vmatprep.subr.bf16.mxu0 %v11092_v39 }
 0x8b8   :  { %7939 = vmatpush3.bf16.msra.mxu0 %v10414_v58 }
 0x8b9   :  { %7940 = vmatprep.subr.bf16.mxu0 %v11092_v39 }
 0x8bc   :  { %7942 = vmatpush3.bf16.msra.mxu0 %v10432_v20 }
 0x8bd   :  { %7943 = vmatprep.subr.bf16.mxu0 %v11092_v39 }
 0x8c0   :  { %7945 = vmatpush3.bf16.msra.mxu0 %v10460_v26 }
 0x8c1   :  { %7946 = vmatprep.subr.bf16.mxu0 %v11092_v39 }
 0x8c4   :  { %7948 = vmatpush3.bf16.msra.mxu0 %v10481_v27 }
 0x8c5   :  { %7949 = vmatprep.subr.bf16.mxu0 %v11092_v39 }
 0x8c8   :  { %7951 = vmatpush3.bf16.msra.mxu0 %v10500_v14 }
 0x8c9   :  { %7952 = vmatprep.subr.bf16.mxu0 %v11092_v39 }
 0x8cc   :  { %7954 = vmatpush3.bf16.msra.mxu0 %v10515_v12 }
 0x8cf   :  { %7521 = vmatmul.mubr.f32.vlgmr.msra.gmra.mrb[32].mxu0 %v9515_v0 }
 0x9a2   :  { %v5646_v46 = vpop.f32.mrb[32].mxu0 }
 0x9a3   :  { %v7956_v24 = vadd.f32 %v5646_v46, %v10441_v44  ;;  %v7522_v9 = vpop.f32.mrb[33].mxu0 }
 0x9a5   :  { %v5650_v18 = vmul.f32 %v7956_v24, %v7956_v24 }
 0x9a7   :  { %v5651_v55 = vsel %vm2901_vm3, %v5650_v18, 0.0 }
 0x9a8   :  { %v5652_v10 = vrot.slane %v5651_v55, 4 }
 0x9aa   :  { %v5653_v32 = vadd.f32 %v5652_v10, %v5651_v55 }
 0x9ac   :  { %v5654_v47 = vrot.slane %v5653_v32, 2 }
 0x9ae   :  { %v5655_v36 = vadd.f32 %v5654_v47, %v5653_v32 }
 0x9b0   :  { %v5656_v34 = vrot.slane %v5655_v36, 1 }
 0x9b2   :  { %v5657_v58 = vadd.f32 %v5656_v34, %v5655_v36 }
 0x9b4   :  { %v5658_v28 = vmax.f32 %v5657_v58, 1e-24 }
 0x9b6   :  { %8442 = vrsqrt.f32 %v5658_v28 }
 0x9c0   :  { %v8443_v39 = vpop.eup %8442 }
 0x9c1   :  { %v5660_v20 = vmul.f32 %v8443_v39, %v7956_v24 }
 0x9c3   :  { %v5661_v0 = vmul.f32 %v5660_v20, %v10571_v8 }
 0x9c5   :  { %5663 = vst.msk [vmem:[#allocation3 + $0x4] sm:$0xf] %vm2901_vm3, %v5661_v0 }
 0x9c6   :  { %8455 = shalt.err (!%p8452_p4)
}
 0x9c7   :  { %s8456_s12 = scalar_lea.hbm %s10677_s5, 128 }
 0x9c8   :  { %p8457_p5 = scmp.ne.s32.totalorder %s10677_s5, %s8456_s12  ;;  %p8460_p6 = scmp.lt.u32.totalorder %s8456_s12, %s10677_s5 }
 0x9ca   :  { %p8462_p7 = pnand %p8460_p6, %p8457_p5 }
 0x9cc   :  { %8465 = shalt.err (!%p8462_p7)
}
 0x9cd   :  { %s8479_s17 = smov 64   ;;  %s8480_s18 = smov 4  }
 0x9ce   :  { %5675 = dma.vmem_to_hbm [thread:$0]  %s5670_s4, 128, %s10677_s5, [#allocation4], %s8479_s17, %s8479_s17, %s8480_s18  }
 0x9cf   :  { %8466 = dma.done.wait [#allocation4], 128  }
 0x9d0   :  { %8467 = vsyncadd [#allocation4], 4294967168 }
 0x9d1   :  { %5679 = vsyncpa [#allocation4], 1 }

</bundles_post_ra>
